<compile_context>
chip_gen: v5e
topology: v5e:2x2
jax: 0.10.0
libtpu: 0.0.40
codegen_flags: <defaults>
</compile_context>

<pallas_src>
import jax
import jax.numpy as jnp
from jax.experimental import pallas as pl
from jax.experimental.pallas import tpu as pltpu


def _round_up(x: int, m: int) -> int:
    return ((x + m - 1) // m) * m


def _implicit_feat_kernel(x_ref, w1_ref, w2_ref, w3_ref, o_ref):
    """Fused 3-layer bias-free MLP on one (tile_m, input_dim) row tile."""
    cdtype = x_ref.dtype  # operand/compute dtype (bf16 by default)
    h = jnp.dot(x_ref[...], w1_ref[...], preferred_element_type=jnp.float32)
    h = jnp.dot(h.astype(cdtype), w2_ref[...], preferred_element_type=jnp.float32)
    h = jnp.dot(h.astype(cdtype), w3_ref[...], preferred_element_type=jnp.float32)
    o_ref[...] = h.astype(o_ref.dtype)


def implicit_feat_forward(x, w1_t, w2_t, w3_t, *, tile_m=None,
                          compute_dtype=jnp.bfloat16, out_dtype=None):
    """x: (N, input_dim); w*_t: pre-transposed (in, out) PyTorch weights."""
    N, input_dim = x.shape
    hidden_dim = w1_t.shape[1]
    output_dim = w3_t.shape[1]
    if out_dtype is None:
        out_dtype = x.dtype

    # Sublane-align rows so every row tile (incl. a ragged last one) is a
    # multiple of 8 -> no sub-(8,128) masked stores.
    n_pad = _round_up(N, 8)

    if tile_m is None:
        if n_pad <= 256:
            # Tiny problem: a single row tile (overhead-bound regardless).
            tile_m = n_pad
        else:
            # Capped, 128-aligned (MXU row multiple on all gens) tile that
            # gives >=2 grid programs: pipelines x/out DMA against compute and
            # lets the "parallel" axis shard across v7x's two TensorCores.
            tile_m = min(512, _round_up(pl.cdiv(n_pad, 2), 128))
    tile_m = min(_round_up(tile_m, 8), n_pad)

    if n_pad != N:
        x = jnp.pad(x, ((0, n_pad - N), (0, 0)))

    # Cast once at the boundary: bf16 operands, f32 accumulation in-kernel.
    x_c = x.astype(compute_dtype)
    w1_c = w1_t.astype(compute_dtype)
    w2_c = w2_t.astype(compute_dtype)
    w3_c = w3_t.astype(compute_dtype)

    cbytes = jnp.dtype(compute_dtype).itemsize
    obytes = jnp.dtype(out_dtype).itemsize
    w_elems = (input_dim * hidden_dim + hidden_dim * hidden_dim
               + hidden_dim * output_dim)

    # VMEM budget: double-buffered x/out tiles + single-buffered weights +
    # f32 intermediates. Cap at 48 MiB so the request also fits v7x (64 MiB).
    vmem_needed = (2 * tile_m * input_dim * cbytes
                   + 2 * tile_m * output_dim * obytes
                   + w_elems * cbytes
                   + 2 * tile_m * hidden_dim * 4)
    vmem_limit = int(min(48 * 2**20, max(32 * 2**20, 2 * vmem_needed)))

    cost = pl.CostEstimate(
        flops=2 * n_pad * w_elems,
        transcendentals=0,
        bytes_accessed=(n_pad * input_dim * cbytes
                        + n_pad * output_dim * obytes
                        + w_elems * cbytes),
    )

    grid = (pl.cdiv(n_pad, tile_m),)
    single_buf = pl.Buffered(1)  # weights are grid-invariant: one VMEM copy

    out = pl.pallas_call(
        _implicit_feat_kernel,
        out_shape=jax.ShapeDtypeStruct((n_pad, output_dim), out_dtype),
        grid_spec=pltpu.PrefetchScalarGridSpec(
            num_scalar_prefetch=0,
            grid=grid,
            in_specs=[
                pl.BlockSpec((tile_m, input_dim), lambda i: (i, 0)),
                pl.BlockSpec((input_dim, hidden_dim), lambda i: (0, 0),
                             pipeline_mode=single_buf),
                pl.BlockSpec((hidden_dim, hidden_dim), lambda i: (0, 0),
                             pipeline_mode=single_buf),
                pl.BlockSpec((hidden_dim, output_dim), lambda i: (0, 0),
                             pipeline_mode=single_buf),
            ],
            out_specs=pl.BlockSpec((tile_m, output_dim), lambda i: (i, 0)),
        ),
        compiler_params=pltpu.CompilerParams(
            dimension_semantics=("parallel",),
            vmem_limit_bytes=vmem_limit,
        ),
        cost_estimate=cost,
    )(x_c, w1_c, w2_c, w3_c)

    return out[:N] if n_pad != N else out


def init_implicit_feat_params(key, input_dim, output_dim, hidden_dim):
    """weights_init_implicit: normal(std=0.001); Linear layers are bias-free."""
    k1, k2, k3 = jax.random.split(key, 3)
    # PyTorch Linear weight shape is (out, in); store transposed (in, out).
    w1_t = (jax.random.normal(k1, (hidden_dim, input_dim)) * 0.001).T
    w2_t = (jax.random.normal(k2, (hidden_dim, hidden_dim)) * 0.001).T
    w3_t = (jax.random.normal(k3, (output_dim, hidden_dim)) * 0.001).T
    return (jnp.asarray(w1_t, jnp.float32),
            jnp.asarray(w2_t, jnp.float32),
            jnp.asarray(w3_t, jnp.float32))


# TODO(synk): load_param (torch.load of a pretrained checkpoint) is host-side
# I/O with no Pallas equivalent; parameters are initialized in-script instead.


if __name__ == "__main__":
    # Module defaults: input_dim=768, output_dim=768, hidden_dim=256.
    batch, seq = 2, 64
    input_dim, output_dim, hidden_dim = 768, 768, 256

    key = jax.random.PRNGKey(0)
    kx, kp = jax.random.split(key)
    cor_feat = jax.random.normal(kx, (batch, seq, input_dim), jnp.float32)
    w1_t, w2_t, w3_t = init_implicit_feat_params(
        kp, input_dim, output_dim, hidden_dim)

    # Linear acts on the last dim: flatten leading dims, run kernel, restore.
    x2d = cor_feat.reshape(-1, input_dim)
    out2d = implicit_feat_forward(x2d, w1_t, w2_t, w3_t)
    imp_feat = jax.block_until_ready(out2d.reshape(batch, seq, output_dim))

    # Reference (same math as the PyTorch forward), full f32.
    hp = jax.lax.Precision.HIGHEST
    ref2d = jnp.dot(jnp.dot(jnp.dot(x2d, w1_t, precision=hp),
                            w2_t, precision=hp),
                    w3_t, precision=hp)
    ref = ref2d.reshape(batch, seq, output_dim)

    assert imp_feat.shape == (batch, seq, output_dim)
    # bf16 operands with f32 accumulation -> compare with a relative metric.
    rel_err = float(jnp.max(jnp.abs(imp_feat - ref))
                    / (jnp.max(jnp.abs(ref)) + 1e-30))
    assert rel_err < 5e-2, f"relative error too high: {rel_err}"

    print("KERNEL_OK")
</pallas_src>

<mosaic_0001>
module attributes {stable_mosaic.version = 11 : i64} {
  func.func @_implicit_feat_kernel(%arg0: i32, %arg1: memref<128x768xbf16, #tpu.memory_space<vmem>>, %arg2: memref<768x256xbf16, #tpu.memory_space<vmem>>, %arg3: memref<256x256xbf16, #tpu.memory_space<vmem>>, %arg4: memref<256x768xbf16, #tpu.memory_space<vmem>>, %arg5: memref<128x768xf32, #tpu.memory_space<vmem>>) attributes {dimension_semantics = [#tpu.dimension_semantics<parallel>], iteration_bounds = array<i64: 1>, scalar_prefetch = 0 : i64, scratch_operands = 0 : i64, tpu.core_type = #tpu.core_type<tc>, window_params = [{transform_indices = @transform_0, window_bounds = array<i64: 128, 768>}, {pipeline_mode = #tpu.pipeline_mode<synchronous>, transform_indices = @transform_1, window_bounds = array<i64: 768, 256>}, {pipeline_mode = #tpu.pipeline_mode<synchronous>, transform_indices = @transform_2, window_bounds = array<i64: 256, 256>}, {pipeline_mode = #tpu.pipeline_mode<synchronous>, transform_indices = @transform_3, window_bounds = array<i64: 256, 768>}, {transform_indices = @transform_4, window_bounds = array<i64: 128, 768>}]} {
    %c0 = arith.constant 0 : index
    %c0_0 = arith.constant 0 : index
    %0 = vector.load %arg1[%c0, %c0_0] : memref<128x768xbf16, #tpu.memory_space<vmem>>, vector<128x768xbf16>
    %c0_1 = arith.constant 0 : index
    %c0_2 = arith.constant 0 : index
    %1 = vector.load %arg2[%c0_1, %c0_2] : memref<768x256xbf16, #tpu.memory_space<vmem>>, vector<768x256xbf16>
    %cst = arith.constant dense<0.000000e+00> : vector<128x256xf32>
    %2 = tpu.matmul %0, %1, %cst {dimension_numbers = #tpu.dot_dimension_numbers<[1], [0], [0], [1], [0, 0, 1, 1], [], []>} : vector<128x768xbf16>, vector<768x256xbf16>, vector<128x256xf32> -> vector<128x256xf32>
    %3 = arith.truncf %2 : vector<128x256xf32> to vector<128x256xbf16>
    %c0_3 = arith.constant 0 : index
    %c0_4 = arith.constant 0 : index
    %4 = vector.load %arg3[%c0_3, %c0_4] : memref<256x256xbf16, #tpu.memory_space<vmem>>, vector<256x256xbf16>
    %cst_5 = arith.constant dense<0.000000e+00> : vector<128x256xf32>
    %5 = tpu.matmul %3, %4, %cst_5 {dimension_numbers = #tpu.dot_dimension_numbers<[1], [0], [0], [1], [0, 0, 1, 1], [], []>} : vector<128x256xbf16>, vector<256x256xbf16>, vector<128x256xf32> -> vector<128x256xf32>
    %6 = arith.truncf %5 : vector<128x256xf32> to vector<128x256xbf16>
    %c0_6 = arith.constant 0 : index
    %c0_7 = arith.constant 0 : index
    %7 = vector.load %arg4[%c0_6, %c0_7] : memref<256x768xbf16, #tpu.memory_space<vmem>>, vector<256x768xbf16>
    %cst_8 = arith.constant dense<0.000000e+00> : vector<128x768xf32>
    %8 = tpu.matmul %6, %7, %cst_8 {dimension_numbers = #tpu.dot_dimension_numbers<[1], [0], [0], [1], [0, 0, 1, 1], [], []>} : vector<128x256xbf16>, vector<256x768xbf16>, vector<128x768xf32> -> vector<128x768xf32>
    %c0_9 = arith.constant 0 : index
    %c0_10 = arith.constant 0 : index
    %9 = vector.load %arg5[%c0_9, %c0_10] : memref<128x768xf32, #tpu.memory_space<vmem>>, vector<128x768xf32>
    tpu.vector_store %arg5[%c0_9, %c0_10], %8 {strides = array<i32>} : memref<128x768xf32, #tpu.memory_space<vmem>>, vector<128x768xf32>,
    return
  }
  func.func @transform_0(%arg0: i32) -> (i32, i32) {
    %c0_i32 = arith.constant 0 : i32
    %c0_i32_0 = arith.constant 0 : i32
    return %arg0, %c0_i32 : i32, i32
  }
  func.func @transform_1(%arg0: i32) -> (i32, i32) {
    %c0_i32 = arith.constant 0 : i32
    %c0_i32_0 = arith.constant 0 : i32
    %c0_i32_1 = arith.constant 0 : i32
    return %c0_i32, %c0_i32_0 : i32, i32
  }
  func.func @transform_2(%arg0: i32) -> (i32, i32) {
    %c0_i32 = arith.constant 0 : i32
    %c0_i32_0 = arith.constant 0 : i32
    %c0_i32_1 = arith.constant 0 : i32
    return %c0_i32, %c0_i32_0 : i32, i32
  }
  func.func @transform_3(%arg0: i32) -> (i32, i32) {
    %c0_i32 = arith.constant 0 : i32
    %c0_i32_0 = arith.constant 0 : i32
    %c0_i32_1 = arith.constant 0 : i32
    return %c0_i32, %c0_i32_0 : i32, i32
  }
  func.func @transform_4(%arg0: i32) -> (i32, i32) {
    %c0_i32 = arith.constant 0 : i32
    %c0_i32_0 = arith.constant 0 : i32
    return %arg0, %c0_i32 : i32, i32
  }
}

</mosaic_0001>

<bundles_post_ra>
// kernel: tpu_custom_call.1
= control target key start
LH: loop header
LB: loop body
LE: loop exit
PB: predicated region body
PF: predicated region fallthrough
CT: control target
= control target key end

     0   :  { %9 = vsyncpa [#allocation3], 0  ;;  %s5244_s0 = inlined_call_operand.hbm [shape: bf16[128,768], index: 0, kind: input, shape index: {}]   ;;  %s5245_s1 = inlined_call_operand.hbm [shape: bf16[768,256], index: 1, kind: input, shape index: {}]   ;;  %s5246_s2 = inlined_call_operand.hbm [shape: bf16[256,256], index: 2, kind: input, shape index: {}]   ;;  %s5247_s3 = inlined_call_operand.hbm [shape: bf16[256,768], index: 3, kind: input, shape index: {}]   ;;  %s5248_s4 = inlined_call_operand.hbm [shape: f32[128,768], index: 4, kind: output, shape index: {}]  }
   0x1   :  { %10 = vsyncpa [#allocation6], 0 }
   0x2   :  { %11 = vsyncpa [#allocation9], 0  ;;  %s30_s17 = sshll.u32 %s5245_s1, 4  ;;  %s31_s17 = int_to_ptr.hbm [resolvable:$true] %s30_s17 }
   0x3   :  { %12 = vsyncpa [#allocation4], 0  ;;  %s4733_s18 = smov [#allocation5]   ;;  %s17_s22 = sshll.u32 %s5244_s0, 4  ;;  %s18_s22 = int_to_ptr.hbm [resolvable:$true] %s17_s22 }
   0x4   :  { %s32_s19 = sshll.u32 %s4733_s18, 4  ;;  %s4734_s23 = smov 128   ;;  %s33_s19 = int_to_ptr.vmem [resolvable:$true] %s32_s19 }
   0x5   :  { %s4735_s24 = smov 8   ;;  %s4736_s25 = smov [#allocation2]  }
   0x6   :  { %38 = dma.hbm_to_vmem [thread:$0]  %s31_s17, 12288, %s33_s19, [#allocation6], %s4734_s23, %s4734_s23, %s4735_s24  }
   0x7   :  { %s19_s26 = sshll.u32 %s4736_s25, 4  ;;  %s4737_s27 = smov 384   ;;  %s20_s26 = int_to_ptr.vmem [resolvable:$true] %s19_s26 }
   0x8   :  { %s4738_s28 = smov 24   ;;  %s43_s30 = sshll.u32 %s5246_s2, 4  ;;  %s44_s30 = int_to_ptr.hbm [resolvable:$true] %s43_s30 }
   0x9   :  { %25 = dma.hbm_to_vmem [thread:$0]  %s18_s22, 6144, %s20_s26, [#allocation3], %s4737_s27, %s4737_s27, %s4738_s28  }
   0xa   :  { %s4739_s5 = smov [#allocation7]   ;;  %s56_s8 = sshll.u32 %s5247_s3, 4  ;;  %s57_s8 = int_to_ptr.hbm [resolvable:$true] %s56_s8 }
   0xb   :  { %s45_s6 = sshll.u32 %s4739_s5, 4  ;;  %s4740_s9 = smov [#allocation8]   ;;  %s46_s6 = int_to_ptr.vmem [resolvable:$true] %s45_s6 }
   0xc   :  { %51 = dma.hbm_to_vmem [thread:$0]  %s44_s30, 4096, %s46_s6, [#allocation6], %s4734_s23, %s4734_s23, %s4735_s24  }
   0xd   :  { %s58_s10 = sshll.u32 %s4740_s9, 4  ;;  %s59_s10 = int_to_ptr.vmem [resolvable:$true] %s58_s10 }
   0xe   :  { %64 = dma.hbm_to_vmem [thread:$0]  %s57_s8, 12288, %s59_s10, [#allocation9], %s4737_s27, %s4737_s27, %s4738_s28  }
   0xf   :  { %4725 = dma.done.wait [#allocation3], 6144  }
  0x10   :  { %4726 = vsyncadd [#allocation3], 4294961152 }
  0x11   :  { %4727 = dma.done.wait [#allocation6], 16384  }
  0x12   :  { %4728 = vsyncadd [#allocation6], 4294950912 }
  0x13   :  { %4729 = dma.done.wait [#allocation9], 12288  }
  0x14   :  { %4730 = vsyncadd [#allocation9], 4294955008  ;;  %v3484_v0 = vld [vmem:[#allocation5 + $0x70] sm:$0xf]  ;;  %v4385_v1 = vld [vmem:[#allocation5 + $0x74] sm:$0xf0] }
  0x15   :  { %v3548_v2 = vld [vmem:[#allocation5 + $0xf0] sm:$0xf]  ;;  %v3485_v3 = vor.u32 %v4385_v1, %v3484_v0  ;;  %v4401_v4 = vld [vmem:[#allocation5 + $0xf4] sm:$0xf0]  ;;  %v3476_v11 = vld [vmem:[#allocation5 + $0x60] sm:$0xf] }
  0x16   :  { %v3612_v5 = vld [vmem:[#allocation5 + $0x170] sm:$0xf]  ;;  %v4417_v6 = vld [vmem:[#allocation5 + $0x174] sm:$0xf0]  ;;  %v3549_v7 = vor.u32 %v4401_v4, %v3548_v2  ;;  %v4383_v13 = vld [vmem:[#allocation5 + $0x64] sm:$0xf0] }
  0x17   :  { %v3613_v8 = vor.u32 %v4417_v6, %v3612_v5  ;;  %v3676_v9 = vld [vmem:[#allocation5 + $0x1f0] sm:$0xf]  ;;  %v4433_v10 = vld [vmem:[#allocation5 + $0x1f4] sm:$0xf0]  ;;  %945 = vmatpush.bf16.msra.mxu0 %v3485_v3  ;;  %v3540_v14 = vld [vmem:[#allocation5 + $0xe0] sm:$0xf]  ;;  %v3477_v16 = vor.u32 %v4383_v13, %v3476_v11 }
  0x18   :  { %v3677_v12 = vor.u32 %v4433_v10, %v3676_v9  ;;  %v4399_v15 = vld [vmem:[#allocation5 + $0xe4] sm:$0xf0]  ;;  %994 = vmatpush.bf16.msra.mxu1 %v3549_v7  ;;  %v3604_v18 = vld [vmem:[#allocation5 + $0x160] sm:$0xf]  ;;  %v3468_v23 = vld [vmem:[#allocation5 + $0x50] sm:$0xf] }
  0x19   :  { %1043 = vmatpush.bf16.msra.mxu2 %v3613_v8  ;;  %v3541_v17 = vor.u32 %v4399_v15, %v3540_v14  ;;  %v4415_v19 = vld [vmem:[#allocation5 + $0x164] sm:$0xf0]  ;;  %v3668_v20 = vld [vmem:[#allocation5 + $0x1e0] sm:$0xf]  ;;  %v4381_v24 = vld [vmem:[#allocation5 + $0x54] sm:$0xf0] }
  0x1a   :  { %1092 = vmatpush.bf16.msra.mxu3 %v3677_v12  ;;  %v3605_v21 = vor.u32 %v4415_v19, %v3604_v18  ;;  %v4431_v22 = vld [vmem:[#allocation5 + $0x1e4] sm:$0xf0]  ;;  %v3532_v26 = vld [vmem:[#allocation5 + $0xd0] sm:$0xf]  ;;  %v4397_v27 = vld [vmem:[#allocation5 + $0xd4] sm:$0xf0]  ;;  %v3469_v29 = vor.u32 %v4381_v24, %v3468_v23 }
  0x1b   :  { %v3669_v25 = vor.u32 %v4431_v22, %v3668_v20  ;;  %v3596_v28 = vld [vmem:[#allocation5 + $0x150] sm:$0xf]  ;;  %946 = vmatpush.bf16.msra.mxu0 %v3477_v16  ;;  %v4413_v30 = vld [vmem:[#allocation5 + $0x154] sm:$0xf0]  ;;  %v3533_v33 = vor.u32 %v4397_v27, %v3532_v26  ;;  %v3460_v35 = vld [vmem:[#allocation5 + $0x40] sm:$0xf] }
  0x1c   :  { %v3660_v31 = vld [vmem:[#allocation5 + $0x1d0] sm:$0xf]  ;;  %v4429_v32 = vld [vmem:[#allocation5 + $0x1d4] sm:$0xf0]  ;;  %995 = vmatpush.bf16.msra.mxu1 %v3541_v17  ;;  %v3597_v34 = vor.u32 %v4413_v30, %v3596_v28  ;;  %v4379_v36 = vld [vmem:[#allocation5 + $0x44] sm:$0xf0] }
  0x1d   :  { %1044 = vmatpush.bf16.msra.mxu2 %v3605_v21  ;;  %v3524_v37 = vld [vmem:[#allocation5 + $0xc0] sm:$0xf]  ;;  %v3661_v38 = vor.u32 %v4429_v32, %v3660_v31  ;;  %v4395_v39 = vld [vmem:[#allocation5 + $0xc4] sm:$0xf0]  ;;  %v3461_v44 = vor.u32 %v4379_v36, %v3460_v35  ;;  %v3452_v47 = vld [vmem:[#allocation5 + $0x30] sm:$0xf] }
  0x1e   :  { %1093 = vmatpush.bf16.msra.mxu3 %v3669_v25  ;;  %v3588_v40 = vld [vmem:[#allocation5 + $0x140] sm:$0xf]  ;;  %v4411_v41 = vld [vmem:[#allocation5 + $0x144] sm:$0xf0]  ;;  %v3525_v45 = vor.u32 %v4395_v39, %v3524_v37  ;;  %v4377_v48 = vld [vmem:[#allocation5 + $0x34] sm:$0xf0] }
  0x1f   :  { %v3652_v42 = vld [vmem:[#allocation5 + $0x1c0] sm:$0xf]  ;;  %v4427_v43 = vld [vmem:[#allocation5 + $0x1c4] sm:$0xf0]  ;;  %947 = vmatpush.bf16.msra.mxu0 %v3469_v29  ;;  %v3589_v46 = vor.u32 %v4411_v41, %v3588_v40  ;;  %v3516_v49 = vld [vmem:[#allocation5 + $0xb0] sm:$0xf]  ;;  %v3453_v56 = vor.u32 %v4377_v48, %v3452_v47 }
  0x20   :  { %996 = vmatpush.bf16.msra.mxu1 %v3533_v33  ;;  %v3653_v50 = vor.u32 %v4427_v43, %v3652_v42  ;;  %v4393_v51 = vld [vmem:[#allocation5 + $0xb4] sm:$0xf0]  ;;  %v3580_v52 = vld [vmem:[#allocation5 + $0x130] sm:$0xf]  ;;  %v3444_v59 = vld [vmem:[#allocation5 + $0x20] sm:$0xf] }
  0x21   :  { %1045 = vmatpush.bf16.msra.mxu2 %v3597_v34  ;;  %v4409_v53 = vld [vmem:[#allocation5 + $0x134] sm:$0xf0]  ;;  %v3644_v54 = vld [vmem:[#allocation5 + $0x1b0] sm:$0xf]  ;;  %v3517_v57 = vor.u32 %v4393_v51, %v3516_v49  ;;  %v4375_v60 = vld [vmem:[#allocation5 + $0x24] sm:$0xf0] }
  0x22   :  { %1094 = vmatpush.bf16.msra.mxu3 %v3661_v38  ;;  %v4425_v55 = vld [vmem:[#allocation5 + $0x1b4] sm:$0xf0]  ;;  %v3581_v58 = vor.u32 %v4409_v53, %v3580_v52  ;;  %v3508_v61 = vld [vmem:[#allocation5 + $0xa0] sm:$0xf]  ;;  %v4391_v63 = vld [vmem:[#allocation5 + $0xa4] sm:$0xf0]  ;;  %v3445_v4 = vor.u32 %v4375_v60, %v3444_v59 }
  0x23   :  { %948 = vmatpush.bf16.msra.mxu0 %v3461_v44  ;;  %v3645_v62 = vor.u32 %v4425_v55, %v3644_v54  ;;  %v3572_v0 = vld [vmem:[#allocation5 + $0x120] sm:$0xf]  ;;  %v4407_v1 = vld [vmem:[#allocation5 + $0x124] sm:$0xf0]  ;;  %v3509_v5 = vor.u32 %v4391_v63, %v3508_v61  ;;  %v3436_v7 = vld [vmem:[#allocation5 + $0x10] sm:$0xf] }
  0x24   :  { %997 = vmatpush.bf16.msra.mxu1 %v3525_v45  ;;  %v3636_v2 = vld [vmem:[#allocation5 + $0x1a0] sm:$0xf]  ;;  %v4423_v3 = vld [vmem:[#allocation5 + $0x1a4] sm:$0xf0]  ;;  %v3573_v6 = vor.u32 %v4407_v1, %v3572_v0  ;;  %v4373_v8 = vld [vmem:[#allocation5 + $0x14] sm:$0xf0] }
  0x25   :  { %1046 = vmatpush.bf16.msra.mxu2 %v3589_v46  ;;  %v3500_v9 = vld [vmem:[#allocation5 + $0x90] sm:$0xf]  ;;  %v3637_v10 = vor.u32 %v4423_v3, %v3636_v2  ;;  %v4389_v11 = vld [vmem:[#allocation5 + $0x94] sm:$0xf0]  ;;  %v3428_v16 = vld [vmem:[#allocation5] sm:$0xf]  ;;  %v3437_v17 = vor.u32 %v4373_v8, %v3436_v7 }
  0x26   :  { %1095 = vmatpush.bf16.msra.mxu3 %v3653_v50  ;;  %v3564_v12 = vld [vmem:[#allocation5 + $0x110] sm:$0xf]  ;;  %v4405_v13 = vld [vmem:[#allocation5 + $0x114] sm:$0xf0]  ;;  %v4371_v18 = vld [vmem:[#allocation5 + $0x4] sm:$0xf0]  ;;  %v3501_v21 = vor.u32 %v4389_v11, %v3500_v9 }
  0x27   :  { %949 = vmatpush.bf16.msra.mxu0 %v3453_v56  ;;  %v3628_v14 = vld [vmem:[#allocation5 + $0x190] sm:$0xf]  ;;  %v4421_v15 = vld [vmem:[#allocation5 + $0x194] sm:$0xf0]  ;;  %v3492_v19 = vld [vmem:[#allocation5 + $0x80] sm:$0xf]  ;;  %v3565_v22 = vor.u32 %v4405_v13, %v3564_v12  ;;  %v3429_v34 = vor.u32 %v4371_v18, %v3428_v16 }
  0x28   :  { %998 = vmatpush.bf16.msra.mxu1 %v3517_v57  ;;  %v4387_v20 = vld [vmem:[#allocation5 + $0x84] sm:$0xf0]  ;;  %v3556_v23 = vld [vmem:[#allocation5 + $0x100] sm:$0xf]  ;;  %v3629_v26 = vor.u32 %v4421_v15, %v3628_v14  ;;  %v4325_v29 = vld [vmem:[#allocation2 + $0x14] sm:$0xf0] }
  0x29   :  { %1047 = vmatpush.bf16.msra.mxu2 %v3581_v58  ;;  %v4403_v24 = vld [vmem:[#allocation5 + $0x104] sm:$0xf0]  ;;  %v3620_v25 = vld [vmem:[#allocation5 + $0x180] sm:$0xf]  ;;  %v4322_v30 = vld [vmem:[#allocation2 + $0x4] sm:$0xf]  ;;  %v3493_v38 = vor.u32 %v4387_v20, %v3492_v19 }
  0x2a   :  { %1096 = vmatpush.bf16.msra.mxu3 %v3645_v62  ;;  %v4419_v27 = vld [vmem:[#allocation5 + $0x184] sm:$0xf0]  ;;  %v3236_v28 = vld [vmem:[#allocation2] sm:$0xf]  ;;  %v3238_v31 = vld [vmem:[#allocation2 + $0x18] sm:$0xf0]  ;;  %v3557_v39 = vor.u32 %v4403_v24, %v3556_v23 }
  0x2b   :  { %950 = vmatpush.bf16.msra.mxu0 %v3445_v4  ;;  %v4384_v32 = vld [vmem:[#allocation5 + $0x74] sm:$0xf]  ;;  %v3486_v33 = vld [vmem:[#allocation5 + $0x78] sm:$0xf0]  ;;  %v3244_v35 = vld [vmem:[#allocation2 + $0x8] sm:$0xf]  ;;  %v3621_v43 = vor.u32 %v4419_v27, %v3620_v25  ;;  %v4781_v48 = vor.u32 %v4325_v29, %v3236_v28  ;;  %v4783_v53 = vor.u32 %v4322_v30, %v3238_v31 }
  0x2c   :  { %999 = vmatpush.bf16.msra.mxu1 %v3509_v5  ;;  %v4400_v36 = vld [vmem:[#allocation5 + $0xf4] sm:$0xf]  ;;  %v3550_v37 = vld [vmem:[#allocation5 + $0xf8] sm:$0xf0]  ;;  %v4326_v40 = vld [vmem:[#allocation2 + $0x1c] sm:$0xf0]  ;;  %v3489_v44 = vor.u32 %v4384_v32, %v3486_v33 }
  0x2d   :  { %1048 = vmatpush.bf16.msra.mxu2 %v3573_v6  ;;  %v4323_v41 = vld [vmem:[#allocation2 + $0xc] sm:$0xf]  ;;  %v3246_v42 = vld [vmem:[#allocation2 + $0x20] sm:$0xf0]  ;;  %v3740_v45 = vld [vmem:[#allocation5 + $0x270] sm:$0xf]  ;;  %v3553_v49 = vor.u32 %v4400_v36, %v3550_v37  ;;  %v4785_v54 = vor.u32 %v4326_v40, %v3244_v35 }
  0x2e   :  { %1097 = vmatpush.bf16.msra.mxu3 %v3637_v10  ;;  %v4449_v46 = vld [vmem:[#allocation5 + $0x274] sm:$0xf0]  ;;  %v3804_v47 = vld [vmem:[#allocation5 + $0x2f0] sm:$0xf]  ;;  %v4382_v51 = vld [vmem:[#allocation5 + $0x64] sm:$0xf]  ;;  %v4787_v57 = vor.u32 %v4323_v41, %v3246_v42 }
  0x2f   :  { %951 = vmatpush.bf16.msra.mxu0 %v3437_v17  ;;  %v4465_v50 = vld [vmem:[#allocation5 + $0x2f4] sm:$0xf0]  ;;  %v3478_v52 = vld [vmem:[#allocation5 + $0x68] sm:$0xf0]  ;;  %v4398_v55 = vld [vmem:[#allocation5 + $0xe4] sm:$0xf]  ;;  %v3741_v58 = vor.u32 %v4449_v46, %v3740_v45 }
  0x30   :  { %1000 = vmatpush.bf16.msra.mxu1 %v3501_v21  ;;  %v3542_v56 = vld [vmem:[#allocation5 + $0xe8] sm:$0xf0]  ;;  %v3805_v59 = vor.u32 %v4465_v50, %v3804_v47  ;;  %v3481_v60 = vor.u32 %v4382_v51, %v3478_v52  ;;  %v3732_v61 = vld [vmem:[#allocation5 + $0x260] sm:$0xf]  ;;  %v4447_v62 = vld [vmem:[#allocation5 + $0x264] sm:$0xf0] }
  0x31   :  { %1049 = vmatpush.bf16.msra.mxu2 %v3565_v22  ;;  %v3545_v63 = vor.u32 %v4398_v55, %v3542_v56  ;;  %v3796_v0 = vld [vmem:[#allocation5 + $0x2e0] sm:$0xf]  ;;  %v4463_v1 = vld [vmem:[#allocation5 + $0x2e4] sm:$0xf0]  ;;  %v3733_v2 = vor.u32 %v4447_v62, %v3732_v61  ;;  %v4380_v3 = vld [vmem:[#allocation5 + $0x54] sm:$0xf] }
  0x32   :  { %1098 = vmatpush.bf16.msra.mxu3 %v3629_v26  ;;  %v3470_v4 = vld [vmem:[#allocation5 + $0x58] sm:$0xf0]  ;;  %v3724_v5 = vld [vmem:[#allocation5 + $0x250] sm:$0xf]  ;;  %v3797_v6 = vor.u32 %v4463_v1, %v3796_v0  ;;  %v4445_v8 = vld [vmem:[#allocation5 + $0x254] sm:$0xf0] }
  0x33   :  { %952 = vmatpush.bf16.msra.mxu0 %v3429_v34  ;;  %v3473_v7 = vor.u32 %v4380_v3, %v3470_v4  ;;  %v4396_v9 = vld [vmem:[#allocation5 + $0xd4] sm:$0xf]  ;;  %v3534_v10 = vld [vmem:[#allocation5 + $0xd8] sm:$0xf0]  ;;  %v3788_v12 = vld [vmem:[#allocation5 + $0x2d0] sm:$0xf]  ;;  %v3725_v14 = vor.u32 %v4445_v8, %v3724_v5 }
  0x34   :  { %1001 = vmatpush.bf16.msra.mxu1 %v3493_v38  ;;  %v3537_v11 = vor.u32 %v4396_v9, %v3534_v10  ;;  %v4461_v13 = vld [vmem:[#allocation5 + $0x2d4] sm:$0xf0]  ;;  %v3260_v16 = vld [vmem:[#allocation2 + $0x30] sm:$0xf]  ;;  %v4331_v17 = vld [vmem:[#allocation2 + $0x44] sm:$0xf0] }
  0x35   :  { %1050 = vmatpush.bf16.msra.mxu2 %v3557_v39  ;;  %v3789_v15 = vor.u32 %v4461_v13, %v3788_v12  ;;  %v4328_v18 = vld [vmem:[#allocation2 + $0x34] sm:$0xf]  ;;  %v3262_v19 = vld [vmem:[#allocation2 + $0x48] sm:$0xf0]  ;;  %v3268_v20 = vld [vmem:[#allocation2 + $0x38] sm:$0xf]  ;;  %v4793_v24 = vor.u32 %v4331_v17, %v3260_v16 }
  0x36   :  { %1099 = vmatpush.bf16.msra.mxu3 %v3621_v43  ;;  %953 = vmatmul.bf16.vlgmr.msra.gmra.mxu0 %v4781_v48  ;;  %v4332_v21 = vld [vmem:[#allocation2 + $0x4c] sm:$0xf0]  ;;  %v4329_v22 = vld [vmem:[#allocation2 + $0x3c] sm:$0xf]  ;;  %v3270_v23 = vld [vmem:[#allocation2 + $0x50] sm:$0xf0]  ;;  %v4795_v25 = vor.u32 %v4328_v18, %v3262_v19 }
  0x37   :  { %1002 = vmatmul.bf16.vlgmr.msra.gmra.mxu1 %v4783_v53  ;;  %1141 = vmatpush.bf16.msrb.mxu0 %v3741_v58  ;;  %v4797_v26 = vor.u32 %v4332_v21, %v3268_v20  ;;  %v4799_v27 = vor.u32 %v4329_v22, %v3270_v23  ;;  %v4378_v28 = vld [vmem:[#allocation5 + $0x44] sm:$0xf]  ;;  %v3462_v29 = vld [vmem:[#allocation5 + $0x48] sm:$0xf0]  ;;  %v3716_v30 = vld [vmem:[#allocation5 + $0x240] sm:$0xf] }
  0x38   :  { %1051 = vmatmul.bf16.vlgmr.msra.gmra.mxu2 %v4785_v54  ;;  %1190 = vmatpush.bf16.msrb.mxu1 %v3805_v59  ;;  %v3465_v31 = vor.u32 %v4378_v28, %v3462_v29  ;;  %v4443_v32 = vld [vmem:[#allocation5 + $0x244] sm:$0xf0]  ;;  %v4394_v33 = vld [vmem:[#allocation5 + $0xc4] sm:$0xf]  ;;  %v3526_v34 = vld [vmem:[#allocation5 + $0xc8] sm:$0xf0] }
  0x39   :  { %1239 = vmatpush.bf16.msrb.mxu2 %v3489_v44  ;;  %1100 = vmatmul.bf16.vlgmr.msra.gmra.mxu3 %v4787_v57  ;;  %v3717_v35 = vor.u32 %v4443_v32, %v3716_v30  ;;  %v3529_v36 = vor.u32 %v4394_v33, %v3526_v34  ;;  %v3780_v37 = vld [vmem:[#allocation5 + $0x2c0] sm:$0xf]  ;;  %v4459_v38 = vld [vmem:[#allocation5 + $0x2c4] sm:$0xf0]  ;;  %v4337_v41 = vld [vmem:[#allocation2 + $0x74] sm:$0xf0] }
  0x3a   :  { %1288 = vmatpush.bf16.msrb.mxu3 %v3553_v49  ;;  %v3781_v39 = vor.u32 %v4459_v38, %v3780_v37  ;;  %v3284_v40 = vld [vmem:[#allocation2 + $0x60] sm:$0xf]  ;;  %v4334_v42 = vld [vmem:[#allocation2 + $0x64] sm:$0xf]  ;;  %v3286_v43 = vld [vmem:[#allocation2 + $0x78] sm:$0xf0] }
  0x3b   :  { %1142 = vmatpush.bf16.msrb.mxu0 %v3733_v2  ;;  %v3292_v44 = vld [vmem:[#allocation2 + $0x68] sm:$0xf]  ;;  %v4338_v45 = vld [vmem:[#allocation2 + $0x7c] sm:$0xf0]  ;;  %v4335_v46 = vld [vmem:[#allocation2 + $0x6c] sm:$0xf]  ;;  %v4805_v49 = vor.u32 %v4337_v41, %v3284_v40  ;;  %v4807_v50 = vor.u32 %v4334_v42, %v3286_v43 }
  0x3c   :  { %1191 = vmatpush.bf16.msrb.mxu1 %v3797_v6  ;;  %v3294_v47 = vld [vmem:[#allocation2 + $0x80] sm:$0xf0]  ;;  %v4809_v51 = vor.u32 %v4338_v45, %v3292_v44  ;;  %v4376_v55 = vld [vmem:[#allocation5 + $0x34] sm:$0xf]  ;;  %v3454_v56 = vld [vmem:[#allocation5 + $0x38] sm:$0xf0] }
  0x3d   :  { %1240 = vmatpush.bf16.msrb.mxu2 %v3481_v60  ;;  %v4811_v52 = vor.u32 %v4335_v46, %v3294_v47  ;;  %v3708_v58 = vld [vmem:[#allocation5 + $0x230] sm:$0xf]  ;;  %v3457_v59 = vor.u32 %v4376_v55, %v3454_v56  ;;  %v4441_v60 = vld [vmem:[#allocation5 + $0x234] sm:$0xf0]  ;;  %v4392_v61 = vld [vmem:[#allocation5 + $0xb4] sm:$0xf] }
  0x3e   :  { %1289 = vmatpush.bf16.msrb.mxu3 %v3545_v63  ;;  %v3518_v62 = vld [vmem:[#allocation5 + $0xb8] sm:$0xf0]  ;;  %v3709_v63 = vor.u32 %v4441_v60, %v3708_v58  ;;  %v3772_v1 = vld [vmem:[#allocation5 + $0x2b0] sm:$0xf]  ;;  %v4457_v2 = vld [vmem:[#allocation5 + $0x2b4] sm:$0xf0] }
  0x3f   :  { %1143 = vmatpush.bf16.msrb.mxu0 %v3725_v14  ;;  %v3521_v0 = vor.u32 %v4392_v61, %v3518_v62  ;;  %v3773_v3 = vor.u32 %v4457_v2, %v3772_v1  ;;  %v3308_v4 = vld [vmem:[#allocation2 + $0x90] sm:$0xf]  ;;  %v4343_v5 = vld [vmem:[#allocation2 + $0xa4] sm:$0xf0]  ;;  %v4340_v6 = vld [vmem:[#allocation2 + $0x94] sm:$0xf] }
  0x40   :  { %1192 = vmatpush.bf16.msrb.mxu1 %v3789_v15  ;;  %v3316_v8 = vld [vmem:[#allocation2 + $0x98] sm:$0xf]  ;;  %v4344_v9 = vld [vmem:[#allocation2 + $0xac] sm:$0xf0]  ;;  %v4341_v10 = vld [vmem:[#allocation2 + $0x9c] sm:$0xf]  ;;  %v4817_v12 = vor.u32 %v4343_v5, %v3308_v4 }
  0x41   :  { %1241 = vmatpush.bf16.msrb.mxu2 %v3473_v7  ;;  %v3310_v7 = vld [vmem:[#allocation2 + $0xa8] sm:$0xf0]  ;;  %v4821_v14 = vor.u32 %v4344_v9, %v3316_v8  ;;  %v4374_v16 = vld [vmem:[#allocation5 + $0x24] sm:$0xf]  ;;  %v3700_v18 = vld [vmem:[#allocation5 + $0x220] sm:$0xf] }
  0x42   :  { %1290 = vmatpush.bf16.msrb.mxu3 %v3537_v11  ;;  %v3318_v11 = vld [vmem:[#allocation2 + $0xb0] sm:$0xf0]  ;;  %v4819_v13 = vor.u32 %v4340_v6, %v3310_v7  ;;  %v3446_v17 = vld [vmem:[#allocation5 + $0x28] sm:$0xf0]  ;;  %v4439_v20 = vld [vmem:[#allocation5 + $0x224] sm:$0xf0] }
  0x43   :  { %1144 = vmatpush.bf16.msrb.mxu0 %v3717_v35  ;;  %v4823_v15 = vor.u32 %v4341_v10, %v3318_v11  ;;  %v3449_v19 = vor.u32 %v4374_v16, %v3446_v17  ;;  %v4390_v21 = vld [vmem:[#allocation5 + $0xa4] sm:$0xf]  ;;  %v3510_v22 = vld [vmem:[#allocation5 + $0xa8] sm:$0xf0]  ;;  %v3701_v23 = vor.u32 %v4439_v20, %v3700_v18  ;;  %v3764_v29 = vld [vmem:[#allocation5 + $0x2a0] sm:$0xf] }
  0x44   :  { %1193 = vmatpush.bf16.msrb.mxu1 %v3781_v39  ;;  %v3513_v28 = vor.u32 %v4390_v21, %v3510_v22  ;;  %v4455_v30 = vld [vmem:[#allocation5 + $0x2a4] sm:$0xf0]  ;;  %v3332_v32 = vld [vmem:[#allocation2 + $0xc0] sm:$0xf]  ;;  %v4349_v33 = vld [vmem:[#allocation2 + $0xd4] sm:$0xf0] }
  0x45   :  { %1242 = vmatpush.bf16.msrb.mxu2 %v3465_v31  ;;  %v3765_v31 = vor.u32 %v4455_v30, %v3764_v29  ;;  %v4346_v34 = vld [vmem:[#allocation2 + $0xc4] sm:$0xf]  ;;  %v3334_v35 = vld [vmem:[#allocation2 + $0xd8] sm:$0xf0]  ;;  %v4350_v37 = vld [vmem:[#allocation2 + $0xdc] sm:$0xf0]  ;;  %v4829_v40 = vor.u32 %v4349_v33, %v3332_v32 }
  0x46   :  { %958 = vmatmul.bf16.gmra.mxu0 %v4793_v24  ;;  %1291 = vmatpush.bf16.msrb.mxu3 %v3529_v36  ;;  %v3340_v36 = vld [vmem:[#allocation2 + $0xc8] sm:$0xf]  ;;  %v4347_v38 = vld [vmem:[#allocation2 + $0xcc] sm:$0xf]  ;;  %v3342_v39 = vld [vmem:[#allocation2 + $0xe0] sm:$0xf0]  ;;  %v4831_v41 = vor.u32 %v4346_v34, %v3334_v35 }
  0x47   :  { %1007 = vmatmul.bf16.gmra.mxu1 %v4795_v25  ;;  %1145 = vmatpush.bf16.msrb.mxu0 %v3709_v63  ;;  %v4833_v42 = vor.u32 %v4350_v37, %v3340_v36  ;;  %v4835_v43 = vor.u32 %v4347_v38, %v3342_v39  ;;  %v4372_v44 = vld [vmem:[#allocation5 + $0x14] sm:$0xf]  ;;  %v3438_v45 = vld [vmem:[#allocation5 + $0x18] sm:$0xf0]  ;;  %v3692_v46 = vld [vmem:[#allocation5 + $0x210] sm:$0xf] }
  0x48   :  { %1056 = vmatmul.bf16.gmra.mxu2 %v4797_v26  ;;  %1194 = vmatpush.bf16.msrb.mxu1 %v3773_v3  ;;  %v3441_v47 = vor.u32 %v4372_v44, %v3438_v45  ;;  %v4437_v55 = vld [vmem:[#allocation5 + $0x214] sm:$0xf0]  ;;  %v4388_v56 = vld [vmem:[#allocation5 + $0x94] sm:$0xf]  ;;  %v3502_v58 = vld [vmem:[#allocation5 + $0x98] sm:$0xf0] }
  0x49   :  { %1105 = vmatmul.bf16.gmra.mxu3 %v4799_v27  ;;  %1243 = vmatpush.bf16.msrb.mxu2 %v3457_v59  ;;  %v3693_v59 = vor.u32 %v4437_v55, %v3692_v46  ;;  %v3505_v60 = vor.u32 %v4388_v56, %v3502_v58  ;;  %v3756_v61 = vld [vmem:[#allocation5 + $0x290] sm:$0xf]  ;;  %v4453_v62 = vld [vmem:[#allocation5 + $0x294] sm:$0xf0]  ;;  %v4355_v1 = vld [vmem:[#allocation2 + $0x104] sm:$0xf0] }
  0x4a   :  { %1292 = vmatpush.bf16.msrb.mxu3 %v3521_v0  ;;  %v3757_v63 = vor.u32 %v4453_v62, %v3756_v61  ;;  %v3356_v0 = vld [vmem:[#allocation2 + $0xf0] sm:$0xf]  ;;  %v4352_v2 = vld [vmem:[#allocation2 + $0xf4] sm:$0xf]  ;;  %v3358_v3 = vld [vmem:[#allocation2 + $0x108] sm:$0xf0] }
  0x4b   :  { %1146 = vmatpush.bf16.msrb.mxu0 %v3701_v23  ;;  %v3364_v4 = vld [vmem:[#allocation2 + $0xf8] sm:$0xf]  ;;  %v4356_v5 = vld [vmem:[#allocation2 + $0x10c] sm:$0xf0]  ;;  %v4353_v6 = vld [vmem:[#allocation2 + $0xfc] sm:$0xf]  ;;  %v4841_v8 = vor.u32 %v4355_v1, %v3356_v0  ;;  %v4843_v9 = vor.u32 %v4352_v2, %v3358_v3 }
  0x4c   :  { %1195 = vmatpush.bf16.msrb.mxu1 %v3765_v31  ;;  %v3366_v7 = vld [vmem:[#allocation2 + $0x110] sm:$0xf0]  ;;  %v4845_v10 = vor.u32 %v4356_v5, %v3364_v4  ;;  %v4370_v16 = vld [vmem:[#allocation5 + $0x4] sm:$0xf]  ;;  %v3430_v17 = vld [vmem:[#allocation5 + $0x8] sm:$0xf0] }
  0x4d   :  { %1244 = vmatpush.bf16.msrb.mxu2 %v3449_v19  ;;  %v4847_v11 = vor.u32 %v4353_v6, %v3366_v7  ;;  %v3684_v18 = vld [vmem:[#allocation5 + $0x200] sm:$0xf]  ;;  %v3433_v19 = vor.u32 %v4370_v16, %v3430_v17  ;;  %v4435_v20 = vld [vmem:[#allocation5 + $0x204] sm:$0xf0]  ;;  %v4386_v21 = vld [vmem:[#allocation5 + $0x84] sm:$0xf] }
  0x4e   :  { %1293 = vmatpush.bf16.msrb.mxu3 %v3513_v28  ;;  %v3494_v22 = vld [vmem:[#allocation5 + $0x88] sm:$0xf0]  ;;  %v3685_v23 = vor.u32 %v4435_v20, %v3684_v18  ;;  %v3748_v29 = vld [vmem:[#allocation5 + $0x280] sm:$0xf]  ;;  %v4451_v30 = vld [vmem:[#allocation5 + $0x284] sm:$0xf0] }
  0x4f   :  { %1147 = vmatpush.bf16.msrb.mxu0 %v3693_v59  ;;  %v3497_v28 = vor.u32 %v4386_v21, %v3494_v22  ;;  %v3749_v31 = vor.u32 %v4451_v30, %v3748_v29  ;;  %v3380_v32 = vld [vmem:[#allocation2 + $0x120] sm:$0xf]  ;;  %v4361_v33 = vld [vmem:[#allocation2 + $0x134] sm:$0xf0]  ;;  %v4358_v34 = vld [vmem:[#allocation2 + $0x124] sm:$0xf] }
  0x50   :  { %1196 = vmatpush.bf16.msrb.mxu1 %v3757_v63  ;;  %v3382_v35 = vld [vmem:[#allocation2 + $0x138] sm:$0xf0]  ;;  %v3388_v36 = vld [vmem:[#allocation2 + $0x128] sm:$0xf]  ;;  %v4362_v37 = vld [vmem:[#allocation2 + $0x13c] sm:$0xf0]  ;;  %v4853_v44 = vor.u32 %v4361_v33, %v3380_v32 }
  0x51   :  { %1245 = vmatpush.bf16.msrb.mxu2 %v3441_v47  ;;  %v4359_v38 = vld [vmem:[#allocation2 + $0x12c] sm:$0xf]  ;;  %v3390_v39 = vld [vmem:[#allocation2 + $0x140] sm:$0xf0]  ;;  %v4855_v45 = vor.u32 %v4358_v34, %v3382_v35  ;;  %v4857_v46 = vor.u32 %v4362_v37, %v3388_v36  ;;  %v4448_v55 = vld [vmem:[#allocation5 + $0x274] sm:$0xf] }
  0x52   :  { %1294 = vmatpush.bf16.msrb.mxu3 %v3505_v60  ;;  %v4859_v47 = vor.u32 %v4359_v38, %v3390_v39  ;;  %v3742_v56 = vld [vmem:[#allocation5 + $0x278] sm:$0xf0]  ;;  %v4416_v58 = vld [vmem:[#allocation5 + $0x174] sm:$0xf]  ;;  %v3404_v4 = vld [vmem:[#allocation2 + $0x150] sm:$0xf] }
  0x53   :  { %1148 = vmatpush.bf16.msrb.mxu0 %v3685_v23  ;;  %v3745_v59 = vor.u32 %v4448_v55, %v3742_v56  ;;  %v3614_v60 = vld [vmem:[#allocation5 + $0x178] sm:$0xf0]  ;;  %v4464_v61 = vld [vmem:[#allocation5 + $0x2f4] sm:$0xf]  ;;  %v4367_v5 = vld [vmem:[#allocation2 + $0x164] sm:$0xf0] }
  0x54   :  { %1197 = vmatpush.bf16.msrb.mxu1 %v3749_v31  ;;  %v3806_v62 = vld [vmem:[#allocation5 + $0x2f8] sm:$0xf0]  ;;  %v3617_v63 = vor.u32 %v4416_v58, %v3614_v60  ;;  %v4432_v1 = vld [vmem:[#allocation5 + $0x1f4] sm:$0xf]  ;;  %v3406_v7 = vld [vmem:[#allocation2 + $0x168] sm:$0xf0]  ;;  %v4865_v20 = vor.u32 %v4367_v5, %v3404_v4 }
  0x55   :  { %1246 = vmatpush.bf16.msrb.mxu2 %v3433_v19  ;;  %v3809_v0 = vor.u32 %v4464_v61, %v3806_v62  ;;  %v3678_v2 = vld [vmem:[#allocation5 + $0x1f8] sm:$0xf0]  ;;  %v4364_v6 = vld [vmem:[#allocation2 + $0x154] sm:$0xf]  ;;  %v3412_v16 = vld [vmem:[#allocation2 + $0x158] sm:$0xf] }
  0x56   :  { %963 = vmatmul.bf16.gmra.mxu0 %v4805_v49  ;;  %1295 = vmatpush.bf16.msrb.mxu3 %v3497_v28  ;;  %v3681_v3 = vor.u32 %v4432_v1, %v3678_v2  ;;  %v4368_v17 = vld [vmem:[#allocation2 + $0x16c] sm:$0xf0]  ;;  %v4365_v18 = vld [vmem:[#allocation2 + $0x15c] sm:$0xf]  ;;  %v3414_v19 = vld [vmem:[#allocation2 + $0x170] sm:$0xf0]  ;;  %v4867_v21 = vor.u32 %v4364_v6, %v3406_v7 }
  0x57   :  { %1012 = vmatmul.bf16.gmra.mxu1 %v4807_v50  ;;  %1337 = vmatpush.bf16.msra.mxu0 %v3617_v63  ;;  %v4869_v22 = vor.u32 %v4368_v17, %v3412_v16  ;;  %v4871_v23 = vor.u32 %v4365_v18, %v3414_v19  ;;  %v4446_v28 = vld [vmem:[#allocation5 + $0x264] sm:$0xf]  ;;  %v3734_v29 = vld [vmem:[#allocation5 + $0x268] sm:$0xf0]  ;;  %v3252_v55 = vld [vmem:[#allocation2 + $0x10] sm:$0xf] }
  0x58   :  { %1061 = vmatmul.bf16.gmra.mxu2 %v4809_v51  ;;  %1386 = vmatpush.bf16.msra.mxu1 %v3681_v3  ;;  %v4414_v30 = vld [vmem:[#allocation5 + $0x164] sm:$0xf]  ;;  %v3737_v31 = vor.u32 %v4446_v28, %v3734_v29  ;;  %v3606_v32 = vld [vmem:[#allocation5 + $0x168] sm:$0xf0]  ;;  %v4327_v56 = vld [vmem:[#allocation2 + $0x24] sm:$0xf0] }
  0x59   :  { %1110 = vmatmul.bf16.gmra.mxu3 %v4811_v52  ;;  %1435 = vmatpush.bf16.msra.mxu2 %v3745_v59  ;;  %5253 = vst [vmem:[#allocation15_spill] sm:$0xff] %v4869_v22  ;;  %v4462_v33 = vld [vmem:[#allocation5 + $0x2e4] sm:$0xf]  ;;  %v3798_v34 = vld [vmem:[#allocation5 + $0x2e8] sm:$0xf0]  ;;  %v3609_v35 = vor.u32 %v4414_v30, %v3606_v32  ;;  %v4877_v60 = vor.u32 %v4327_v56, %v3252_v55  ;;  %s4741_s2 = smov [#allocation10]  }
  0x5a   :  { %1484 = vmatpush.bf16.msra.mxu3 %v3809_v0  ;;  %5254 = vst [vmem:[#allocation16_spill] sm:$0xff] %v4871_v23  ;;  %v3801_v36 = vor.u32 %v4462_v33, %v3798_v34  ;;  %v4430_v37 = vld [vmem:[#allocation5 + $0x1e4] sm:$0xf]  ;;  %v3670_v38 = vld [vmem:[#allocation5 + $0x1e8] sm:$0xf0]  ;;  %s3217_s3 = sshll.u32 %s4741_s2, 4  ;;  %s3218_s3 = int_to_ptr.vmem [resolvable:$true] %s3217_s3 }
  0x5b   :  { %1338 = vmatpush.bf16.msra.mxu0 %v3609_v35  ;;  %v3673_v39 = vor.u32 %v4430_v37, %v3670_v38  ;;  %v4324_v58 = vld [vmem:[#allocation2 + $0x14] sm:$0xf]  ;;  %v3254_v59 = vld [vmem:[#allocation2 + $0x28] sm:$0xf0]  ;;  %v3726_v2 = vld [vmem:[#allocation5 + $0x258] sm:$0xf0] }
  0x5c   :  { %v4879_v62 = vor.u32 %v4324_v58, %v3254_v59  ;;  %v4444_v1 = vld [vmem:[#allocation5 + $0x254] sm:$0xf]  ;;  %v3598_v5 = vld [vmem:[#allocation5 + $0x158] sm:$0xf0]  ;;  %v3276_v34 = vld [vmem:[#allocation2 + $0x40] sm:$0xf] }
  0x5d   :  { %1436 = vmatpush.bf16.msra.mxu2 %v3737_v31  ;;  %1387 = vmatpush.bf16.msra.mxu1 %v3673_v39  ;;  %v4412_v3 = vld [vmem:[#allocation5 + $0x154] sm:$0xf]  ;;  %v3729_v4 = vor.u32 %v4444_v1, %v3726_v2  ;;  %v3790_v7 = vld [vmem:[#allocation5 + $0x2d8] sm:$0xf0]  ;;  %v4333_v35 = vld [vmem:[#allocation2 + $0x54] sm:$0xf0] }
  0x5e   :  { %1485 = vmatpush.bf16.msra.mxu3 %v3801_v36  ;;  %v4460_v6 = vld [vmem:[#allocation5 + $0x2d4] sm:$0xf]  ;;  %v3601_v17 = vor.u32 %v4412_v3, %v3598_v5  ;;  %v3662_v32 = vld [vmem:[#allocation5 + $0x1d8] sm:$0xf0]  ;;  %v4330_v36 = vld [vmem:[#allocation2 + $0x44] sm:$0xf]  ;;  %v4887_v39 = vor.u32 %v4333_v35, %v3276_v34 }
  0x5f   :  { %v3793_v18 = vor.u32 %v4460_v6, %v3790_v7  ;;  %v4428_v31 = vld [vmem:[#allocation5 + $0x1d4] sm:$0xf]  ;;  %v3278_v37 = vld [vmem:[#allocation2 + $0x58] sm:$0xf0]  ;;  %v4442_v1 = vld [vmem:[#allocation5 + $0x244] sm:$0xf] }
  0x60   :  { %1339 = vmatpush.bf16.msra.mxu0 %v3601_v17  ;;  %v3665_v33 = vor.u32 %v4428_v31, %v3662_v32  ;;  %v4889_v59 = vor.u32 %v4330_v36, %v3278_v37  ;;  %v3718_v2 = vld [vmem:[#allocation5 + $0x248] sm:$0xf0]  ;;  %v4410_v3 = vld [vmem:[#allocation5 + $0x144] sm:$0xf]  ;;  %v4339_v34 = vld [vmem:[#allocation2 + $0x84] sm:$0xf0] }
  0x61   :  { %1437 = vmatpush.bf16.msra.mxu2 %v3729_v4  ;;  %v3721_v4 = vor.u32 %v4442_v1, %v3718_v2  ;;  %v3590_v5 = vld [vmem:[#allocation5 + $0x148] sm:$0xf0]  ;;  %v4458_v6 = vld [vmem:[#allocation5 + $0x2c4] sm:$0xf]  ;;  %v4336_v35 = vld [vmem:[#allocation2 + $0x74] sm:$0xf] }
  0x62   :  { %1486 = vmatpush.bf16.msra.mxu3 %v3793_v18  ;;  %1388 = vmatpush.bf16.msra.mxu1 %v3665_v33  ;;  %v3782_v7 = vld [vmem:[#allocation5 + $0x2c8] sm:$0xf0]  ;;  %v3593_v17 = vor.u32 %v4410_v3, %v3590_v5  ;;  %v3300_v33 = vld [vmem:[#allocation2 + $0x70] sm:$0xf]  ;;  %v4440_v3 = vld [vmem:[#allocation5 + $0x234] sm:$0xf] }
  0x63   :  { %v3785_v18 = vor.u32 %v4458_v6, %v3782_v7  ;;  %v3654_v31 = vld [vmem:[#allocation5 + $0x1c8] sm:$0xf0]  ;;  %v4408_v5 = vld [vmem:[#allocation5 + $0x134] sm:$0xf]  ;;  %v3582_v7 = vld [vmem:[#allocation5 + $0x138] sm:$0xf0] }
  0x64   :  { %1340 = vmatpush.bf16.msra.mxu0 %v3593_v17  ;;  %v3302_v36 = vld [vmem:[#allocation2 + $0x88] sm:$0xf0]  ;;  %v3774_v17 = vld [vmem:[#allocation5 + $0x2b8] sm:$0xf0]  ;;  %s3219_s13 = sshll.u32 %s5248_s4, 4  ;;  %s4742_s14 = smov 768   ;;  %s3220_s13 = int_to_ptr.hbm [resolvable:$true] %s3219_s13 }
  0x65   :  { %1438 = vmatpush.bf16.msra.mxu2 %v3721_v4  ;;  %v3710_v4 = vld [vmem:[#allocation5 + $0x238] sm:$0xf0]  ;;  %s4743_s15 = smov 48  }
  0x66   :  { %968 = vmatmul.bf16.gmra.mxu0 %v4817_v12  ;;  %1487 = vmatpush.bf16.msra.mxu3 %v3785_v18  ;;  %v3713_v6 = vor.u32 %v4440_v3, %v3710_v4 }
  0x67   :  { %1017 = vmatmul.bf16.gmra.mxu1 %v4819_v13 }
  0x68   :  { %1066 = vmatmul.bf16.gmra.mxu2 %v4821_v14 }
  0x69   :  { %1115 = vmatmul.bf16.gmra.mxu3 %v4823_v15  ;;  %1439 = vmatpush.bf16.msra.mxu2 %v3713_v6 }
  0x76   :  { %973 = vmatmul.bf16.gmra.mxu0 %v4829_v40 }
  0x77   :  { %1022 = vmatmul.bf16.gmra.mxu1 %v4831_v41 }
  0x78   :  { %1071 = vmatmul.bf16.gmra.mxu2 %v4833_v42 }
  0x79   :  { %1120 = vmatmul.bf16.gmra.mxu3 %v4835_v43 }
  0x86   :  { %978 = vmatmul.bf16.gmra.mxu0 %v4841_v8 }
  0x87   :  { %1027 = vmatmul.bf16.gmra.mxu1 %v4843_v9 }
  0x88   :  { %1076 = vmatmul.bf16.gmra.mxu2 %v4845_v10 }
  0x89   :  { %1125 = vmatmul.bf16.gmra.mxu3 %v4847_v11 }
  0x96   :  { %983 = vmatmul.bf16.gmra.mxu0 %v4853_v44 }
  0x97   :  { %1032 = vmatmul.bf16.gmra.mxu1 %v4855_v45 }
  0x98   :  { %1081 = vmatmul.bf16.gmra.mxu2 %v4857_v46 }
  0x99   :  { %1130 = vmatmul.bf16.gmra.mxu3 %v4859_v47 }
  0xa6   :  { %988 = vmatmul.bf16.gmra.mxu0 %v4865_v20 }
  0xa7   :  { %1037 = vmatmul.bf16.gmra.mxu1 %v4867_v21 }
  0xa8   :  { %1086 = vmatmul.bf16.gmra.mxu2 %v4869_v22 }
  0xa9   :  { %1135 = vmatmul.bf16.gmra.mxu3 %v4871_v23 }
  0xb3   :  { %v954_v61 = vpop.f32.mrf.mxu0 }
  0xb4   :  { %v1003_v63 = vpop.f32.mrf.mxu1 }
  0xb5   :  { %v1004_v0 = vadd.f32 %v1003_v63, %v954_v61 }
  0xb6   :  { %1149 = vmatmul.bf16.vlgmr.msrb.gmra.mxu0 %v4877_v60 }
  0xb7   :  { %1198 = vmatmul.bf16.vlgmr.msrb.gmra.mxu1 %v4879_v62 }
  0xb8   :  { %1247 = vmatmul.bf16.vlgmr.msrb.gmra.mxu2 %v4781_v48 }
  0xb9   :  { %1296 = vmatmul.bf16.vlgmr.msrb.gmra.mxu3 %v4783_v53 }
  0xbb   :  { %v1052_v16 = vpop.f32.mrf.mxu2  ;;  %v956_v29 = vpop.f32.mrf.mxu0 }
  0xbc   :  { %v1053_v19 = vadd.f32 %v1052_v16, %v1004_v0  ;;  %v1101_v28 = vpop.f32.mrf.mxu3  ;;  %v1005_v30 = vpop.f32.mrf.mxu1 }
  0xbd   :  { %v1006_v53 = vadd.f32 %v1005_v30, %v956_v29 }
  0xbe   :  { %v4885_v48 = vadd.f32 %v1101_v28, %v1053_v19 }
  0xc3   :  { %v1054_v38 = vpop.f32.mrf.mxu2  ;;  %v959_v58 = vpop.f32.mrf.mxu0 }
  0xc4   :  { %v1055_v55 = vadd.f32 %v1054_v38, %v1006_v53  ;;  %v1103_v56 = vpop.f32.mrf.mxu3  ;;  %v1008_v61 = vpop.f32.mrf.mxu1  ;;  %v4426_v53 = vld [vmem:[#allocation5 + $0x1c4] sm:$0xf]  ;;  %v4899_v38 = vor.u32 %v4339_v34, %v3300_v33  ;;  %v3324_v34 = vld [vmem:[#allocation2 + $0xa0] sm:$0xf] }
  0xc5   :  { %v1009_v0 = vadd.f32 %v1008_v61, %v959_v58  ;;  %v3657_v32 = vor.u32 %v4426_v53, %v3654_v31  ;;  %v4901_v61 = vor.u32 %v4336_v35, %v3302_v36  ;;  %v4424_v31 = vld [vmem:[#allocation5 + $0x1b4] sm:$0xf]  ;;  %v4345_v35 = vld [vmem:[#allocation2 + $0xb4] sm:$0xf0]  ;;  %v4342_v36 = vld [vmem:[#allocation2 + $0xa4] sm:$0xf] }
  0xc6   :  { %v4891_v63 = vadd.f32 %v1103_v56, %v1055_v55  ;;  %1154 = vmatmul.bf16.gmra.mxu0 %v4887_v39 }
  0xc7   :  { %1203 = vmatmul.bf16.gmra.mxu1 %v4889_v59 }
  0xc8   :  { %1252 = vmatmul.bf16.gmra.mxu2 %v4793_v24  ;;  %1389 = vmatpush.bf16.msra.mxu1 %v3657_v32  ;;  %v3646_v32 = vld [vmem:[#allocation5 + $0x1b8] sm:$0xf0] }
  0xc9   :  { %1301 = vmatmul.bf16.gmra.mxu3 %v4795_v25  ;;  %v3649_v33 = vor.u32 %v4424_v31, %v3646_v32 }
  0xcb   :  { %v1057_v16 = vpop.f32.mrf.mxu2  ;;  %v961_v29 = vpop.f32.mrf.mxu0 }
  0xcc   :  { %v1058_v19 = vadd.f32 %v1057_v16, %v1009_v0  ;;  %v1106_v28 = vpop.f32.mrf.mxu3  ;;  %v1010_v30 = vpop.f32.mrf.mxu1  ;;  %v4456_v16 = vld [vmem:[#allocation5 + $0x2b4] sm:$0xf]  ;;  %1390 = vmatpush.bf16.msra.mxu1 %v3649_v33 }
  0xcd   :  { %v1011_v25 = vadd.f32 %v1010_v30, %v961_v29 }
  0xce   :  { %v4897_v24 = vadd.f32 %v1106_v28, %v1058_v19  ;;  %v3585_v19 = vor.u32 %v4408_v5, %v3582_v7  ;;  %v3777_v28 = vor.u32 %v4456_v16, %v3774_v17  ;;  %v4438_v7 = vld [vmem:[#allocation5 + $0x224] sm:$0xf]  ;;  %v3702_v16 = vld [vmem:[#allocation5 + $0x228] sm:$0xf0] }
  0xcf   :  { %v4406_v17 = vld [vmem:[#allocation5 + $0x124] sm:$0xf] }
  0xd0   :  { %1341 = vmatpush.bf16.msra.mxu0 %v3585_v19  ;;  %1488 = vmatpush.bf16.msra.mxu3 %v3777_v28  ;;  %v3574_v19 = vld [vmem:[#allocation5 + $0x128] sm:$0xf0]  ;;  %v4454_v28 = vld [vmem:[#allocation5 + $0x2a4] sm:$0xf] }
  0xd3   :  { %v1059_v37 = vpop.f32.mrf.mxu2  ;;  %v964_v58 = vpop.f32.mrf.mxu0 }
  0xd4   :  { %v1060_v55 = vadd.f32 %v1059_v37, %v1011_v25  ;;  %v1108_v56 = vpop.f32.mrf.mxu3  ;;  %v1013_v0 = vpop.f32.mrf.mxu1  ;;  %v3326_v37 = vld [vmem:[#allocation2 + $0xb8] sm:$0xf0] }
  0xd5   :  { %v1014_v2 = vadd.f32 %v1013_v0, %v964_v58  ;;  %v4913_v3 = vor.u32 %v4342_v36, %v3326_v37  ;;  %v3348_v37 = vld [vmem:[#allocation2 + $0xd0] sm:$0xf] }
  0xd6   :  { %v4903_v1 = vadd.f32 %v1108_v56, %v1060_v55  ;;  %1159 = vmatmul.bf16.gmra.mxu0 %v4899_v38  ;;  %v4911_v56 = vor.u32 %v4345_v35, %v3324_v34  ;;  %v4422_v34 = vld [vmem:[#allocation5 + $0x1a4] sm:$0xf]  ;;  %v3638_v35 = vld [vmem:[#allocation5 + $0x1a8] sm:$0xf0] }
  0xd7   :  { %1208 = vmatmul.bf16.gmra.mxu1 %v4901_v61  ;;  %v3641_v36 = vor.u32 %v4422_v34, %v3638_v35 }
  0xd8   :  { %1257 = vmatmul.bf16.gmra.mxu2 %v4805_v49 }
  0xd9   :  { %1306 = vmatmul.bf16.gmra.mxu3 %v4807_v50  ;;  %1391 = vmatpush.bf16.msra.mxu1 %v3641_v36 }
  0xdb   :  { %v1062_v18 = vpop.f32.mrf.mxu2  ;;  %v966_v25 = vpop.f32.mrf.mxu0 }
  0xdc   :  { %v1063_v29 = vadd.f32 %v1062_v18, %v1014_v2  ;;  %v1111_v30 = vpop.f32.mrf.mxu3  ;;  %v1015_v53 = vpop.f32.mrf.mxu1  ;;  %v3705_v18 = vor.u32 %v4438_v7, %v3702_v16 }
  0xdd   :  { %v1016_v50 = vadd.f32 %v1015_v53, %v966_v25  ;;  %v3577_v25 = vor.u32 %v4406_v17, %v3574_v19 }
  0xde   :  { %v4909_v49 = vadd.f32 %v1111_v30, %v1063_v29  ;;  %v3766_v29 = vld [vmem:[#allocation5 + $0x2a8] sm:$0xf0]  ;;  %1440 = vmatpush.bf16.msra.mxu2 %v3705_v18 }
  0xdf   :  { %v3769_v53 = vor.u32 %v4454_v28, %v3766_v29  ;;  %1342 = vmatpush.bf16.msra.mxu0 %v3577_v25  ;;  %v4436_v29 = vld [vmem:[#allocation5 + $0x214] sm:$0xf] }
  0xe0   :  { %v4404_v25 = vld [vmem:[#allocation5 + $0x114] sm:$0xf] }
  0xe1   :  { %1489 = vmatpush.bf16.msra.mxu3 %v3769_v53 }
  0xe3   :  { %v1064_v55 = vpop.f32.mrf.mxu2  ;;  %v969_v2 = vpop.f32.mrf.mxu0 }
  0xe4   :  { %v1065_v58 = vadd.f32 %v1064_v55, %v1016_v50  ;;  %v1113_v0 = vpop.f32.mrf.mxu3  ;;  %v1018_v4 = vpop.f32.mrf.mxu1  ;;  %v4351_v55 = vld [vmem:[#allocation2 + $0xe4] sm:$0xf0] }
  0xe5   :  { %v1019_v6 = vadd.f32 %v1018_v4, %v969_v2  ;;  %v4923_v4 = vor.u32 %v4351_v55, %v3348_v37 }
  0xe6   :  { %v4915_v5 = vadd.f32 %v1113_v0, %v1065_v58  ;;  %1164 = vmatmul.bf16.gmra.mxu0 %v4911_v56  ;;  %v4348_v58 = vld [vmem:[#allocation2 + $0xd4] sm:$0xf]  ;;  %v3350_v0 = vld [vmem:[#allocation2 + $0xe8] sm:$0xf0] }
  0xe7   :  { %1213 = vmatmul.bf16.gmra.mxu1 %v4913_v3  ;;  %v4925_v17 = vor.u32 %v4348_v58, %v3350_v0  ;;  %v4420_v58 = vld [vmem:[#allocation5 + $0x194] sm:$0xf]  ;;  %v3630_v0 = vld [vmem:[#allocation5 + $0x198] sm:$0xf0] }
  0xe8   :  { %1262 = vmatmul.bf16.gmra.mxu2 %v4817_v12 }
  0xe9   :  { %1311 = vmatmul.bf16.gmra.mxu3 %v4819_v13 }
  0xeb   :  { %v1067_v30 = vpop.f32.mrf.mxu2  ;;  %v971_v32 = vpop.f32.mrf.mxu0 }
  0xec   :  { %v1068_v50 = vadd.f32 %v1067_v30, %v1019_v6  ;;  %v1116_v31 = vpop.f32.mrf.mxu3  ;;  %v1020_v33 = vpop.f32.mrf.mxu1  ;;  %v3694_v30 = vld [vmem:[#allocation5 + $0x218] sm:$0xf0] }
  0xed   :  { %v1021_v13 = vadd.f32 %v1020_v33, %v971_v32  ;;  %v3697_v53 = vor.u32 %v4436_v29, %v3694_v30  ;;  %v3758_v32 = vld [vmem:[#allocation5 + $0x298] sm:$0xf0] }
  0xee   :  { %v4921_v12 = vadd.f32 %v1116_v31, %v1068_v50  ;;  %v3566_v50 = vld [vmem:[#allocation5 + $0x118] sm:$0xf0]  ;;  %v4452_v31 = vld [vmem:[#allocation5 + $0x294] sm:$0xf] }
  0xef   :  { %v3761_v34 = vor.u32 %v4452_v31, %v3758_v32  ;;  %1441 = vmatpush.bf16.msra.mxu2 %v3697_v53 }
  0xf1   :  { %1490 = vmatpush.bf16.msra.mxu3 %v3761_v34  ;;  %v3686_v34 = vld [vmem:[#allocation5 + $0x208] sm:$0xf0] }
  0xf3   :  { %v1069_v2 = vpop.f32.mrf.mxu2  ;;  %v974_v16 = vpop.f32.mrf.mxu0 }
  0xf4   :  { %v1070_v6 = vadd.f32 %v1069_v2, %v1021_v13  ;;  %v1118_v7 = vpop.f32.mrf.mxu3  ;;  %v1023_v18 = vpop.f32.mrf.mxu1  ;;  %v3569_v13 = vor.u32 %v4404_v25, %v3566_v50  ;;  %v3633_v2 = vor.u32 %v4420_v58, %v3630_v0 }
  0xf5   :  { %v1024_v28 = vadd.f32 %v1023_v18, %v974_v16  ;;  %v4354_v16 = vld [vmem:[#allocation2 + $0x104] sm:$0xf]  ;;  %v3374_v18 = vld [vmem:[#allocation2 + $0x118] sm:$0xf0] }
  0xf6   :  { %v4927_v19 = vadd.f32 %v1118_v7, %v1070_v6  ;;  %1169 = vmatmul.bf16.gmra.mxu0 %v4923_v4  ;;  %v3372_v6 = vld [vmem:[#allocation2 + $0x100] sm:$0xf]  ;;  %v4357_v7 = vld [vmem:[#allocation2 + $0x114] sm:$0xf0]  ;;  %1392 = vmatpush.bf16.msra.mxu1 %v3633_v2  ;;  %v4937_v50 = vor.u32 %v4354_v16, %v3374_v18 }
  0xf7   :  { %1218 = vmatmul.bf16.gmra.mxu1 %v4925_v17  ;;  %1343 = vmatpush.bf16.msra.mxu0 %v3569_v13  ;;  %v4935_v30 = vor.u32 %v4357_v7, %v3372_v6  ;;  %v4434_v13 = vld [vmem:[#allocation5 + $0x204] sm:$0xf] }
  0xf8   :  { %1267 = vmatmul.bf16.gmra.mxu2 %v4829_v40 }
  0xf9   :  { %1316 = vmatmul.bf16.gmra.mxu3 %v4831_v41 }
  0xfb   :  { %v1072_v33 = vpop.f32.mrf.mxu2  ;;  %v976_v37 = vpop.f32.mrf.mxu0 }
  0xfc   :  { %v1073_v35 = vadd.f32 %v1072_v33, %v1024_v28  ;;  %v1121_v36 = vpop.f32.mrf.mxu3  ;;  %v1025_v55 = vpop.f32.mrf.mxu1 }
  0xfd   :  { %v1026_v41 = vadd.f32 %v1025_v55, %v976_v37  ;;  %v3558_v37 = vld [vmem:[#allocation5 + $0x108] sm:$0xf0]  ;;  %v4450_v55 = vld [vmem:[#allocation5 + $0x284] sm:$0xf] }
  0xfe   :  { %v4933_v40 = vadd.f32 %v1121_v36, %v1073_v35  ;;  %v4402_v35 = vld [vmem:[#allocation5 + $0x104] sm:$0xf]  ;;  %v3689_v36 = vor.u32 %v4434_v13, %v3686_v34  ;;  %v4360_v13 = vld [vmem:[#allocation2 + $0x134] sm:$0xf]  ;;  %v3398_v34 = vld [vmem:[#allocation2 + $0x148] sm:$0xf0] }
  0xff   :  { %v3561_v0 = vor.u32 %v4402_v35, %v3558_v37 }
 0x100   :  { %1442 = vmatpush.bf16.msra.mxu2 %v3689_v36 }
 0x101   :  { %1344 = vmatpush.bf16.msra.mxu0 %v3561_v0 }
 0x103   :  { %v1074_v29 = vpop.f32.mrf.mxu2  ;;  %v979_v53 = vpop.f32.mrf.mxu0 }
 0x104   :  { %v1075_v28 = vadd.f32 %v1074_v29, %v1026_v41  ;;  %v1123_v25 = vpop.f32.mrf.mxu3  ;;  %v1028_v31 = vpop.f32.mrf.mxu1  ;;  %v3750_v41 = vld [vmem:[#allocation5 + $0x288] sm:$0xf0]  ;;  %v4418_v29 = vld [vmem:[#allocation5 + $0x184] sm:$0xf] }
 0x105   :  { %v1029_v33 = vadd.f32 %v1028_v31, %v979_v53  ;;  %v3753_v2 = vor.u32 %v4450_v55, %v3750_v41  ;;  %v3396_v53 = vld [vmem:[#allocation2 + $0x130] sm:$0xf]  ;;  %v4363_v31 = vld [vmem:[#allocation2 + $0x144] sm:$0xf0]  ;;  %v4949_v41 = vor.u32 %v4360_v13, %v3398_v34  ;;  %v3422_v13 = vld [vmem:[#allocation2 + $0x178] sm:$0xf0] }
 0x106   :  { %v4939_v32 = vadd.f32 %v1123_v25, %v1075_v28  ;;  %1174 = vmatmul.bf16.gmra.mxu0 %v4935_v30  ;;  %v3622_v28 = vld [vmem:[#allocation5 + $0x188] sm:$0xf0]  ;;  %v4947_v37 = vor.u32 %v4363_v31, %v3396_v53  ;;  %v4369_v53 = vld [vmem:[#allocation2 + $0x174] sm:$0xf0]  ;;  %v4366_v31 = vld [vmem:[#allocation2 + $0x164] sm:$0xf] }
 0x107   :  { %1223 = vmatmul.bf16.gmra.mxu1 %v4937_v50  ;;  %1491 = vmatpush.bf16.msra.mxu3 %v3753_v2  ;;  %v3625_v25 = vor.u32 %v4418_v29, %v3622_v28 }
 0x108   :  { %1272 = vmatmul.bf16.gmra.mxu2 %v4841_v8 }
 0x109   :  { %1321 = vmatmul.bf16.gmra.mxu3 %v4843_v9  ;;  %1393 = vmatpush.bf16.msra.mxu1 %v3625_v25  ;;  %v3420_v25 = vld [vmem:[#allocation2 + $0x160] sm:$0xf] }
 0x10b   :  { %v1077_v58 = vpop.f32.mrf.mxu2  ;;  %v981_v16 = vpop.f32.mrf.mxu0 }
 0x10c   :  { %v1078_v6 = vadd.f32 %v1077_v58, %v1029_v33  ;;  %v1126_v7 = vpop.f32.mrf.mxu3  ;;  %v1030_v18 = vpop.f32.mrf.mxu1 }
 0x10d   :  { %v1031_v9 = vadd.f32 %v1030_v18, %v981_v16 }
 0x10e   :  { %v4945_v8 = vadd.f32 %v1126_v7, %v1078_v6 }
 0x113   :  { %v1079_v35 = vpop.f32.mrf.mxu2  ;;  %v984_v36 = vpop.f32.mrf.mxu0 }
 0x114   :  { %v1080_v33 = vadd.f32 %v1079_v35, %v1031_v9  ;;  %v1128_v55 = vpop.f32.mrf.mxu3  ;;  %v1033_v58 = vpop.f32.mrf.mxu1  ;;  %v4959_v35 = vor.u32 %v4369_v53, %v3420_v25 }
 0x115   :  { %v1034_v2 = vadd.f32 %v1033_v58, %v984_v36  ;;  %v4961_v36 = vor.u32 %v4366_v31, %v3422_v13 }
 0x116   :  { %v4951_v0 = vadd.f32 %v1128_v55, %v1080_v33  ;;  %1179 = vmatmul.bf16.gmra.mxu0 %v4947_v37  ;;  %5255 = vst [vmem:[#allocation17_spill] sm:$0xff] %v4959_v35 }
 0x117   :  { %1228 = vmatmul.bf16.gmra.mxu1 %v4949_v41  ;;  %5256 = vst [vmem:[#allocation18_spill] sm:$0xff] %v4961_v36 }
 0x118   :  { %1277 = vmatmul.bf16.gmra.mxu2 %v4853_v44 }
 0x119   :  { %1326 = vmatmul.bf16.gmra.mxu3 %v4855_v45 }
 0x11b   :  { %v1082_v6 = vpop.f32.mrf.mxu2  ;;  %v986_v18 = vpop.f32.mrf.mxu0 }
 0x11c   :  { %v1083_v7 = vadd.f32 %v1082_v6, %v1034_v2  ;;  %v1131_v16 = vpop.f32.mrf.mxu3  ;;  %v1035_v9 = vpop.f32.mrf.mxu1  ;;  %v4480_v6 = vld [vmem:[#allocation7 + $0x74] sm:$0xf] }
 0x11d   :  { %v1036_v28 = vadd.f32 %v1035_v9, %v986_v18  ;;  %v3934_v9 = vld [vmem:[#allocation7 + $0xf8] sm:$0xf0] }
 0x11e   :  { %v4957_v29 = vadd.f32 %v1131_v16, %v1083_v7  ;;  %v3870_v7 = vld [vmem:[#allocation7 + $0x78] sm:$0xf0]  ;;  %v4496_v16 = vld [vmem:[#allocation7 + $0xf4] sm:$0xf] }
 0x11f   :  { %v3873_v18 = vor.u32 %v4480_v6, %v3870_v7  ;;  %v3937_v25 = vor.u32 %v4496_v16, %v3934_v9 }
 0x121   :  { %1839 = vmatpush.bf16.msrb.mxu2 %v3873_v18  ;;  %1888 = vmatpush.bf16.msrb.mxu3 %v3937_v25 }
 0x123   :  { %v1084_v34 = vpop.f32.mrf.mxu2  ;;  %v989_v44 = vpop.f32.mrf.mxu0 }
 0x124   :  { %v1085_v33 = vadd.f32 %v1084_v34, %v1036_v28  ;;  %v1133_v55 = vpop.f32.mrf.mxu3  ;;  %v1038_v45 = vpop.f32.mrf.mxu1 }
 0x125   :  { %v1039_v2 = vadd.f32 %v1038_v45, %v989_v44  ;;  %v3868_v44 = vld [vmem:[#allocation7 + $0x70] sm:$0xf] }
 0x126   :  { %v4963_v58 = vadd.f32 %v1133_v55, %v1085_v33  ;;  %1184 = vmatmul.bf16.gmra.mxu0 %v4959_v35  ;;  %v3932_v45 = vld [vmem:[#allocation7 + $0xf0] sm:$0xf] }
 0x127   :  { %1233 = vmatmul.bf16.gmra.mxu1 %v4961_v36  ;;  %v4497_v36 = vld [vmem:[#allocation7 + $0xf4] sm:$0xf0] }
 0x128   :  { %1282 = vmatmul.bf16.gmra.mxu2 %v4865_v20  ;;  %v4481_v20 = vld [vmem:[#allocation7 + $0x74] sm:$0xf0]  ;;  %v3933_v23 = vor.u32 %v4497_v36, %v3932_v45  ;;  %v4478_v36 = vld [vmem:[#allocation7 + $0x64] sm:$0xf]  ;;  %v4495_v45 = vld [vmem:[#allocation7 + $0xe4] sm:$0xf0] }
 0x129   :  { %1331 = vmatmul.bf16.gmra.mxu3 %v4867_v21  ;;  %v3869_v21 = vor.u32 %v4481_v20, %v3868_v44  ;;  %v3924_v44 = vld [vmem:[#allocation7 + $0xe0] sm:$0xf] }
 0x12a   :  { %1790 = vmatpush.bf16.msrb.mxu1 %v3933_v23 }
 0x12b   :  { %v1087_v28 = vpop.f32.mrf.mxu2  ;;  %v991_v13 = vpop.f32.mrf.mxu0  ;;  %1741 = vmatpush.bf16.msrb.mxu0 %v3869_v21 }
 0x12c   :  { %v1088_v53 = vadd.f32 %v1087_v28, %v1039_v2  ;;  %v1136_v31 = vpop.f32.mrf.mxu3  ;;  %v1040_v34 = vpop.f32.mrf.mxu1  ;;  %v4494_v28 = vld [vmem:[#allocation7 + $0xe4] sm:$0xf] }
 0x12d   :  { %v1041_v55 = vadd.f32 %v1040_v34, %v991_v13 }
 0x12e   :  { %v4969_v33 = vadd.f32 %v1136_v31, %v1088_v53  ;;  %v3926_v53 = vld [vmem:[#allocation7 + $0xe8] sm:$0xf0] }
 0x133   :  { %v1089_v35 = vpop.f32.mrf.mxu2  ;;  %v1150_v22 = vpop.f32.mrf.mxu0 }
 0x134   :  { %v1090_v6 = vadd.f32 %v1089_v35, %v1041_v55  ;;  %v1138_v7 = vpop.f32.mrf.mxu3  ;;  %v1151_v2 = vadd.f32 %v1150_v22, %v4885_v48  ;;  %v1199_v16 = vpop.f32.mrf.mxu1  ;;  %v3862_v35 = vld [vmem:[#allocation7 + $0x68] sm:$0xf0]  ;;  %v3929_v22 = vor.u32 %v4494_v28, %v3926_v53  ;;  %v4479_v55 = vld [vmem:[#allocation7 + $0x64] sm:$0xf0]  ;;  %v3854_v28 = vld [vmem:[#allocation7 + $0x58] sm:$0xf0] }
 0x135   :  { %v3865_v25 = vor.u32 %v4478_v36, %v3862_v35 }
 0x136   :  { %v4972_v18 = vadd.f32 %v1138_v7, %v1090_v6  ;;  %v1200_v9 = vadd.f32 %v1199_v16, %v1151_v2  ;;  %1345 = vmatmul.bf16.vlgmr.msra.gmra.mxu0 %v4785_v54  ;;  %1889 = vmatpush.bf16.msrb.mxu3 %v3929_v22  ;;  %v3925_v6 = vor.u32 %v4495_v45, %v3924_v44  ;;  %v4493_v44 = vld [vmem:[#allocation7 + $0xd4] sm:$0xf0] }
 0x137   :  { %1394 = vmatmul.bf16.vlgmr.msra.gmra.mxu1 %v4787_v57  ;;  %1840 = vmatpush.bf16.msrb.mxu2 %v3865_v25  ;;  %v4492_v25 = vld [vmem:[#allocation7 + $0xd4] sm:$0xf] }
 0x138   :  { %1443 = vmatmul.bf16.vlgmr.msra.gmra.mxu2 %v4877_v60  ;;  %1791 = vmatpush.bf16.msrb.mxu1 %v3925_v6 }
 0x139   :  { %1492 = vmatmul.bf16.vlgmr.msra.gmra.mxu3 %v4879_v62  ;;  %v3860_v62 = vld [vmem:[#allocation7 + $0x60] sm:$0xf] }
 0x13a   :  { %v3861_v20 = vor.u32 %v4479_v55, %v3860_v62  ;;  %v3916_v62 = vld [vmem:[#allocation7 + $0xd0] sm:$0xf] }
 0x13b   :  { %v1248_v31 = vpop.f32.mrf.mxu2  ;;  %v1152_v23 = vpop.f32.mrf.mxu0  ;;  %v3917_v45 = vor.u32 %v4493_v44, %v3916_v62 }
 0x13c   :  { %v1297_v48 = vpop.f32.mrf.mxu3  ;;  %v1153_v54 = vadd.f32 %v1152_v23, %v4891_v63  ;;  %v1201_v34 = vpop.f32.mrf.mxu1  ;;  %1742 = vmatpush.bf16.msrb.mxu0 %v3861_v20 }
 0x13d   :  { %v4978_v13 = vadd.f32 %v1297_v48, %v1248_v31  ;;  %v3918_v31 = vld [vmem:[#allocation7 + $0xd8] sm:$0xf0]  ;;  %1792 = vmatpush.bf16.msrb.mxu1 %v3917_v45 }
 0x13e   :  { %v1202_v57 = vadd.f32 %v1201_v34, %v1153_v54  ;;  %v3921_v48 = vor.u32 %v4492_v25, %v3918_v31  ;;  %v3910_v25 = vld [vmem:[#allocation7 + $0xc8] sm:$0xf0] }
 0x140   :  { %v4981_v60 = vpack.c.bf16 %v1202_v57, %v1200_v9  ;;  %v4476_v9 = vld [vmem:[#allocation7 + $0x54] sm:$0xf]  ;;  %1890 = vmatpush.bf16.msrb.mxu3 %v3921_v48  ;;  %v4477_v57 = vld [vmem:[#allocation7 + $0x54] sm:$0xf0] }
 0x141   :  { %v3857_v53 = vor.u32 %v4476_v9, %v3854_v28  ;;  %v4490_v9 = vld [vmem:[#allocation7 + $0xc4] sm:$0xf] }
 0x142   :  { %v3913_v31 = vor.u32 %v4490_v9, %v3910_v25 }
 0x143   :  { %v1250_v21 = vpop.f32.mrf.mxu2  ;;  %v1155_v2 = vpop.f32.mrf.mxu0  ;;  %1841 = vmatpush.bf16.msrb.mxu2 %v3857_v53 }
 0x144   :  { %v1299_v7 = vpop.f32.mrf.mxu3  ;;  %v1156_v36 = vadd.f32 %v1155_v2, %v4897_v24  ;;  %v1204_v63 = vpop.f32.mrf.mxu1  ;;  %1891 = vmatpush.bf16.msrb.mxu3 %v3913_v31  ;;  %v3900_v31 = vld [vmem:[#allocation7 + $0xb0] sm:$0xf] }
 0x145   :  { %v4983_v16 = vadd.f32 %v1299_v7, %v1250_v21 }
 0x146   :  { %v1205_v35 = vadd.f32 %v1204_v63, %v1156_v36  ;;  %1350 = vmatmul.bf16.gmra.mxu0 %v4797_v26  ;;  %v4474_v63 = vld [vmem:[#allocation7 + $0x44] sm:$0xf] }
 0x147   :  { %1399 = vmatmul.bf16.gmra.mxu1 %v4799_v27 }
 0x148   :  { %1448 = vmatmul.bf16.gmra.mxu2 %v4887_v39 }
 0x149   :  { %1497 = vmatmul.bf16.gmra.mxu3 %v4889_v59  ;;  %v3852_v59 = vld [vmem:[#allocation7 + $0x50] sm:$0xf] }
 0x14a   :  { %v3853_v55 = vor.u32 %v4477_v57, %v3852_v59 }
 0x14b   :  { %v1253_v22 = vpop.f32.mrf.mxu2  ;;  %v1157_v24 = vpop.f32.mrf.mxu0 }
 0x14c   :  { %v1302_v23 = vpop.f32.mrf.mxu3  ;;  %v1158_v26 = vadd.f32 %v1157_v24, %v4903_v1  ;;  %v1206_v34 = vpop.f32.mrf.mxu1  ;;  %1743 = vmatpush.bf16.msrb.mxu0 %v3853_v55  ;;  %v4475_v24 = vld [vmem:[#allocation7 + $0x44] sm:$0xf0] }
 0x14d   :  { %v4990_v54 = vadd.f32 %v1302_v23, %v1253_v22 }
 0x14e   :  { %v1207_v27 = vadd.f32 %v1206_v34, %v1158_v26  ;;  %v3908_v26 = vld [vmem:[#allocation7 + $0xc0] sm:$0xf] }
 0x150   :  { %v4993_v39 = vpack.c.bf16 %v1207_v27, %v1205_v35  ;;  %v3846_v35 = vld [vmem:[#allocation7 + $0x48] sm:$0xf0]  ;;  %v4491_v27 = vld [vmem:[#allocation7 + $0xc4] sm:$0xf0] }
 0x151   :  { %v3849_v28 = vor.u32 %v4474_v63, %v3846_v35  ;;  %v3909_v57 = vor.u32 %v4491_v27, %v3908_v26  ;;  %v4470_v27 = vld [vmem:[#allocation7 + $0x24] sm:$0xf] }
 0x153   :  { %v1255_v20 = vpop.f32.mrf.mxu2  ;;  %v1160_v6 = vpop.f32.mrf.mxu0  ;;  %1842 = vmatpush.bf16.msrb.mxu2 %v3849_v28  ;;  %1793 = vmatpush.bf16.msrb.mxu1 %v3909_v57  ;;  %v4486_v57 = vld [vmem:[#allocation7 + $0xa4] sm:$0xf] }
 0x154   :  { %v1304_v21 = vpop.f32.mrf.mxu3  ;;  %v1161_v2 = vadd.f32 %v1160_v6, %v4909_v49  ;;  %v1209_v1 = vpop.f32.mrf.mxu1  ;;  %v3838_v6 = vld [vmem:[#allocation7 + $0x38] sm:$0xf0] }
 0x155   :  { %v4995_v7 = vadd.f32 %v1304_v21, %v1255_v20  ;;  %v4472_v21 = vld [vmem:[#allocation7 + $0x34] sm:$0xf] }
 0x156   :  { %v1210_v36 = vadd.f32 %v1209_v1, %v1161_v2  ;;  %1355 = vmatmul.bf16.gmra.mxu0 %v4809_v51  ;;  %v4488_v2 = vld [vmem:[#allocation7 + $0xb4] sm:$0xf]  ;;  %v3841_v1 = vor.u32 %v4472_v21, %v3838_v6 }
 0x157   :  { %1404 = vmatmul.bf16.gmra.mxu1 %v4811_v52 }
 0x158   :  { %1453 = vmatmul.bf16.gmra.mxu2 %v4899_v38 }
 0x159   :  { %1502 = vmatmul.bf16.gmra.mxu3 %v4901_v61  ;;  %v3844_v61 = vld [vmem:[#allocation7 + $0x40] sm:$0xf]  ;;  %1843 = vmatpush.bf16.msrb.mxu2 %v3841_v1 }
 0x15a   :  { %v3845_v34 = vor.u32 %v4475_v24, %v3844_v61  ;;  %v3892_v1 = vld [vmem:[#allocation7 + $0xa0] sm:$0xf] }
 0x15b   :  { %v1258_v53 = vpop.f32.mrf.mxu2  ;;  %v1162_v49 = vpop.f32.mrf.mxu0 }
 0x15c   :  { %v1307_v22 = vpop.f32.mrf.mxu3  ;;  %v1163_v51 = vadd.f32 %v1162_v49, %v4915_v5  ;;  %v1211_v23 = vpop.f32.mrf.mxu1  ;;  %1744 = vmatpush.bf16.msrb.mxu0 %v3845_v34  ;;  %v4489_v49 = vld [vmem:[#allocation7 + $0xb4] sm:$0xf0] }
 0x15d   :  { %v5002_v48 = vadd.f32 %v1307_v22, %v1258_v53  ;;  %v4473_v53 = vld [vmem:[#allocation7 + $0x34] sm:$0xf0] }
 0x15e   :  { %v1212_v52 = vadd.f32 %v1211_v23, %v1163_v51  ;;  %v3901_v23 = vor.u32 %v4489_v49, %v3900_v31  ;;  %v4484_v31 = vld [vmem:[#allocation7 + $0x94] sm:$0xf]  ;;  %v3886_v49 = vld [vmem:[#allocation7 + $0x98] sm:$0xf0] }
 0x160   :  { %v5005_v38 = vpack.c.bf16 %v1212_v52, %v1210_v36  ;;  %v3902_v36 = vld [vmem:[#allocation7 + $0xb8] sm:$0xf0]  ;;  %1794 = vmatpush.bf16.msrb.mxu1 %v3901_v23  ;;  %v3889_v23 = vor.u32 %v4484_v31, %v3886_v49 }
 0x161   :  { %v3905_v35 = vor.u32 %v4488_v2, %v3902_v36  ;;  %v4471_v2 = vld [vmem:[#allocation7 + $0x24] sm:$0xf0] }
 0x163   :  { %v1260_v59 = vpop.f32.mrf.mxu2  ;;  %v1165_v55 = vpop.f32.mrf.mxu0  ;;  %1892 = vmatpush.bf16.msrb.mxu3 %v3905_v35 }
 0x164   :  { %v1309_v62 = vpop.f32.mrf.mxu3  ;;  %v1166_v20 = vadd.f32 %v1165_v55, %v4921_v12  ;;  %v1214_v5 = vpop.f32.mrf.mxu1  ;;  %v3894_v55 = vld [vmem:[#allocation7 + $0xa8] sm:$0xf0] }
 0x165   :  { %v5007_v44 = vadd.f32 %v1309_v62, %v1260_v59  ;;  %v3830_v59 = vld [vmem:[#allocation7 + $0x28] sm:$0xf0] }
 0x166   :  { %v1215_v45 = vadd.f32 %v1214_v5, %v1166_v20  ;;  %1360 = vmatmul.bf16.gmra.mxu0 %v4821_v14  ;;  %v3833_v62 = vor.u32 %v4470_v27, %v3830_v59  ;;  %v3897_v5 = vor.u32 %v4486_v57, %v3894_v55  ;;  %v3884_v27 = vld [vmem:[#allocation7 + $0x90] sm:$0xf]  ;;  %v4485_v59 = vld [vmem:[#allocation7 + $0x94] sm:$0xf0]  ;;  %v3812_v55 = vld [vmem:[#allocation7] sm:$0xf] }
 0x167   :  { %1409 = vmatmul.bf16.gmra.mxu1 %v4823_v15  ;;  %v3885_v57 = vor.u32 %v4485_v59, %v3884_v27 }
 0x168   :  { %1458 = vmatmul.bf16.gmra.mxu2 %v4911_v56  ;;  %1893 = vmatpush.bf16.msrb.mxu3 %v3897_v5  ;;  %v4466_v5 = vld [vmem:[#allocation7 + $0x4] sm:$0xf] }
 0x169   :  { %1507 = vmatmul.bf16.gmra.mxu3 %v4913_v3  ;;  %v3836_v3 = vld [vmem:[#allocation7 + $0x30] sm:$0xf]  ;;  %1844 = vmatpush.bf16.msrb.mxu2 %v3833_v62 }
 0x16a   :  { %v3837_v22 = vor.u32 %v4473_v53, %v3836_v3  ;;  %v4468_v3 = vld [vmem:[#allocation7 + $0x14] sm:$0xf]  ;;  %v3822_v53 = vld [vmem:[#allocation7 + $0x18] sm:$0xf0] }
 0x16b   :  { %v1263_v63 = vpop.f32.mrf.mxu2  ;;  %v1167_v12 = vpop.f32.mrf.mxu0 }
 0x16c   :  { %v1312_v9 = vpop.f32.mrf.mxu3  ;;  %v1168_v14 = vadd.f32 %v1167_v12, %v4927_v19  ;;  %v1216_v25 = vpop.f32.mrf.mxu1  ;;  %1745 = vmatpush.bf16.msrb.mxu0 %v3837_v22  ;;  %v3825_v22 = vor.u32 %v4468_v3, %v3822_v53  ;;  %1894 = vmatpush.bf16.msrb.mxu3 %v3889_v23  ;;  %v3876_v3 = vld [vmem:[#allocation7 + $0x80] sm:$0xf]  ;;  %v4483_v53 = vld [vmem:[#allocation7 + $0x84] sm:$0xf0] }
 0x16d   :  { %v5014_v28 = vadd.f32 %v1312_v9, %v1263_v63  ;;  %v4487_v63 = vld [vmem:[#allocation7 + $0xa4] sm:$0xf0] }
 0x16e   :  { %v1217_v15 = vadd.f32 %v1216_v25, %v1168_v14  ;;  %v3893_v9 = vor.u32 %v4487_v63, %v3892_v1  ;;  %1845 = vmatpush.bf16.msrb.mxu2 %v3825_v22  ;;  %v4482_v1 = vld [vmem:[#allocation7 + $0x84] sm:$0xf] }
 0x170   :  { %v5017_v56 = vpack.c.bf16 %v1217_v15, %v1215_v45  ;;  %1795 = vmatpush.bf16.msrb.mxu1 %v3893_v9 }
 0x173   :  { %v1265_v51 = vpop.f32.mrf.mxu2  ;;  %v1170_v61 = vpop.f32.mrf.mxu0 }
 0x174   :  { %v1314_v52 = vpop.f32.mrf.mxu3  ;;  %v1171_v26 = vadd.f32 %v1170_v61, %v4933_v40  ;;  %v1219_v19 = vpop.f32.mrf.mxu1  ;;  %1796 = vmatpush.bf16.msrb.mxu1 %v3885_v57 }
 0x175   :  { %v5019_v24 = vadd.f32 %v1314_v52, %v1265_v51 }
 0x176   :  { %v1220_v34 = vadd.f32 %v1219_v19, %v1171_v26  ;;  %1365 = vmatmul.bf16.gmra.mxu0 %v4833_v42  ;;  %v4469_v19 = vld [vmem:[#allocation7 + $0x14] sm:$0xf0] }
 0x177   :  { %1414 = vmatmul.bf16.gmra.mxu1 %v4835_v43 }
 0x178   :  { %1463 = vmatmul.bf16.gmra.mxu2 %v4923_v4 }
 0x179   :  { %1512 = vmatmul.bf16.gmra.mxu3 %v4925_v17  ;;  %v3828_v17 = vld [vmem:[#allocation7 + $0x20] sm:$0xf] }
 0x17a   :  { %v3829_v36 = vor.u32 %v4471_v2, %v3828_v17 }
 0x17b   :  { %v1268_v20 = vpop.f32.mrf.mxu2  ;;  %v1172_v40 = vpop.f32.mrf.mxu0 }
 0x17c   :  { %v1317_v45 = vpop.f32.mrf.mxu3  ;;  %v1173_v42 = vadd.f32 %v1172_v40, %v4939_v32  ;;  %v1221_v6 = vpop.f32.mrf.mxu1  ;;  %1746 = vmatpush.bf16.msrb.mxu0 %v3829_v36  ;;  %v3878_v36 = vld [vmem:[#allocation7 + $0x88] sm:$0xf0] }
 0x17d   :  { %v5026_v21 = vadd.f32 %v1317_v45, %v1268_v20  ;;  %v4467_v20 = vld [vmem:[#allocation7 + $0x4] sm:$0xf0]  ;;  %v3881_v63 = vor.u32 %v4482_v1, %v3878_v36 }
 0x17e   :  { %v1222_v43 = vadd.f32 %v1221_v6, %v1173_v42  ;;  %v3813_v40 = vor.u32 %v4467_v20, %v3812_v55  ;;  %v3814_v42 = vld [vmem:[#allocation7 + $0x8] sm:$0xf0] }
 0x17f   :  { %v3817_v17 = vor.u32 %v4466_v5, %v3814_v42  ;;  %1895 = vmatpush.bf16.msrb.mxu3 %v3881_v63  ;;  %v4588_v42 = vld [vmem:[#allocation8 + $0x2d4] sm:$0xf] }
 0x180   :  { %v5029_v4 = vpack.c.bf16 %v1222_v43, %v1220_v34 }
 0x181   :  { %1846 = vmatpush.bf16.msrb.mxu2 %v3817_v17 }
 0x183   :  { %v5031_v35 = vpop.f32.mrf.mxu2  ;;  %v1175_v14 = vpop.f32.mrf.mxu0 }
 0x184   :  { %v5033_v12 = vpop.f32.mrf.mxu3  ;;  %v1176_v25 = vadd.f32 %v1175_v14, %v4945_v8  ;;  %v1224_v32 = vpop.f32.mrf.mxu1 }
 0x186   :  { %v1225_v15 = vadd.f32 %v1224_v32, %v1176_v25  ;;  %1370 = vmatmul.bf16.gmra.mxu0 %v4845_v10 }
 0x187   :  { %1419 = vmatmul.bf16.gmra.mxu1 %v4847_v11 }
 0x188   :  { %1468 = vmatmul.bf16.gmra.mxu2 %v4935_v30  ;;  %v3820_v30 = vld [vmem:[#allocation7 + $0x10] sm:$0xf] }
 0x189   :  { %1517 = vmatmul.bf16.gmra.mxu3 %v4937_v50  ;;  %v3821_v50 = vor.u32 %v4469_v19, %v3820_v30 }
 0x18b   :  { %v1273_v51 = vpop.f32.mrf.mxu2  ;;  %v1177_v8 = vpop.f32.mrf.mxu0  ;;  %1747 = vmatpush.bf16.msrb.mxu0 %v3821_v50 }
 0x18c   :  { %v1322_v52 = vpop.f32.mrf.mxu3  ;;  %v1178_v10 = vadd.f32 %v1177_v8, %v4951_v0  ;;  %v1226_v26 = vpop.f32.mrf.mxu1  ;;  %v5259_v8 = vld [vmem:[#allocation17_spill] sm:$0xff] }
 0x18d   :  { %v5040_v61 = vadd.f32 %v1322_v52, %v1273_v51  ;;  %v5257_v52 = vld [vmem:[#allocation15_spill] sm:$0xff] }
 0x18e   :  { %v1227_v11 = vadd.f32 %v1226_v26, %v1178_v10  ;;  %v5260_v10 = vld [vmem:[#allocation18_spill] sm:$0xff] }
 0x18f   :  { %1748 = vmatpush.bf16.msrb.mxu0 %v3813_v40  ;;  %v4110_v40 = vld [vmem:[#allocation8 + $0x168] sm:$0xf0] }
 0x190   :  { %v5043_v34 = vpack.c.bf16 %v1227_v11, %v1225_v15 }
 0x193   :  { %v5045_v62 = vpop.f32.mrf.mxu2  ;;  %v1180_v0 = vpop.f32.mrf.mxu0 }
 0x194   :  { %v5047_v45 = vpop.f32.mrf.mxu3  ;;  %v1181_v6 = vadd.f32 %v1180_v0, %v4957_v29  ;;  %v1229_v43 = vpop.f32.mrf.mxu1  ;;  %v4540_v0 = vld [vmem:[#allocation8 + $0x154] sm:$0xf] }
 0x196   :  { %v1230_v2 = vadd.f32 %v1229_v43, %v1181_v6  ;;  %1375 = vmatmul.bf16.gmra.mxu0 %v4857_v46  ;;  %v4113_v43 = vor.u32 %v4540_v0, %v4110_v40 }
 0x197   :  { %1424 = vmatmul.bf16.gmra.mxu1 %v4859_v47  ;;  %v3877_v47 = vor.u32 %v4483_v53, %v3876_v3 }
 0x198   :  { %1473 = vmatmul.bf16.gmra.mxu2 %v4947_v37 }
 0x199   :  { %1522 = vmatmul.bf16.gmra.mxu3 %v4949_v41  ;;  %1797 = vmatpush.bf16.msrb.mxu1 %v3877_v47 }
 0x19a   :  { %2627 = vmatpush.bf16.msra.mxu2 %v4113_v43 }
 0x19b   :  { %v1278_v9 = vpop.f32.mrf.mxu2  ;;  %v1182_v29 = vpop.f32.mrf.mxu0 }
 0x19c   :  { %v1327_v14 = vpop.f32.mrf.mxu3  ;;  %v1183_v32 = vadd.f32 %v1182_v29, %v4963_v58  ;;  %v1231_v15 = vpop.f32.mrf.mxu1  ;;  %v5258_v58 = vld [vmem:[#allocation16_spill] sm:$0xff] }
 0x19d   :  { %v5054_v25 = vadd.f32 %v1327_v14, %v1278_v9  ;;  %v4108_v14 = vld [vmem:[#allocation8 + $0x150] sm:$0xf]  ;;  %v4543_v29 = vld [vmem:[#allocation8 + $0x164] sm:$0xf0] }
 0x19e   :  { %v1232_v46 = vadd.f32 %v1231_v15, %v1183_v32  ;;  %v4300_v32 = vld [vmem:[#allocation8 + $0x2d0] sm:$0xf]  ;;  %v4109_v15 = vor.u32 %v4543_v29, %v4108_v14 }
 0x1a0   :  { %v5057_v31 = vpack.c.bf16 %v1232_v46, %v1230_v2  ;;  %v4591_v46 = vld [vmem:[#allocation8 + $0x2e4] sm:$0xf0]  ;;  %2529 = vmatpush.bf16.msra.mxu0 %v4109_v15  ;;  %v4528_v15 = vld [vmem:[#allocation8 + $0xf4] sm:$0xf] }
 0x1a1   :  { %v4301_v3 = vor.u32 %v4591_v46, %v4300_v32  ;;  %v4062_v46 = vld [vmem:[#allocation8 + $0x108] sm:$0xf0] }
 0x1a3   :  { %v5059_v37 = vpop.f32.mrf.mxu2  ;;  %v1185_v22 = vpop.f32.mrf.mxu0  ;;  %2578 = vmatpush.bf16.msra.mxu1 %v4301_v3  ;;  %v4576_v3 = vld [vmem:[#allocation8 + $0x274] sm:$0xf] }
 0x1a4   :  { %v5061_v41 = vpop.f32.mrf.mxu3  ;;  %v1186_v49 = vadd.f32 %v1185_v22, %v4969_v33  ;;  %v1234_v51 = vpop.f32.mrf.mxu1 }
 0x1a6   :  { %v1235_v23 = vadd.f32 %v1234_v51, %v1186_v49  ;;  %1380 = vmatmul.bf16.gmra.mxu0 %v5257_v52 }
 0x1a7   :  { %1429 = vmatmul.bf16.gmra.mxu1 %v5258_v58 }
 0x1a8   :  { %1478 = vmatmul.bf16.gmra.mxu2 %v5259_v8  ;;  %v4534_v8 = vld [vmem:[#allocation8 + $0x124] sm:$0xf] }
 0x1a9   :  { %1527 = vmatmul.bf16.gmra.mxu3 %v5260_v10  ;;  %v4086_v10 = vld [vmem:[#allocation8 + $0x138] sm:$0xf0] }
 0x1ab   :  { %v1283_v26 = vpop.f32.mrf.mxu2  ;;  %v1187_v30 = vpop.f32.mrf.mxu0 }
 0x1ac   :  { %v1332_v11 = vpop.f32.mrf.mxu3  ;;  %v1188_v50 = vadd.f32 %v1187_v30, %v4972_v18  ;;  %v1236_v27 = vpop.f32.mrf.mxu1  ;;  %v4302_v18 = vld [vmem:[#allocation8 + $0x2e8] sm:$0xf0]  ;;  %v4089_v30 = vor.u32 %v4534_v8, %v4086_v10  ;;  %v4252_v8 = vld [vmem:[#allocation8 + $0x270] sm:$0xf] }
 0x1ad   :  { %v5068_v19 = vadd.f32 %v1332_v11, %v1283_v26  ;;  %v4305_v36 = vor.u32 %v4588_v42, %v4302_v18  ;;  %v4582_v26 = vld [vmem:[#allocation8 + $0x2a4] sm:$0xf]  ;;  %v4084_v42 = vld [vmem:[#allocation8 + $0x120] sm:$0xf] }
 0x1ae   :  { %v1237_v59 = vadd.f32 %v1236_v27, %v1188_v50  ;;  %v4278_v50 = vld [vmem:[#allocation8 + $0x2b8] sm:$0xf0]  ;;  %2628 = vmatpush.bf16.msra.mxu2 %v4089_v30 }
 0x1af   :  { %2676 = vmatpush.bf16.msra.mxu3 %v4305_v36 }
 0x1b0   :  { %v5071_v33 = vpack.c.bf16 %v1237_v59, %v1235_v23 }
 0x1b3   :  { %v5073_v57 = vpop.f32.mrf.mxu2  ;;  %v1346_v20 = vpop.f32.mrf.mxu0 }
 0x1b4   :  { %v5075_v55 = vpop.f32.mrf.mxu3  ;;  %v1395_v5 = vpop.f32.mrf.mxu1  ;;  %v1347_v17 = vadd.f32 %v1346_v20, %v4978_v13 }
 0x1b6   :  { %1749 = vmatmul.bf16.vlgmr.msrb.gmra.mxu0 %v4981_v60 }
 0x1b8   :  { %1847 = vmatmul.bf16.vlgmr.msrb.gmra.mxu2 %v4981_v60  ;;  %v1396_v60 = vadd.f32 %v1395_v5, %v1347_v17  ;;  %v4281_v5 = vor.u32 %v4582_v26, %v4278_v50  ;;  %v4585_v17 = vld [vmem:[#allocation8 + $0x2b4] sm:$0xf0] }
 0x1ba   :  { %2677 = vmatpush.bf16.msra.mxu3 %v4281_v5 }
 0x1bb   :  { %v1444_v6 = vpop.f32.mrf.mxu2  ;;  %v1348_v1 = vpop.f32.mrf.mxu0 }
 0x1bc   :  { %v1493_v2 = vpop.f32.mrf.mxu3  ;;  %v1397_v63 = vpop.f32.mrf.mxu1  ;;  %v1349_v9 = vadd.f32 %v1348_v1, %v4983_v16  ;;  %v1445_v53 = vadd.f32 %v1444_v6, %v1396_v60  ;;  %v4276_v6 = vld [vmem:[#allocation8 + $0x2a0] sm:$0xf] }
 0x1be   :  { %v1398_v47 = vadd.f32 %v1397_v63, %v1349_v9  ;;  %v1494_v52 = vadd.f32 %v1493_v2, %v1445_v53  ;;  %v4277_v2 = vor.u32 %v4585_v17, %v4276_v6  ;;  %v4038_v6 = vld [vmem:[#allocation8 + $0xd8] sm:$0xf0] }
 0x1c0   :  { %2579 = vmatpush.bf16.msra.mxu1 %v4277_v2  ;;  %v4230_v2 = vld [vmem:[#allocation8 + $0x258] sm:$0xf0] }
 0x1c3   :  { %v1446_v22 = vpop.f32.mrf.mxu2  ;;  %v1351_v51 = vpop.f32.mrf.mxu0 }
 0x1c4   :  { %v1447_v13 = vadd.f32 %v1446_v22, %v1398_v47  ;;  %v1495_v49 = vpop.f32.mrf.mxu3  ;;  %v1400_v23 = vpop.f32.mrf.mxu1  ;;  %v1352_v27 = vadd.f32 %v1351_v51, %v4990_v54  ;;  %v4065_v47 = vor.u32 %v4528_v15, %v4062_v46  ;;  %v4254_v22 = vld [vmem:[#allocation8 + $0x288] sm:$0xf0]  ;;  %v4573_v15 = vld [vmem:[#allocation8 + $0x254] sm:$0xf0] }
 0x1c6   :  { %v1496_v58 = vadd.f32 %v1495_v49, %v1447_v13  ;;  %1754 = vmatmul.bf16.gmra.mxu0 %v4993_v39  ;;  %v1401_v43 = vadd.f32 %v1400_v23, %v1352_v27  ;;  %v4257_v23 = vor.u32 %v4576_v3, %v4254_v22  ;;  %2629 = vmatpush.bf16.msra.mxu2 %v4065_v47 }
 0x1c8   :  { %v1534_v16 = vpack.c.bf16 %v1496_v58, %v1494_v52  ;;  %1852 = vmatmul.bf16.gmra.mxu2 %v4993_v39  ;;  %v4537_v39 = vld [vmem:[#allocation8 + $0x134] sm:$0xf0]  ;;  %2678 = vmatpush.bf16.msra.mxu3 %v4257_v23 }
 0x1c9   :  { %v4085_v18 = vor.u32 %v4537_v39, %v4084_v42  ;;  %v4522_v39 = vld [vmem:[#allocation8 + $0xc4] sm:$0xf] }
 0x1ca   :  { %1798 = vmatmul.bf16.vlgmr.msrb.gmra.mxu1 %v1534_v16  ;;  %1896 = vmatmul.bf16.vlgmr.msrb.gmra.mxu3 %v1534_v16  ;;  %v4060_v16 = vld [vmem:[#allocation8 + $0xf0] sm:$0xf]  ;;  %v4041_v17 = vor.u32 %v4522_v39, %v4038_v6 }
 0x1cb   :  { %v1449_v11 = vpop.f32.mrf.mxu2  ;;  %v1353_v20 = vpop.f32.mrf.mxu0  ;;  %2530 = vmatpush.bf16.msra.mxu0 %v4085_v18 }
 0x1cc   :  { %v1498_v59 = vpop.f32.mrf.mxu3  ;;  %v1402_v0 = vpop.f32.mrf.mxu1  ;;  %v1354_v40 = vadd.f32 %v1353_v20, %v4995_v7  ;;  %v1450_v1 = vadd.f32 %v1449_v11, %v1401_v43  ;;  %v4579_v11 = vld [vmem:[#allocation8 + $0x284] sm:$0xf0]  ;;  %v4570_v43 = vld [vmem:[#allocation8 + $0x244] sm:$0xf]  ;;  %2630 = vmatpush.bf16.msra.mxu2 %v4041_v17 }
 0x1cd   :  { %v4253_v30 = vor.u32 %v4579_v11, %v4252_v8 }
 0x1ce   :  { %v1403_v36 = vadd.f32 %v1402_v0, %v1354_v40  ;;  %v1499_v32 = vadd.f32 %v1498_v59, %v1450_v1 }
 0x1cf   :  { %2580 = vmatpush.bf16.msra.mxu1 %v4253_v30 }
 0x1d3   :  { %v1451_v63 = vpop.f32.mrf.mxu2  ;;  %v1356_v14 = vpop.f32.mrf.mxu0 }
 0x1d4   :  { %v1452_v54 = vadd.f32 %v1451_v63, %v1403_v36  ;;  %v1500_v9 = vpop.f32.mrf.mxu3  ;;  %v1405_v29 = vpop.f32.mrf.mxu1  ;;  %v1357_v13 = vadd.f32 %v1356_v14, %v5002_v48 }
 0x1d6   :  { %v1501_v60 = vadd.f32 %v1500_v9, %v1452_v54  ;;  %1759 = vmatmul.bf16.gmra.mxu0 %v5005_v38  ;;  %v1406_v10 = vadd.f32 %v1405_v29, %v1357_v13  ;;  %v4233_v54 = vor.u32 %v4570_v43, %v4230_v2  ;;  %v4036_v29 = vld [vmem:[#allocation8 + $0xc0] sm:$0xf] }
 0x1d8   :  { %v1536_v7 = vpack.c.bf16 %v1501_v60, %v1499_v32  ;;  %1857 = vmatmul.bf16.gmra.mxu2 %v5005_v38  ;;  %v4531_v38 = vld [vmem:[#allocation8 + $0x104] sm:$0xf0]  ;;  %2679 = vmatpush.bf16.msra.mxu3 %v4233_v54  ;;  %v4228_v32 = vld [vmem:[#allocation8 + $0x240] sm:$0xf]  ;;  %v4558_v54 = vld [vmem:[#allocation8 + $0x1e4] sm:$0xf] }
 0x1d9   :  { %v4061_v26 = vor.u32 %v4531_v38, %v4060_v16  ;;  %v4229_v46 = vor.u32 %v4573_v15, %v4228_v32  ;;  %v4564_v16 = vld [vmem:[#allocation8 + $0x214] sm:$0xf] }
 0x1da   :  { %1803 = vmatmul.bf16.gmra.mxu1 %v1536_v7  ;;  %1901 = vmatmul.bf16.gmra.mxu3 %v1536_v7 }
 0x1db   :  { %v1454_v53 = vpop.f32.mrf.mxu2  ;;  %v1358_v51 = vpop.f32.mrf.mxu0  ;;  %2531 = vmatpush.bf16.msra.mxu0 %v4061_v26  ;;  %2581 = vmatpush.bf16.msra.mxu1 %v4229_v46  ;;  %v1320_v26 = vadd.f32 %v5033_v12, %v5031_v35 }
 0x1dc   :  { %v1503_v49 = vpop.f32.mrf.mxu3  ;;  %v1407_v52 = vpop.f32.mrf.mxu1  ;;  %v1359_v58 = vadd.f32 %v1358_v51, %v5007_v44  ;;  %v1455_v50 = vadd.f32 %v1454_v53, %v1406_v10  ;;  %v4206_v10 = vld [vmem:[#allocation8 + $0x228] sm:$0xf0] }
 0x1de   :  { %v1408_v27 = vadd.f32 %v1407_v52, %v1359_v58  ;;  %v1504_v40 = vadd.f32 %v1503_v49, %v1455_v50  ;;  %v4516_v52 = vld [vmem:[#allocation8 + $0x94] sm:$0xf]  ;;  %v4014_v58 = vld [vmem:[#allocation8 + $0xa8] sm:$0xf0] }
 0x1df   :  { %v4017_v8 = vor.u32 %v4516_v52, %v4014_v58 }
 0x1e1   :  { %2631 = vmatpush.bf16.msra.mxu2 %v4017_v8  ;;  %v4504_v8 = vld [vmem:[#allocation8 + $0x34] sm:$0xf] }
 0x1e3   :  { %v1456_v59 = vpop.f32.mrf.mxu2  ;;  %v1361_v5 = vpop.f32.mrf.mxu0 }
 0x1e4   :  { %v1457_v48 = vadd.f32 %v1456_v59, %v1408_v27  ;;  %v1505_v20 = vpop.f32.mrf.mxu3  ;;  %v1410_v0 = vpop.f32.mrf.mxu1  ;;  %v1362_v1 = vadd.f32 %v1361_v5, %v5014_v28  ;;  %v4209_v27 = vor.u32 %v4564_v16, %v4206_v10  ;;  %v4204_v5 = vld [vmem:[#allocation8 + $0x210] sm:$0xf]  ;;  %v3966_v10 = vld [vmem:[#allocation8 + $0x48] sm:$0xf0] }
 0x1e6   :  { %v1506_v42 = vadd.f32 %v1505_v20, %v1457_v48  ;;  %1764 = vmatmul.bf16.gmra.mxu0 %v5017_v56  ;;  %v1411_v60 = vadd.f32 %v1410_v0, %v1362_v1  ;;  %2680 = vmatpush.bf16.msra.mxu3 %v4209_v27  ;;  %v4519_v20 = vld [vmem:[#allocation8 + $0xa4] sm:$0xf0]  ;;  %v1330_v27 = vadd.f32 %v5061_v41, %v5059_v37 }
 0x1e8   :  { %v1538_v44 = vpack.c.bf16 %v1506_v42, %v1504_v40  ;;  %1862 = vmatmul.bf16.gmra.mxu2 %v5017_v56  ;;  %v4525_v56 = vld [vmem:[#allocation8 + $0xd4] sm:$0xf0]  ;;  %v4567_v42 = vld [vmem:[#allocation8 + $0x224] sm:$0xf0] }
 0x1e9   :  { %v4037_v7 = vor.u32 %v4525_v56, %v4036_v29  ;;  %v4182_v29 = vld [vmem:[#allocation8 + $0x1f8] sm:$0xf0]  ;;  %v1325_v56 = vadd.f32 %v5047_v45, %v5045_v62 }
 0x1ea   :  { %1808 = vmatmul.bf16.gmra.mxu1 %v1538_v44  ;;  %1906 = vmatmul.bf16.gmra.mxu3 %v1538_v44  ;;  %v4205_v44 = vor.u32 %v4567_v42, %v4204_v5  ;;  %v4185_v15 = vor.u32 %v4558_v54, %v4182_v29  ;;  %v3964_v5 = vld [vmem:[#allocation8 + $0x30] sm:$0xf]  ;;  %v4546_v54 = vld [vmem:[#allocation8 + $0x184] sm:$0xf] }
 0x1eb   :  { %v1459_v18 = vpop.f32.mrf.mxu2  ;;  %v1363_v63 = vpop.f32.mrf.mxu0  ;;  %2532 = vmatpush.bf16.msra.mxu0 %v4037_v7 }
 0x1ec   :  { %v1508_v36 = vpop.f32.mrf.mxu3  ;;  %v1412_v9 = vpop.f32.mrf.mxu1  ;;  %v1364_v14 = vadd.f32 %v1363_v63, %v5019_v24  ;;  %v1460_v3 = vadd.f32 %v1459_v18, %v1411_v60  ;;  %2582 = vmatpush.bf16.msra.mxu1 %v4205_v44  ;;  %v3990_v63 = vld [vmem:[#allocation8 + $0x78] sm:$0xf0]  ;;  %2681 = vmatpush.bf16.msra.mxu3 %v4185_v15  ;;  %v4555_v44 = vld [vmem:[#allocation8 + $0x1c4] sm:$0xf0] }
 0x1ee   :  { %v1413_v53 = vadd.f32 %v1412_v9, %v1364_v14  ;;  %v1509_v51 = vadd.f32 %v1508_v36, %v1460_v3  ;;  %v4510_v36 = vld [vmem:[#allocation8 + $0x64] sm:$0xf] }
 0x1ef   :  { %v3993_v14 = vor.u32 %v4510_v36, %v3990_v63  ;;  %v4498_v36 = vld [vmem:[#allocation8 + $0x4] sm:$0xf]  ;;  %v3942_v63 = vld [vmem:[#allocation8 + $0x18] sm:$0xf0] }
 0x1f1   :  { %2632 = vmatpush.bf16.msra.mxu2 %v3993_v14  ;;  %v4134_v14 = vld [vmem:[#allocation8 + $0x198] sm:$0xf0] }
 0x1f2   :  { %v4137_v29 = vor.u32 %v4546_v54, %v4134_v14 }
 0x1f3   :  { %v1461_v47 = vpop.f32.mrf.mxu2  ;;  %v1366_v13 = vpop.f32.mrf.mxu0 }
 0x1f4   :  { %v1462_v28 = vadd.f32 %v1461_v47, %v1413_v53  ;;  %v1510_v22 = vpop.f32.mrf.mxu3  ;;  %v1415_v49 = vpop.f32.mrf.mxu1  ;;  %v1367_v11 = vadd.f32 %v1366_v13, %v5026_v21  ;;  %v4513_v53 = vld [vmem:[#allocation8 + $0x74] sm:$0xf0]  ;;  %v4180_v47 = vld [vmem:[#allocation8 + $0x1e0] sm:$0xf] }
 0x1f5   :  { %v4561_v13 = vld [vmem:[#allocation8 + $0x1f4] sm:$0xf0] }
 0x1f6   :  { %v1511_v23 = vadd.f32 %v1510_v22, %v1462_v28  ;;  %1769 = vmatmul.bf16.gmra.mxu0 %v5029_v4  ;;  %v1416_v0 = vadd.f32 %v1415_v49, %v1367_v11  ;;  %v4181_v49 = vor.u32 %v4561_v13, %v4180_v47  ;;  %v4132_v13 = vld [vmem:[#allocation8 + $0x180] sm:$0xf] }
 0x1f8   :  { %v1540_v24 = vpack.c.bf16 %v1511_v23, %v1509_v51  ;;  %1867 = vmatmul.bf16.gmra.mxu2 %v5029_v4  ;;  %v4012_v4 = vld [vmem:[#allocation8 + $0x90] sm:$0xf]  ;;  %2583 = vmatpush.bf16.msra.mxu1 %v4181_v49  ;;  %v4549_v49 = vld [vmem:[#allocation8 + $0x194] sm:$0xf0] }
 0x1f9   :  { %v4013_v40 = vor.u32 %v4519_v20, %v4012_v4 }
 0x1fa   :  { %1813 = vmatmul.bf16.gmra.mxu1 %v1540_v24  ;;  %1911 = vmatmul.bf16.gmra.mxu3 %v1540_v24 }
 0x1fb   :  { %v1464_v38 = vpop.f32.mrf.mxu2  ;;  %v1368_v50 = vpop.f32.mrf.mxu0  ;;  %2533 = vmatpush.bf16.msra.mxu0 %v4013_v40  ;;  %v4156_v40 = vld [vmem:[#allocation8 + $0x1b0] sm:$0xf] }
 0x1fc   :  { %v1513_v30 = vpop.f32.mrf.mxu3  ;;  %v1417_v59 = vpop.f32.mrf.mxu1  ;;  %v1369_v48 = vadd.f32 %v1368_v50, %v1320_v26  ;;  %v1465_v39 = vadd.f32 %v1464_v38, %v1416_v0  ;;  %v4552_v26 = vld [vmem:[#allocation8 + $0x1b4] sm:$0xf]  ;;  %v4158_v50 = vld [vmem:[#allocation8 + $0x1c8] sm:$0xf0]  ;;  %v4507_v0 = vld [vmem:[#allocation8 + $0x44] sm:$0xf0] }
 0x1fd   :  { %v4161_v20 = vor.u32 %v4552_v26, %v4158_v50  ;;  %v3965_v42 = vor.u32 %v4507_v0, %v3964_v5  ;;  %v4308_v50 = vld [vmem:[#allocation8 + $0x2d8] sm:$0xf]  ;;  %v4535_v0 = vld [vmem:[#allocation8 + $0x12c] sm:$0xf] }
 0x1fe   :  { %v1418_v6 = vadd.f32 %v1417_v59, %v1369_v48  ;;  %v1514_v17 = vadd.f32 %v1513_v30, %v1465_v39  ;;  %v3969_v30 = vor.u32 %v4504_v8, %v3966_v10  ;;  %v4310_v8 = vld [vmem:[#allocation8 + $0x2f0] sm:$0xf0] }
 0x1ff   :  { %2682 = vmatpush.bf16.msra.mxu3 %v4161_v20 }
 0x200   :  { %2633 = vmatpush.bf16.msra.mxu2 %v3969_v30  ;;  %v4544_v30 = vld [vmem:[#allocation8 + $0x16c] sm:$0xf0] }
 0x203   :  { %v1466_v35 = vpop.f32.mrf.mxu2  ;;  %v1371_v43 = vpop.f32.mrf.mxu0  ;;  %2683 = vmatpush.bf16.msra.mxu3 %v4137_v29 }
 0x204   :  { %v1467_v21 = vadd.f32 %v1466_v35, %v1418_v6  ;;  %v1515_v12 = vpop.f32.mrf.mxu3  ;;  %v1420_v18 = vpop.f32.mrf.mxu1  ;;  %v1372_v32 = vadd.f32 %v1371_v43, %v5040_v61  ;;  %v4157_v6 = vor.u32 %v4555_v44, %v4156_v40  ;;  %v4094_v40 = vld [vmem:[#allocation8 + $0x140] sm:$0xf0] }
 0x205   :  { %v4097_v44 = vor.u32 %v4535_v0, %v4094_v40  ;;  %v4044_v40 = vld [vmem:[#allocation8 + $0xc8] sm:$0xf] }
 0x206   :  { %v1516_v2 = vadd.f32 %v1515_v12, %v1467_v21  ;;  %1774 = vmatmul.bf16.gmra.mxu0 %v5043_v34  ;;  %v1421_v28 = vadd.f32 %v1420_v18, %v1372_v32  ;;  %2584 = vmatpush.bf16.msra.mxu1 %v4157_v6  ;;  %v1335_v32 = vadd.f32 %v5075_v55, %v5073_v57 }
 0x208   :  { %v1542_v1 = vpack.c.bf16 %v1516_v2, %v1514_v17  ;;  %1872 = vmatmul.bf16.gmra.mxu2 %v5043_v34  ;;  %v3988_v34 = vld [vmem:[#allocation8 + $0x60] sm:$0xf] }
 0x209   :  { %v3989_v22 = vor.u32 %v4513_v53, %v3988_v34 }
 0x20a   :  { %1818 = vmatmul.bf16.gmra.mxu1 %v1542_v1  ;;  %1916 = vmatmul.bf16.gmra.mxu3 %v1542_v1 }
 0x20b   :  { %v1469_v9 = vpop.f32.mrf.mxu2  ;;  %v1373_v7 = vpop.f32.mrf.mxu0  ;;  %2534 = vmatpush.bf16.msra.mxu0 %v3989_v22 }
 0x20c   :  { %v1518_v60 = vpop.f32.mrf.mxu3  ;;  %v1422_v46 = vpop.f32.mrf.mxu1  ;;  %v1374_v3 = vadd.f32 %v1373_v7, %v1325_v56  ;;  %v1470_v51 = vadd.f32 %v1469_v9, %v1421_v28  ;;  %v3945_v9 = vor.u32 %v4498_v36, %v3942_v63  ;;  %v4586_v36 = vld [vmem:[#allocation8 + $0x2bc] sm:$0xf0] }
 0x20e   :  { %v1423_v23 = vadd.f32 %v1422_v46, %v1374_v3  ;;  %v1519_v58 = vadd.f32 %v1518_v60, %v1470_v51  ;;  %2634 = vmatpush.bf16.msra.mxu2 %v3945_v9  ;;  %v4501_v3 = vld [vmem:[#allocation8 + $0x14] sm:$0xf0] }
 0x20f   :  { %2535 = vmatpush.bf16.msra.mxu0 %v3965_v42 }
 0x213   :  { %v1471_v62 = vpop.f32.mrf.mxu2  ;;  %v1376_v24 = vpop.f32.mrf.mxu0 }
 0x214   :  { %v1472_v61 = vadd.f32 %v1471_v62, %v1423_v23  ;;  %v1520_v45 = vpop.f32.mrf.mxu3  ;;  %v1425_v52 = vpop.f32.mrf.mxu1  ;;  %v1377_v59 = vadd.f32 %v1376_v24, %v5054_v25  ;;  %v4133_v23 = vor.u32 %v4549_v49, %v4132_v13  ;;  %v4541_v24 = vld [vmem:[#allocation8 + $0x15c] sm:$0xf] }
 0x216   :  { %v1521_v16 = vadd.f32 %v1520_v45, %v1472_v61  ;;  %1779 = vmatmul.bf16.gmra.mxu0 %v5057_v31  ;;  %v1426_v35 = vadd.f32 %v1425_v52, %v1377_v59  ;;  %2585 = vmatpush.bf16.msra.mxu1 %v4133_v23  ;;  %v4118_v52 = vld [vmem:[#allocation8 + $0x170] sm:$0xf0]  ;;  %v4532_v23 = vld [vmem:[#allocation8 + $0x10c] sm:$0xf0] }
 0x218   :  { %v1544_v38 = vpack.c.bf16 %v1521_v16, %v1519_v58  ;;  %1877 = vmatmul.bf16.gmra.mxu2 %v5057_v31  ;;  %v4589_v58 = vld [vmem:[#allocation8 + $0x2dc] sm:$0xf] }
 0x219   :  { %v4313_v26 = vor.u32 %v4589_v58, %v4310_v8  ;;  %v4523_v8 = vld [vmem:[#allocation8 + $0xcc] sm:$0xf] }
 0x21a   :  { %1823 = vmatmul.bf16.gmra.mxu1 %v1544_v38  ;;  %1921 = vmatmul.bf16.gmra.mxu3 %v1544_v38  ;;  %v4121_v38 = vor.u32 %v4541_v24, %v4118_v52 }
 0x21b   :  { %v1474_v11 = vpop.f32.mrf.mxu2  ;;  %v1378_v4 = vpop.f32.mrf.mxu0  ;;  %2872 = vmatpush.bf16.msrb.mxu3 %v4313_v26  ;;  %v4571_v26 = vld [vmem:[#allocation8 + $0x24c] sm:$0xf] }
 0x21c   :  { %v1523_v48 = vpop.f32.mrf.mxu3  ;;  %v1427_v31 = vpop.f32.mrf.mxu1  ;;  %v1379_v39 = vadd.f32 %v1378_v4, %v1330_v27  ;;  %v1475_v21 = vadd.f32 %v1474_v11, %v1426_v35  ;;  %2823 = vmatpush.bf16.msrb.mxu2 %v4121_v38  ;;  %v4116_v11 = vld [vmem:[#allocation8 + $0x158] sm:$0xf] }
 0x21d   :  { %v4117_v59 = vor.u32 %v4544_v30, %v4116_v11 }
 0x21e   :  { %v1428_v37 = vadd.f32 %v1427_v31, %v1379_v39  ;;  %v1524_v18 = vadd.f32 %v1523_v48, %v1475_v21  ;;  %v4592_v48 = vld [vmem:[#allocation8 + $0x2ec] sm:$0xf0]  ;;  %v4583_v31 = vld [vmem:[#allocation8 + $0x2ac] sm:$0xf]  ;;  %v4286_v39 = vld [vmem:[#allocation8 + $0x2c0] sm:$0xf0] }
 0x21f   :  { %v4309_v20 = vor.u32 %v4592_v48, %v4308_v50  ;;  %v4289_v35 = vor.u32 %v4583_v31, %v4286_v39  ;;  %v4238_v50 = vld [vmem:[#allocation8 + $0x260] sm:$0xf0]  ;;  %v4526_v31 = vld [vmem:[#allocation8 + $0xdc] sm:$0xf0] }
 0x220   :  { %2824 = vmatpush.bf16.msrb.mxu2 %v4097_v44  ;;  %v4045_v44 = vor.u32 %v4526_v31, %v4044_v40  ;;  %v4574_v39 = vld [vmem:[#allocation8 + $0x25c] sm:$0xf0] }
 0x221   :  { %2774 = vmatpush.bf16.msrb.mxu1 %v4309_v20  ;;  %2873 = vmatpush.bf16.msrb.mxu3 %v4289_v35 }
 0x223   :  { %v1476_v41 = vpop.f32.mrf.mxu2  ;;  %v1381_v43 = vpop.f32.mrf.mxu0 }
 0x224   :  { %v1477_v25 = vadd.f32 %v1476_v41, %v1428_v37  ;;  %v1525_v12 = vpop.f32.mrf.mxu3  ;;  %v1430_v2 = vpop.f32.mrf.mxu1  ;;  %v1382_v60 = vadd.f32 %v1381_v43, %v5068_v19  ;;  %v4092_v43 = vld [vmem:[#allocation8 + $0x128] sm:$0xf] }
 0x226   :  { %v1526_v17 = vadd.f32 %v1525_v12, %v1477_v25  ;;  %1784 = vmatmul.bf16.gmra.mxu0 %v5071_v33  ;;  %v1431_v34 = vadd.f32 %v1430_v2, %v1382_v60  ;;  %v4529_v60 = vld [vmem:[#allocation8 + $0xfc] sm:$0xf] }
 0x228   :  { %v1546_v1 = vpack.c.bf16 %v1526_v17, %v1524_v18  ;;  %1882 = vmatmul.bf16.gmra.mxu2 %v5071_v33  ;;  %v3940_v33 = vld [vmem:[#allocation8] sm:$0xf]  ;;  %v4284_v17 = vld [vmem:[#allocation8 + $0x2a8] sm:$0xf] }
 0x229   :  { %v3941_v53 = vor.u32 %v4501_v3, %v3940_v33  ;;  %v4538_v18 = vld [vmem:[#allocation8 + $0x13c] sm:$0xf0]  ;;  %v4285_v54 = vor.u32 %v4586_v36, %v4284_v17  ;;  %v4262_v3 = vld [vmem:[#allocation8 + $0x290] sm:$0xf0]  ;;  %v4517_v17 = vld [vmem:[#allocation8 + $0x9c] sm:$0xf] }
 0x22a   :  { %1828 = vmatmul.bf16.gmra.mxu1 %v1546_v1  ;;  %1926 = vmatmul.bf16.gmra.mxu3 %v1546_v1  ;;  %v4093_v1 = vor.u32 %v4538_v18, %v4092_v43 }
 0x22b   :  { %v1479_v56 = vpop.f32.mrf.mxu2  ;;  %v1383_v15 = vpop.f32.mrf.mxu0  ;;  %2536 = vmatpush.bf16.msra.mxu0 %v3941_v53  ;;  %2775 = vmatpush.bf16.msrb.mxu1 %v4285_v54 }
 0x22c   :  { %v1528_v7 = vpop.f32.mrf.mxu3  ;;  %v1384_v46 = vadd.f32 %v1383_v15, %v1335_v32  ;;  %v1432_v47 = vpop.f32.mrf.mxu1  ;;  %v1480_v28 = vadd.f32 %v1479_v56, %v1431_v34  ;;  %v4577_v15 = vld [vmem:[#allocation8 + $0x27c] sm:$0xf] }
 0x22d   :  { %v4265_v53 = vor.u32 %v4577_v15, %v4262_v3  ;;  %v4020_v15 = vld [vmem:[#allocation8 + $0x98] sm:$0xf] }
 0x22e   :  { %v1433_v22 = vadd.f32 %v1432_v47, %v1384_v46  ;;  %v1529_v19 = vadd.f32 %v1528_v7, %v1480_v28  ;;  %v4070_v7 = vld [vmem:[#allocation8 + $0x110] sm:$0xf0] }
 0x22f   :  { %2725 = vmatpush.bf16.msrb.mxu0 %v4117_v59  ;;  %v4073_v33 = vor.u32 %v4529_v60, %v4070_v7  ;;  %2874 = vmatpush.bf16.msrb.mxu3 %v4265_v53  ;;  %v4568_v53 = vld [vmem:[#allocation8 + $0x22c] sm:$0xf0] }
 0x231   :  { %2825 = vmatpush.bf16.msrb.mxu2 %v4073_v33  ;;  %v4212_v33 = vld [vmem:[#allocation8 + $0x218] sm:$0xf] }
 0x233   :  { %v1481_v51 = vpop.f32.mrf.mxu2  ;;  %v1750_v57 = vpop.f32.mrf.mxu0  ;;  %2726 = vmatpush.bf16.msrb.mxu0 %v4093_v1  ;;  %v4565_v1 = vld [vmem:[#allocation8 + $0x21c] sm:$0xf] }
 0x234   :  { %v1482_v62 = vadd.f32 %v1481_v51, %v1433_v22  ;;  %v1530_v55 = vpop.f32.mrf.mxu3  ;;  %v4068_v51 = vld [vmem:[#allocation8 + $0xf8] sm:$0xf] }
 0x236   :  { %v1531_v61 = vadd.f32 %v1530_v55, %v1482_v62  ;;  %v4260_v62 = vld [vmem:[#allocation8 + $0x278] sm:$0xf]  ;;  %v4069_v55 = vor.u32 %v4532_v23, %v4068_v51 }
 0x238   :  { %v1548_v45 = vpack.c.bf16 %v1531_v61, %v1529_v19  ;;  %v4580_v19 = vld [vmem:[#allocation8 + $0x28c] sm:$0xf0]  ;;  %2727 = vmatpush.bf16.msrb.mxu0 %v4069_v55  ;;  %v3998_v55 = vld [vmem:[#allocation8 + $0x80] sm:$0xf0] }
 0x239   :  { %v4261_v61 = vor.u32 %v4580_v19, %v4260_v62  ;;  %v4559_v19 = vld [vmem:[#allocation8 + $0x1ec] sm:$0xf] }
 0x23a   :  { %1833 = vmatmul.bf16.gmra.mxu1 %v1548_v45  ;;  %1931 = vmatmul.bf16.gmra.mxu3 %v1548_v45 }
 0x23b   :  { %v1848_v16 = vpop.f32.mrf.mxu2  ;;  %v1752_v10 = vpop.f32.mrf.mxu0  ;;  %2776 = vmatpush.bf16.msrb.mxu1 %v4261_v61 }
 0x23c   :  { %2728 = vmatpush.bf16.msrb.mxu0 %v4045_v44 }
 0x243   :  { %v1850_v27 = vpop.f32.mrf.mxu2  ;;  %v1755_v4 = vpop.f32.mrf.mxu0 }
 0x247   :  { %v1799_v5 = vpop.f32.mrf.mxu1 }
 0x248   :  { %v1800_v41 = vadd.f32 %v1799_v5, %v1750_v57 }
 0x24b   :  { %v1853_v42 = vpop.f32.mrf.mxu2  ;;  %v1757_v6 = vpop.f32.mrf.mxu0 }
 0x24d   :  { %v1897_v21 = vpop.f32.mrf.mxu3 }
 0x24e   :  { %v1898_v14 = vadd.f32 %v1897_v21, %v1848_v16 }
 0x24f   :  { %v1801_v37 = vpop.f32.mrf.mxu1 }
 0x250   :  { %v1802_v25 = vadd.f32 %v1801_v37, %v1752_v10  ;;  %v4046_v10 = vld [vmem:[#allocation8 + $0xe0] sm:$0xf0] }
 0x251   :  { %v4049_v30 = vor.u32 %v4523_v8, %v4046_v10 }
 0x252   :  { %v5113_v12 = vpack.c.bf16 %v1802_v25, %v1800_v41 }
 0x253   :  { %v1855_v2 = vpop.f32.mrf.mxu2  ;;  %v1760_v63 = vpop.f32.mrf.mxu0  ;;  %2826 = vmatpush.bf16.msrb.mxu2 %v4049_v30  ;;  %v4514_v30 = vld [vmem:[#allocation8 + $0x7c] sm:$0xf0] }
 0x254   :  { %2537 = vmatmul.bf16.vlgmr.msra.gmra.mxu0 %v5113_v12  ;;  %2635 = vmatmul.bf16.vlgmr.msra.gmra.mxu2 %v5113_v12 }
 0x255   :  { %v1899_v9 = vpop.f32.mrf.mxu3 }
 0x256   :  { %v1900_v29 = vadd.f32 %v1899_v9, %v1850_v27  ;;  %v4241_v27 = vor.u32 %v4571_v26, %v4238_v50  ;;  %v4188_v50 = vld [vmem:[#allocation8 + $0x1e8] sm:$0xf] }
 0x257   :  { %v1804_v56 = vpop.f32.mrf.mxu1 }
 0x258   :  { %v5117_v32 = vpack.c.bf16 %v1900_v29, %v1898_v14  ;;  %v1805_v22 = vadd.f32 %v1804_v56, %v1755_v4  ;;  %2875 = vmatpush.bf16.msrb.mxu3 %v4241_v27 }
 0x25a   :  { %2586 = vmatmul.bf16.vlgmr.msra.gmra.mxu1 %v5117_v32  ;;  %2684 = vmatmul.bf16.vlgmr.msra.gmra.mxu3 %v5117_v32 }
 0x25b   :  { %v1858_v46 = vpop.f32.mrf.mxu2  ;;  %v1762_v34 = vpop.f32.mrf.mxu0 }
 0x25d   :  { %v1902_v47 = vpop.f32.mrf.mxu3 }
 0x25e   :  { %v1903_v52 = vadd.f32 %v1902_v47, %v1853_v42  ;;  %v4236_v42 = vld [vmem:[#allocation8 + $0x248] sm:$0xf]  ;;  %v4213_v47 = vor.u32 %v4568_v53, %v4212_v33 }
 0x25f   :  { %v1806_v28 = vpop.f32.mrf.mxu1 }
 0x260   :  { %v1807_v13 = vadd.f32 %v1806_v28, %v1757_v6  ;;  %v4237_v6 = vor.u32 %v4574_v39, %v4236_v42  ;;  %v4505_v39 = vld [vmem:[#allocation8 + $0x3c] sm:$0xf] }
 0x262   :  { %v5121_v49 = vpack.c.bf16 %v1807_v13, %v1805_v22  ;;  %2777 = vmatpush.bf16.msrb.mxu1 %v4237_v6  ;;  %v3974_v6 = vld [vmem:[#allocation8 + $0x50] sm:$0xf0] }
 0x263   :  { %v1860_v57 = vpop.f32.mrf.mxu2  ;;  %v1765_v45 = vpop.f32.mrf.mxu0 }
 0x264   :  { %2542 = vmatmul.bf16.gmra.mxu0 %v5121_v49  ;;  %2640 = vmatmul.bf16.gmra.mxu2 %v5121_v49 }
 0x265   :  { %v1904_v24 = vpop.f32.mrf.mxu3 }
 0x266   :  { %v1905_v58 = vadd.f32 %v1904_v24, %v1855_v2  ;;  %v4022_v2 = vld [vmem:[#allocation8 + $0xb0] sm:$0xf0]  ;;  %2778 = vmatpush.bf16.msrb.mxu1 %v4213_v47  ;;  %v4499_v47 = vld [vmem:[#allocation8 + $0xc] sm:$0xf] }
 0x267   :  { %v1809_v16 = vpop.f32.mrf.mxu1  ;;  %v4025_v36 = vor.u32 %v4517_v17, %v4022_v2 }
 0x268   :  { %v5125_v38 = vpack.c.bf16 %v1905_v58, %v1903_v52  ;;  %v1810_v20 = vadd.f32 %v1809_v16, %v1760_v63  ;;  %v4214_v63 = vld [vmem:[#allocation8 + $0x230] sm:$0xf0] }
 0x269   :  { %v4217_v54 = vor.u32 %v4565_v1, %v4214_v63  ;;  %2827 = vmatpush.bf16.msrb.mxu2 %v4025_v36 }
 0x26a   :  { %2591 = vmatmul.bf16.gmra.mxu1 %v5125_v38  ;;  %2689 = vmatmul.bf16.gmra.mxu3 %v5125_v38 }
 0x26b   :  { %v1863_v11 = vpop.f32.mrf.mxu2  ;;  %v1767_v48 = vpop.f32.mrf.mxu0  ;;  %2876 = vmatpush.bf16.msrb.mxu3 %v4217_v54  ;;  %v3972_v54 = vld [vmem:[#allocation8 + $0x38] sm:$0xf] }
 0x26d   :  { %v1907_v59 = vpop.f32.mrf.mxu3 }
 0x26e   :  { %v1908_v37 = vadd.f32 %v1907_v59, %v1858_v46  ;;  %v4520_v46 = vld [vmem:[#allocation8 + $0xac] sm:$0xf0] }
 0x26f   :  { %v1811_v4 = vpop.f32.mrf.mxu1 }
 0x270   :  { %v1812_v5 = vadd.f32 %v1811_v4, %v1762_v34  ;;  %v4021_v34 = vor.u32 %v4520_v46, %v4020_v15 }
 0x272   :  { %v5129_v0 = vpack.c.bf16 %v1812_v5, %v1810_v20  ;;  %2729 = vmatpush.bf16.msrb.mxu0 %v4021_v34 }
 0x273   :  { %v1865_v35 = vpop.f32.mrf.mxu2  ;;  %v1770_v18 = vpop.f32.mrf.mxu0 }
 0x274   :  { %2547 = vmatmul.bf16.gmra.mxu0 %v5129_v0  ;;  %2645 = vmatmul.bf16.gmra.mxu2 %v5129_v0 }
 0x275   :  { %v1909_v21 = vpop.f32.mrf.mxu3 }
 0x276   :  { %v1910_v41 = vadd.f32 %v1909_v21, %v1860_v57  ;;  %v4511_v57 = vld [vmem:[#allocation8 + $0x6c] sm:$0xf]  ;;  %v3977_v21 = vor.u32 %v4505_v39, %v3974_v6  ;;  %v4318_v6 = vld [vmem:[#allocation8 + $0x2f8] sm:$0xf0] }
 0x277   :  { %v1814_v25 = vpop.f32.mrf.mxu1  ;;  %v4001_v61 = vor.u32 %v4511_v57, %v3998_v55  ;;  %v3948_v57 = vld [vmem:[#allocation8 + $0x8] sm:$0xf]  ;;  %v4502_v55 = vld [vmem:[#allocation8 + $0x1c] sm:$0xf0] }
 0x278   :  { %v5133_v43 = vpack.c.bf16 %v1910_v41, %v1908_v37  ;;  %v1815_v56 = vadd.f32 %v1814_v25, %v1765_v45  ;;  %v4190_v45 = vld [vmem:[#allocation8 + $0x200] sm:$0xf0]  ;;  %v4166_v37 = vld [vmem:[#allocation8 + $0x1d0] sm:$0xf0] }
 0x279   :  { %v4193_v24 = vor.u32 %v4559_v19, %v4190_v45  ;;  %2828 = vmatpush.bf16.msrb.mxu2 %v4001_v61  ;;  %v3949_v61 = vor.u32 %v4502_v55, %v3948_v57  ;;  %v4140_v45 = vld [vmem:[#allocation8 + $0x188] sm:$0xf]  ;;  %v4292_v57 = vld [vmem:[#allocation8 + $0x2b0] sm:$0xf] }
 0x27a   :  { %2596 = vmatmul.bf16.gmra.mxu1 %v5133_v43  ;;  %2694 = vmatmul.bf16.gmra.mxu3 %v5133_v43 }
 0x27b   :  { %v1868_v14 = vpop.f32.mrf.mxu2  ;;  %v1772_v3 = vpop.f32.mrf.mxu0  ;;  %2877 = vmatpush.bf16.msrb.mxu3 %v4193_v24  ;;  %v4550_v24 = vld [vmem:[#allocation8 + $0x19c] sm:$0xf0] }
 0x27d   :  { %v1912_v9 = vpop.f32.mrf.mxu3  ;;  %2829 = vmatpush.bf16.msrb.mxu2 %v3977_v21 }
 0x27e   :  { %v1913_v22 = vadd.f32 %v1912_v9, %v1863_v11  ;;  %v3996_v11 = vld [vmem:[#allocation8 + $0x68] sm:$0xf]  ;;  %v4508_v9 = vld [vmem:[#allocation8 + $0x4c] sm:$0xf0] }
 0x27f   :  { %v1816_v29 = vpop.f32.mrf.mxu1  ;;  %v3997_v59 = vor.u32 %v4514_v30, %v3996_v11 }
 0x280   :  { %v1817_v60 = vadd.f32 %v1816_v29, %v1767_v48  ;;  %v4562_v48 = vld [vmem:[#allocation8 + $0x1fc] sm:$0xf0]  ;;  %v3973_v29 = vor.u32 %v4508_v9, %v3972_v54  ;;  %v4593_v9 = vld [vmem:[#allocation8 + $0x2f4] sm:$0xf0] }
 0x281   :  { %v4189_v4 = vor.u32 %v4562_v48, %v4188_v50  ;;  %2730 = vmatpush.bf16.msrb.mxu0 %v3997_v59 }
 0x282   :  { %v5137_v7 = vpack.c.bf16 %v1817_v60, %v1815_v56  ;;  %v4556_v56 = vld [vmem:[#allocation8 + $0x1cc] sm:$0xf0] }
 0x283   :  { %v1870_v62 = vpop.f32.mrf.mxu2  ;;  %v1775_v52 = vpop.f32.mrf.mxu0  ;;  %2779 = vmatpush.bf16.msrb.mxu1 %v4189_v4 }
 0x284   :  { %2552 = vmatmul.bf16.gmra.mxu0 %v5137_v7  ;;  %2650 = vmatmul.bf16.gmra.mxu2 %v5137_v7 }
 0x285   :  { %v1914_v28 = vpop.f32.mrf.mxu3  ;;  %2731 = vmatpush.bf16.msrb.mxu0 %v3973_v29 }
 0x286   :  { %v1915_v13 = vadd.f32 %v1914_v28, %v1865_v35  ;;  %v4553_v35 = vld [vmem:[#allocation8 + $0x1bc] sm:$0xf]  ;;  %v3950_v28 = vld [vmem:[#allocation8 + $0x20] sm:$0xf0] }
 0x287   :  { %v1819_v51 = vpop.f32.mrf.mxu1  ;;  %v4169_v41 = vor.u32 %v4553_v35, %v4166_v37 }
 0x288   :  { %v5141_v23 = vpack.c.bf16 %v1915_v13, %v1913_v22  ;;  %v1820_v8 = vadd.f32 %v1819_v51, %v1770_v18  ;;  %v4547_v22 = vld [vmem:[#allocation8 + $0x18c] sm:$0xf]  ;;  %v3953_v51 = vor.u32 %v4499_v47, %v3950_v28 }
 0x289   :  { %2878 = vmatpush.bf16.msrb.mxu3 %v4169_v41  ;;  %2732 = vmatpush.bf16.msrb.mxu0 %v3949_v61  ;;  %v4294_v28 = vld [vmem:[#allocation8 + $0x2c8] sm:$0xf0] }
 0x28a   :  { %2601 = vmatmul.bf16.gmra.mxu1 %v5141_v23  ;;  %2699 = vmatmul.bf16.gmra.mxu3 %v5141_v23 }
 0x28b   :  { %v1873_v27 = vpop.f32.mrf.mxu2  ;;  %v1777_v31 = vpop.f32.mrf.mxu0  ;;  %2830 = vmatpush.bf16.msrb.mxu2 %v3953_v51  ;;  %v4100_v51 = vld [vmem:[#allocation8 + $0x130] sm:$0xf] }
 0x28d   :  { %v1917_v58 = vpop.f32.mrf.mxu3 }
 0x28e   :  { %v1918_v5 = vadd.f32 %v1917_v58, %v1868_v14  ;;  %v4164_v14 = vld [vmem:[#allocation8 + $0x1b8] sm:$0xf]  ;;  %v4141_v58 = vor.u32 %v4550_v24, %v4140_v45 }
 0x28f   :  { %v1821_v16 = vpop.f32.mrf.mxu1  ;;  %v4165_v60 = vor.u32 %v4556_v56, %v4164_v14 }
 0x290   :  { %v1822_v10 = vadd.f32 %v1821_v16, %v1772_v3 }
 0x291   :  { %2780 = vmatpush.bf16.msrb.mxu1 %v4165_v60 }
 0x292   :  { %v5145_v26 = vpack.c.bf16 %v1822_v10, %v1820_v8 }
 0x293   :  { %v1875_v25 = vpop.f32.mrf.mxu2  ;;  %v1780_v36 = vpop.f32.mrf.mxu0 }
 0x294   :  { %2557 = vmatmul.bf16.gmra.mxu0 %v5145_v26  ;;  %2655 = vmatmul.bf16.gmra.mxu2 %v5145_v26 }
 0x295   :  { %v1919_v20 = vpop.f32.mrf.mxu3  ;;  %2781 = vmatpush.bf16.msrb.mxu1 %v4141_v58 }
 0x296   :  { %v1920_v40 = vadd.f32 %v1919_v20, %v1870_v62  ;;  %v4142_v62 = vld [vmem:[#allocation8 + $0x1a0] sm:$0xf0] }
 0x297   :  { %v1824_v42 = vpop.f32.mrf.mxu1  ;;  %v4145_v19 = vor.u32 %v4547_v22, %v4142_v62  ;;  %v4539_v62 = vld [vmem:[#allocation8 + $0x144] sm:$0xf0] }
 0x298   :  { %v5149_v44 = vpack.c.bf16 %v1920_v40, %v1918_v5  ;;  %v1825_v2 = vadd.f32 %v1824_v42, %v1775_v52  ;;  %v4542_v5 = vld [vmem:[#allocation8 + $0x164] sm:$0xf]  ;;  %v4126_v40 = vld [vmem:[#allocation8 + $0x178] sm:$0xf0]  ;;  %v4101_v55 = vor.u32 %v4539_v62, %v4100_v51  ;;  %v4244_v62 = vld [vmem:[#allocation8 + $0x250] sm:$0xf] }
 0x299   :  { %2879 = vmatpush.bf16.msrb.mxu3 %v4145_v19  ;;  %v4129_v39 = vor.u32 %v4542_v5, %v4126_v40  ;;  %v4587_v19 = vld [vmem:[#allocation8 + $0x2c4] sm:$0xf0] }
 0x29a   :  { %2606 = vmatmul.bf16.gmra.mxu1 %v5149_v44  ;;  %2704 = vmatmul.bf16.gmra.mxu3 %v5149_v44  ;;  %v4293_v61 = vor.u32 %v4587_v19, %v4292_v57  ;;  %v4575_v57 = vld [vmem:[#allocation8 + $0x264] sm:$0xf0] }
 0x29b   :  { %v1878_v3 = vpop.f32.mrf.mxu2  ;;  %v1782_v13 = vpop.f32.mrf.mxu0  ;;  %3019 = vmatpush.bf16.msra.mxu2 %v4129_v39  ;;  %v4533_v39 = vld [vmem:[#allocation8 + $0x114] sm:$0xf0] }
 0x29d   :  { %v1922_v18 = vpop.f32.mrf.mxu3 }
 0x29e   :  { %v1923_v46 = vadd.f32 %v1922_v18, %v1873_v27 }
 0x29f   :  { %v1826_v17 = vpop.f32.mrf.mxu1 }
 0x2a0   :  { %v1827_v1 = vadd.f32 %v1826_v17, %v1777_v31  ;;  %v4590_v31 = vld [vmem:[#allocation8 + $0x2e4] sm:$0xf] }
 0x2a1   :  { %v4321_v35 = vor.u32 %v4590_v31, %v4318_v6 }
 0x2a2   :  { %v5153_v63 = vpack.c.bf16 %v1827_v1, %v1825_v2  ;;  %v4124_v2 = vld [vmem:[#allocation8 + $0x160] sm:$0xf]  ;;  %v4545_v1 = vld [vmem:[#allocation8 + $0x174] sm:$0xf0] }
 0x2a3   :  { %v1880_v11 = vpop.f32.mrf.mxu2  ;;  %v1785_v50 = vpop.f32.mrf.mxu0  ;;  %3068 = vmatpush.bf16.msra.mxu3 %v4321_v35  ;;  %v4125_v54 = vor.u32 %v4545_v1, %v4124_v2  ;;  %v4268_v35 = vld [vmem:[#allocation8 + $0x280] sm:$0xf] }
 0x2a4   :  { %2562 = vmatmul.bf16.gmra.mxu0 %v5153_v63  ;;  %2660 = vmatmul.bf16.gmra.mxu2 %v5153_v63 }
 0x2a5   :  { %v1924_v15 = vpop.f32.mrf.mxu3  ;;  %2921 = vmatpush.bf16.msra.mxu0 %v4125_v54  ;;  %v4524_v54 = vld [vmem:[#allocation8 + $0xd4] sm:$0xf] }
 0x2a6   :  { %v1925_v33 = vadd.f32 %v1924_v15, %v1875_v25 }
 0x2a7   :  { %v1829_v34 = vpop.f32.mrf.mxu1 }
 0x2a8   :  { %v5157_v53 = vpack.c.bf16 %v1925_v33, %v1923_v46  ;;  %v1830_v8 = vadd.f32 %v1829_v34, %v1780_v36  ;;  %v4316_v36 = vld [vmem:[#allocation8 + $0x2e0] sm:$0xf]  ;;  %v4536_v33 = vld [vmem:[#allocation8 + $0x134] sm:$0xf] }
 0x2a9   :  { %v4317_v14 = vor.u32 %v4593_v9, %v4316_v36  ;;  %v4584_v34 = vld [vmem:[#allocation8 + $0x2b4] sm:$0xf]  ;;  %2922 = vmatpush.bf16.msra.mxu0 %v4101_v55  ;;  %v4054_v9 = vld [vmem:[#allocation8 + $0xe8] sm:$0xf0]  ;;  %v4245_v55 = vor.u32 %v4575_v57, %v4244_v62  ;;  %v4196_v62 = vld [vmem:[#allocation8 + $0x1f0] sm:$0xf] }
 0x2aa   :  { %2611 = vmatmul.bf16.gmra.mxu1 %v5157_v53  ;;  %2709 = vmatmul.bf16.gmra.mxu3 %v5157_v53  ;;  %v4297_v22 = vor.u32 %v4584_v34, %v4294_v28  ;;  %v4563_v57 = vld [vmem:[#allocation8 + $0x204] sm:$0xf0] }
 0x2ab   :  { %v1883_v42 = vpop.f32.mrf.mxu2  ;;  %v1787_v37 = vpop.f32.mrf.mxu0  ;;  %2970 = vmatpush.bf16.msra.mxu1 %v4317_v14  ;;  %v4057_v14 = vor.u32 %v4524_v54, %v4054_v9  ;;  %v4512_v54 = vld [vmem:[#allocation8 + $0x74] sm:$0xf]  ;;  %v4006_v9 = vld [vmem:[#allocation8 + $0x88] sm:$0xf0] }
 0x2ac   :  { %3069 = vmatpush.bf16.msra.mxu3 %v4297_v22  ;;  %v4052_v22 = vld [vmem:[#allocation8 + $0xd0] sm:$0xf] }
 0x2ad   :  { %v1927_v52 = vpop.f32.mrf.mxu3 }
 0x2ae   :  { %v1928_v59 = vadd.f32 %v1927_v52, %v1878_v3  ;;  %v4102_v3 = vld [vmem:[#allocation8 + $0x148] sm:$0xf0] }
 0x2af   :  { %v1831_v16 = vpop.f32.mrf.mxu1  ;;  %v4105_v47 = vor.u32 %v4536_v33, %v4102_v3  ;;  %2971 = vmatpush.bf16.msra.mxu1 %v4293_v61 }
 0x2b0   :  { %v1832_v10 = vadd.f32 %v1831_v16, %v1782_v13  ;;  %v4530_v16 = vld [vmem:[#allocation8 + $0x104] sm:$0xf] }
 0x2b1   :  { %3020 = vmatpush.bf16.msra.mxu2 %v4105_v47 }
 0x2b2   :  { %v5161_v30 = vpack.c.bf16 %v1832_v10, %v1830_v8  ;;  %v4078_v8 = vld [vmem:[#allocation8 + $0x118] sm:$0xf0] }
 0x2b3   :  { %v1885_v29 = vpop.f32.mrf.mxu2  ;;  %v4081_v10 = vor.u32 %v4530_v16, %v4078_v8  ;;  %v4518_v16 = vld [vmem:[#allocation8 + $0xa4] sm:$0xf]  ;;  %v4030_v8 = vld [vmem:[#allocation8 + $0xb8] sm:$0xf0] }
 0x2b4   :  { %2567 = vmatmul.bf16.gmra.mxu0 %v5161_v30  ;;  %2665 = vmatmul.bf16.gmra.mxu2 %v5161_v30 }
 0x2b5   :  { %v1929_v27 = vpop.f32.mrf.mxu3  ;;  %3021 = vmatpush.bf16.msra.mxu2 %v4081_v10  ;;  %v4033_v10 = vor.u32 %v4518_v16, %v4030_v8  ;;  %v4506_v16 = vld [vmem:[#allocation8 + $0x44] sm:$0xf]  ;;  %v3982_v8 = vld [vmem:[#allocation8 + $0x58] sm:$0xf0] }
 0x2b6   :  { %v1930_v48 = vadd.f32 %v1929_v27, %v1880_v11  ;;  %v4578_v11 = vld [vmem:[#allocation8 + $0x284] sm:$0xf] }
 0x2b7   :  { %v1834_v4 = vpop.f32.mrf.mxu1 }
 0x2b8   :  { %v5165_v20 = vpack.c.bf16 %v1930_v48, %v1928_v59  ;;  %v1835_v25 = vadd.f32 %v1834_v4, %v1785_v50  ;;  %v4270_v50 = vld [vmem:[#allocation8 + $0x298] sm:$0xf0] }
 0x2b9   :  { %v4273_v27 = vor.u32 %v4578_v11, %v4270_v50  ;;  %3022 = vmatpush.bf16.msra.mxu2 %v4057_v14  ;;  %v4566_v11 = vld [vmem:[#allocation8 + $0x224] sm:$0xf]  ;;  %v4222_v50 = vld [vmem:[#allocation8 + $0x238] sm:$0xf0]  ;;  %v4009_v14 = vor.u32 %v4512_v54, %v4006_v9  ;;  %v4500_v54 = vld [vmem:[#allocation8 + $0x14] sm:$0xf] }
 0x2ba   :  { %2616 = vmatmul.bf16.gmra.mxu1 %v5165_v20  ;;  %2714 = vmatmul.bf16.gmra.mxu3 %v5165_v20  ;;  %v3958_v9 = vld [vmem:[#allocation8 + $0x28] sm:$0xf0] }
 0x2bb   :  { %3070 = vmatpush.bf16.msra.mxu3 %v4273_v27  ;;  %v4225_v27 = vor.u32 %v4566_v11, %v4222_v50  ;;  %v4554_v11 = vld [vmem:[#allocation8 + $0x1c4] sm:$0xf]  ;;  %v4174_v50 = vld [vmem:[#allocation8 + $0x1d8] sm:$0xf0] }
 0x2bd   :  { %v1932_v21 = vpop.f32.mrf.mxu3  ;;  %3023 = vmatpush.bf16.msra.mxu2 %v4033_v10  ;;  %v3985_v10 = vor.u32 %v4506_v16, %v3982_v8 }
 0x2be   :  { %v1933_v60 = vadd.f32 %v1932_v21, %v1883_v42  ;;  %v4076_v42 = vld [vmem:[#allocation8 + $0x100] sm:$0xf]  ;;  %v4581_v21 = vld [vmem:[#allocation8 + $0x294] sm:$0xf0] }
 0x2bf   :  { %v1836_v41 = vpop.f32.mrf.mxu1  ;;  %v4077_v6 = vor.u32 %v4533_v39, %v4076_v42  ;;  %v4028_v42 = vld [vmem:[#allocation8 + $0xa0] sm:$0xf]  ;;  %v4521_v39 = vld [vmem:[#allocation8 + $0xb4] sm:$0xf0] }
 0x2c0   :  { %v1837_v18 = vadd.f32 %v1836_v41, %v1787_v37  ;;  %v4269_v37 = vor.u32 %v4581_v21, %v4268_v35  ;;  %v4220_v35 = vld [vmem:[#allocation8 + $0x220] sm:$0xf]  ;;  %v4569_v21 = vld [vmem:[#allocation8 + $0x234] sm:$0xf0] }
 0x2c1   :  { %2923 = vmatpush.bf16.msra.mxu0 %v4077_v6  ;;  %v4029_v6 = vor.u32 %v4521_v39, %v4028_v42  ;;  %3024 = vmatpush.bf16.msra.mxu2 %v4009_v14  ;;  %v3980_v42 = vld [vmem:[#allocation8 + $0x40] sm:$0xf]  ;;  %v4509_v39 = vld [vmem:[#allocation8 + $0x54] sm:$0xf0]  ;;  %v3961_v14 = vor.u32 %v4500_v54, %v3958_v9 }
 0x2c2   :  { %v5169_v17 = vpack.c.bf16 %v1837_v18, %v1835_v25  ;;  %2972 = vmatpush.bf16.msra.mxu1 %v4269_v37  ;;  %v4221_v37 = vor.u32 %v4569_v21, %v4220_v35  ;;  %v4172_v35 = vld [vmem:[#allocation8 + $0x1c0] sm:$0xf]  ;;  %v4557_v21 = vld [vmem:[#allocation8 + $0x1d4] sm:$0xf0] }
 0x2c4   :  { %2572 = vmatmul.bf16.gmra.mxu0 %v5169_v17  ;;  %2670 = vmatmul.bf16.gmra.mxu2 %v5169_v17 }
 0x2c5   :  { %v1934_v56 = vpop.f32.mrf.mxu3  ;;  %3025 = vmatpush.bf16.msra.mxu2 %v3985_v10 }
 0x2c6   :  { %v1935_v15 = vadd.f32 %v1934_v56, %v1885_v29  ;;  %v4572_v29 = vld [vmem:[#allocation8 + $0x254] sm:$0xf]  ;;  %v4246_v56 = vld [vmem:[#allocation8 + $0x268] sm:$0xf0]  ;;  %2973 = vmatpush.bf16.msra.mxu1 %v4245_v55  ;;  %v4197_v55 = vor.u32 %v4563_v57, %v4196_v62  ;;  %v4148_v62 = vld [vmem:[#allocation8 + $0x190] sm:$0xf] }
 0x2c7   :  { %v4551_v57 = vld [vmem:[#allocation8 + $0x1a4] sm:$0xf0] }
 0x2c8   :  { %v5173_v46 = vpack.c.bf16 %v1935_v15, %v1933_v60  ;;  %v4249_v60 = vor.u32 %v4572_v29, %v4246_v56  ;;  %v4560_v29 = vld [vmem:[#allocation8 + $0x1f4] sm:$0xf]  ;;  %v4198_v56 = vld [vmem:[#allocation8 + $0x208] sm:$0xf0] }
 0x2c9   :  { %3026 = vmatpush.bf16.msra.mxu2 %v3961_v14 }
 0x2ca   :  { %2621 = vmatmul.bf16.gmra.mxu1 %v5173_v46  ;;  %2719 = vmatmul.bf16.gmra.mxu3 %v5173_v46 }
 0x2cb   :  { %3071 = vmatpush.bf16.msra.mxu3 %v4249_v60  ;;  %2974 = vmatpush.bf16.msra.mxu1 %v4221_v37  ;;  %v4201_v60 = vor.u32 %v4560_v29, %v4198_v56  ;;  %v4173_v37 = vor.u32 %v4557_v21, %v4172_v35  ;;  %v4548_v29 = vld [vmem:[#allocation8 + $0x194] sm:$0xf]  ;;  %v4150_v56 = vld [vmem:[#allocation8 + $0x1a8] sm:$0xf0] }
 0x2cf   :  { %3072 = vmatpush.bf16.msra.mxu3 %v4225_v27  ;;  %2975 = vmatpush.bf16.msra.mxu1 %v4197_v55  ;;  %v4177_v27 = vor.u32 %v4554_v11, %v4174_v50  ;;  %v4149_v55 = vor.u32 %v4551_v57, %v4148_v62 }
 0x2d1   :  { %v2538_v13 = vpop.f32.mrf.mxu0 }
 0x2d3   :  { %3073 = vmatpush.bf16.msra.mxu3 %v4201_v60  ;;  %2976 = vmatpush.bf16.msra.mxu1 %v4173_v37  ;;  %v4153_v60 = vor.u32 %v4548_v29, %v4150_v56 }
 0x2d4   :  { %2733 = vmatmul.bf16.vlgmr.msrb.gmra.mxu0 %v5113_v12  ;;  %2831 = vmatmul.bf16.vlgmr.msrb.gmra.mxu2 %v5113_v12 }
 0x2d7   :  { %v2587_v45 = vpop.f32.mrf.mxu1  ;;  %v2636_v24 = vpop.f32.mrf.mxu2  ;;  %3074 = vmatpush.bf16.msra.mxu3 %v4177_v27  ;;  %2977 = vmatpush.bf16.msra.mxu1 %v4149_v55 }
 0x2d8   :  { %v2588_v52 = vadd.f32 %v2587_v45, %v2538_v13  ;;  %v4527_v13 = vld [vmem:[#allocation8 + $0xe4] sm:$0xf0] }
 0x2d9   :  { %v2540_v58 = vpop.f32.mrf.mxu0  ;;  %v4053_v51 = vor.u32 %v4527_v13, %v4052_v22  ;;  %v4004_v22 = vld [vmem:[#allocation8 + $0x70] sm:$0xf]  ;;  %v4515_v13 = vld [vmem:[#allocation8 + $0x84] sm:$0xf0] }
 0x2da   :  { %3117 = vst [vmem:[#allocation10] sm:$0xff] %v2588_v52  ;;  %2782 = vmatmul.bf16.vlgmr.msrb.gmra.mxu1 %v5117_v32  ;;  %2880 = vmatmul.bf16.vlgmr.msrb.gmra.mxu3 %v5117_v32 }
 0x2db   :  { %2924 = vmatpush.bf16.msra.mxu0 %v4053_v51  ;;  %v4005_v51 = vor.u32 %v4515_v13, %v4004_v22  ;;  %3075 = vmatpush.bf16.msra.mxu3 %v4153_v60 }
 0x2dd   :  { %v2685_v59 = vpop.f32.mrf.mxu3 }
 0x2de   :  { %v2686_v48 = vadd.f32 %v2685_v59, %v2636_v24 }
 0x2df   :  { %v2589_v4 = vpop.f32.mrf.mxu1  ;;  %v2638_v5 = vpop.f32.mrf.mxu2  ;;  %2925 = vmatpush.bf16.msra.mxu0 %v4029_v6  ;;  %v3981_v6 = vor.u32 %v4509_v39, %v3980_v42 }
 0x2e0   :  { %3118 = vst [vmem:[#allocation10 + $0x8] sm:$0xff] %v2686_v48  ;;  %v2590_v40 = vadd.f32 %v2589_v4, %v2540_v58 }
 0x2e1   :  { %v2543_v31 = vpop.f32.mrf.mxu0 }
 0x2e2   :  { %3123 = vst [vmem:[#allocation10 + $0x30] sm:$0xff] %v2590_v40 }
 0x2e3   :  { %2926 = vmatpush.bf16.msra.mxu0 %v4005_v51 }
 0x2e4   :  { %2738 = vmatmul.bf16.gmra.mxu0 %v5121_v49  ;;  %2836 = vmatmul.bf16.gmra.mxu2 %v5121_v49 }
 0x2e5   :  { %v2687_v41 = vpop.f32.mrf.mxu3 }
 0x2e6   :  { %v2688_v25 = vadd.f32 %v2687_v41, %v2638_v5 }
 0x2e7   :  { %v2592_v18 = vpop.f32.mrf.mxu1  ;;  %v2641_v2 = vpop.f32.mrf.mxu2  ;;  %2927 = vmatpush.bf16.msra.mxu0 %v3981_v6 }
 0x2e8   :  { %3124 = vst [vmem:[#allocation10 + $0x38] sm:$0xff] %v2688_v25  ;;  %v2593_v1 = vadd.f32 %v2592_v18, %v2543_v31 }
 0x2e9   :  { %v2545_v36 = vpop.f32.mrf.mxu0 }
 0x2ea   :  { %3129 = vst [vmem:[#allocation10 + $0x60] sm:$0xff] %v2593_v1  ;;  %2787 = vmatmul.bf16.gmra.mxu1 %v5125_v38  ;;  %2885 = vmatmul.bf16.gmra.mxu3 %v5125_v38 }
 0x2ed   :  { %v2690_v15 = vpop.f32.mrf.mxu3 }
 0x2ee   :  { %v2691_v33 = vadd.f32 %v2690_v15, %v2641_v2 }
 0x2ef   :  { %v2594_v3 = vpop.f32.mrf.mxu1  ;;  %v2643_v34 = vpop.f32.mrf.mxu2 }
 0x2f0   :  { %3130 = vst [vmem:[#allocation10 + $0x68] sm:$0xff] %v2691_v33  ;;  %v2595_v47 = vadd.f32 %v2594_v3, %v2545_v36 }
 0x2f1   :  { %v2548_v28 = vpop.f32.mrf.mxu0 }
 0x2f2   :  { %3135 = vst [vmem:[#allocation10 + $0x90] sm:$0xff] %v2595_v47 }
 0x2f4   :  { %2743 = vmatmul.bf16.gmra.mxu0 %v5129_v0  ;;  %2841 = vmatmul.bf16.gmra.mxu2 %v5129_v0 }
 0x2f5   :  { %v2692_v19 = vpop.f32.mrf.mxu3 }
 0x2f6   :  { %v2693_v61 = vadd.f32 %v2692_v19, %v2643_v34 }
 0x2f7   :  { %v2597_v45 = vpop.f32.mrf.mxu1  ;;  %v2646_v24 = vpop.f32.mrf.mxu2 }
 0x2f8   :  { %3136 = vst [vmem:[#allocation10 + $0x98] sm:$0xff] %v2693_v61  ;;  %v2598_v52 = vadd.f32 %v2597_v45, %v2548_v28 }
 0x2f9   :  { %v2550_v58 = vpop.f32.mrf.mxu0 }
 0x2fa   :  { %3141 = vst [vmem:[#allocation10 + $0xc0] sm:$0xff] %v2598_v52  ;;  %2792 = vmatmul.bf16.gmra.mxu1 %v5133_v43  ;;  %2890 = vmatmul.bf16.gmra.mxu3 %v5133_v43 }
 0x2fd   :  { %v2695_v59 = vpop.f32.mrf.mxu3 }
 0x2fe   :  { %v2696_v48 = vadd.f32 %v2695_v59, %v2646_v24 }
 0x2ff   :  { %v2599_v4 = vpop.f32.mrf.mxu1  ;;  %v2648_v5 = vpop.f32.mrf.mxu2 }
 0x300   :  { %3142 = vst [vmem:[#allocation10 + $0xc8] sm:$0xff] %v2696_v48  ;;  %v2600_v40 = vadd.f32 %v2599_v4, %v2550_v58 }
 0x301   :  { %v2553_v31 = vpop.f32.mrf.mxu0 }
 0x302   :  { %3147 = vst [vmem:[#allocation10 + $0xf0] sm:$0xff] %v2600_v40 }
 0x304   :  { %2748 = vmatmul.bf16.gmra.mxu0 %v5137_v7  ;;  %2846 = vmatmul.bf16.gmra.mxu2 %v5137_v7 }
 0x305   :  { %v2697_v41 = vpop.f32.mrf.mxu3 }
 0x306   :  { %v2698_v25 = vadd.f32 %v2697_v41, %v2648_v5 }
 0x307   :  { %v2602_v18 = vpop.f32.mrf.mxu1  ;;  %v2651_v2 = vpop.f32.mrf.mxu2 }
 0x308   :  { %3148 = vst [vmem:[#allocation10 + $0xf8] sm:$0xff] %v2698_v25  ;;  %v2603_v1 = vadd.f32 %v2602_v18, %v2553_v31 }
 0x309   :  { %v2555_v36 = vpop.f32.mrf.mxu0 }
 0x30a   :  { %3153 = vst [vmem:[#allocation10 + $0x120] sm:$0xff] %v2603_v1  ;;  %2797 = vmatmul.bf16.gmra.mxu1 %v5141_v23  ;;  %2895 = vmatmul.bf16.gmra.mxu3 %v5141_v23 }
 0x30d   :  { %v2700_v15 = vpop.f32.mrf.mxu3 }
 0x30e   :  { %v2701_v33 = vadd.f32 %v2700_v15, %v2651_v2 }
 0x30f   :  { %v2604_v3 = vpop.f32.mrf.mxu1  ;;  %v2653_v34 = vpop.f32.mrf.mxu2 }
 0x310   :  { %3154 = vst [vmem:[#allocation10 + $0x128] sm:$0xff] %v2701_v33  ;;  %v2605_v47 = vadd.f32 %v2604_v3, %v2555_v36 }
 0x311   :  { %v2558_v28 = vpop.f32.mrf.mxu0 }
 0x312   :  { %3159 = vst [vmem:[#allocation10 + $0x150] sm:$0xff] %v2605_v47  ;;  %v3956_v47 = vld [vmem:[#allocation8 + $0x10] sm:$0xf] }
 0x314   :  { %2753 = vmatmul.bf16.gmra.mxu0 %v5145_v26  ;;  %2851 = vmatmul.bf16.gmra.mxu2 %v5145_v26 }
 0x315   :  { %v2702_v19 = vpop.f32.mrf.mxu3 }
 0x316   :  { %v2703_v61 = vadd.f32 %v2702_v19, %v2653_v34 }
 0x317   :  { %v2607_v45 = vpop.f32.mrf.mxu1  ;;  %v2656_v24 = vpop.f32.mrf.mxu2 }
 0x318   :  { %3160 = vst [vmem:[#allocation10 + $0x158] sm:$0xff] %v2703_v61  ;;  %v2608_v52 = vadd.f32 %v2607_v45, %v2558_v28  ;;  %v4503_v28 = vld [vmem:[#allocation8 + $0x24] sm:$0xf0] }
 0x319   :  { %v2560_v58 = vpop.f32.mrf.mxu0  ;;  %v3957_v13 = vor.u32 %v4503_v28, %v3956_v47 }
 0x31a   :  { %3165 = vst [vmem:[#allocation10 + $0x180] sm:$0xff] %v2608_v52  ;;  %2802 = vmatmul.bf16.gmra.mxu1 %v5149_v44  ;;  %2900 = vmatmul.bf16.gmra.mxu3 %v5149_v44 }
 0x31b   :  { %2928 = vmatpush.bf16.msra.mxu0 %v3957_v13 }
 0x31d   :  { %v2705_v59 = vpop.f32.mrf.mxu3 }
 0x31e   :  { %v2706_v48 = vadd.f32 %v2705_v59, %v2656_v24 }
 0x31f   :  { %v2609_v4 = vpop.f32.mrf.mxu1  ;;  %v2658_v5 = vpop.f32.mrf.mxu2 }
 0x320   :  { %3166 = vst [vmem:[#allocation10 + $0x188] sm:$0xff] %v2706_v48  ;;  %v2610_v40 = vadd.f32 %v2609_v4, %v2560_v58 }
 0x321   :  { %v2563_v31 = vpop.f32.mrf.mxu0 }
 0x322   :  { %3171 = vst [vmem:[#allocation10 + $0x1b0] sm:$0xff] %v2610_v40 }
 0x324   :  { %2758 = vmatmul.bf16.gmra.mxu0 %v5153_v63  ;;  %2856 = vmatmul.bf16.gmra.mxu2 %v5153_v63 }
 0x325   :  { %v2707_v41 = vpop.f32.mrf.mxu3 }
 0x326   :  { %v2708_v25 = vadd.f32 %v2707_v41, %v2658_v5 }
 0x327   :  { %v2612_v18 = vpop.f32.mrf.mxu1  ;;  %v2661_v2 = vpop.f32.mrf.mxu2 }
 0x328   :  { %3172 = vst [vmem:[#allocation10 + $0x1b8] sm:$0xff] %v2708_v25  ;;  %v2613_v1 = vadd.f32 %v2612_v18, %v2563_v31 }
 0x329   :  { %v2565_v36 = vpop.f32.mrf.mxu0 }
 0x32a   :  { %3177 = vst [vmem:[#allocation10 + $0x1e0] sm:$0xff] %v2613_v1  ;;  %2807 = vmatmul.bf16.gmra.mxu1 %v5157_v53  ;;  %2905 = vmatmul.bf16.gmra.mxu3 %v5157_v53 }
 0x32d   :  { %v2710_v15 = vpop.f32.mrf.mxu3 }
 0x32e   :  { %v2711_v33 = vadd.f32 %v2710_v15, %v2661_v2 }
 0x32f   :  { %v2614_v3 = vpop.f32.mrf.mxu1  ;;  %v2663_v34 = vpop.f32.mrf.mxu2 }
 0x330   :  { %3178 = vst [vmem:[#allocation10 + $0x1e8] sm:$0xff] %v2711_v33  ;;  %v2615_v22 = vadd.f32 %v2614_v3, %v2565_v36 }
 0x331   :  { %v2568_v51 = vpop.f32.mrf.mxu0 }
 0x332   :  { %3183 = vst [vmem:[#allocation10 + $0x210] sm:$0xff] %v2615_v22 }
 0x334   :  { %2763 = vmatmul.bf16.gmra.mxu0 %v5161_v30  ;;  %2861 = vmatmul.bf16.gmra.mxu2 %v5161_v30 }
 0x335   :  { %v2712_v19 = vpop.f32.mrf.mxu3 }
 0x336   :  { %v2713_v61 = vadd.f32 %v2712_v19, %v2663_v34 }
 0x337   :  { %v2617_v45 = vpop.f32.mrf.mxu1  ;;  %v2666_v24 = vpop.f32.mrf.mxu2 }
 0x338   :  { %3184 = vst [vmem:[#allocation10 + $0x218] sm:$0xff] %v2713_v61  ;;  %v2618_v52 = vadd.f32 %v2617_v45, %v2568_v51 }
 0x339   :  { %v2570_v58 = vpop.f32.mrf.mxu0 }
 0x33a   :  { %3189 = vst [vmem:[#allocation10 + $0x240] sm:$0xff] %v2618_v52  ;;  %2812 = vmatmul.bf16.gmra.mxu1 %v5165_v20  ;;  %2910 = vmatmul.bf16.gmra.mxu3 %v5165_v20 }
 0x33d   :  { %v2715_v16 = vpop.f32.mrf.mxu3 }
 0x33e   :  { %v2716_v8 = vadd.f32 %v2715_v16, %v2666_v24 }
 0x33f   :  { %v2619_v10 = vpop.f32.mrf.mxu1  ;;  %v2668_v11 = vpop.f32.mrf.mxu2 }
 0x340   :  { %3190 = vst [vmem:[#allocation10 + $0x248] sm:$0xff] %v2716_v8  ;;  %v2620_v50 = vadd.f32 %v2619_v10, %v2570_v58 }
 0x341   :  { %v2573_v27 = vpop.f32.mrf.mxu0 }
 0x342   :  { %3195 = vst [vmem:[#allocation10 + $0x270] sm:$0xff] %v2620_v50 }
 0x344   :  { %2768 = vmatmul.bf16.gmra.mxu0 %v5169_v17  ;;  %2866 = vmatmul.bf16.gmra.mxu2 %v5169_v17 }
 0x345   :  { %v2717_v59 = vpop.f32.mrf.mxu3 }
 0x346   :  { %v2718_v48 = vadd.f32 %v2717_v59, %v2668_v11 }
 0x347   :  { %v2622_v4 = vpop.f32.mrf.mxu1  ;;  %v2671_v5 = vpop.f32.mrf.mxu2 }
 0x348   :  { %3196 = vst [vmem:[#allocation10 + $0x278] sm:$0xff] %v2718_v48  ;;  %v2623_v40 = vadd.f32 %v2622_v4, %v2573_v27 }
 0x349   :  { %v2575_v31 = vpop.f32.mrf.mxu0 }
 0x34a   :  { %3201 = vst [vmem:[#allocation10 + $0x2a0] sm:$0xff] %v2623_v40  ;;  %2817 = vmatmul.bf16.gmra.mxu1 %v5173_v46  ;;  %2915 = vmatmul.bf16.gmra.mxu3 %v5173_v46 }
 0x34d   :  { %v2720_v42 = vpop.f32.mrf.mxu3 }
 0x34e   :  { %v2721_v39 = vadd.f32 %v2720_v42, %v2671_v5 }
 0x34f   :  { %v2624_v6 = vpop.f32.mrf.mxu1  ;;  %v2673_v35 = vpop.f32.mrf.mxu2 }
 0x350   :  { %3202 = vst [vmem:[#allocation10 + $0x2a8] sm:$0xff] %v2721_v39  ;;  %v2625_v21 = vadd.f32 %v2624_v6, %v2575_v31 }
 0x351   :  { %v2734_v37 = vpop.f32.mrf.mxu0 }
 0x352   :  { %3207 = vst [vmem:[#allocation10 + $0x2d0] sm:$0xff] %v2625_v21 }
 0x354   :  { %2929 = vmatmul.bf16.vlgmr.msra.gmra.mxu0 %v5113_v12  ;;  %3027 = vmatmul.bf16.vlgmr.msra.gmra.mxu2 %v5113_v12 }
 0x355   :  { %v2722_v41 = vpop.f32.mrf.mxu3 }
 0x356   :  { %v2723_v25 = vadd.f32 %v2722_v41, %v2673_v35 }
 0x357   :  { %v2783_v18 = vpop.f32.mrf.mxu1  ;;  %v2832_v2 = vpop.f32.mrf.mxu2 }
 0x358   :  { %3208 = vst [vmem:[#allocation10 + $0x2d8] sm:$0xff] %v2723_v25  ;;  %v2784_v1 = vadd.f32 %v2783_v18, %v2734_v37 }
 0x359   :  { %v2736_v36 = vpop.f32.mrf.mxu0 }
 0x35a   :  { %3119 = vst [vmem:[#allocation10 + $0x10] sm:$0xff] %v2784_v1  ;;  %2978 = vmatmul.bf16.vlgmr.msra.gmra.mxu1 %v5117_v32  ;;  %3076 = vmatmul.bf16.vlgmr.msra.gmra.mxu3 %v5117_v32 }
 0x35d   :  { %v2881_v54 = vpop.f32.mrf.mxu3 }
 0x35e   :  { %v2882_v9 = vadd.f32 %v2881_v54, %v2832_v2 }
 0x35f   :  { %v2785_v14 = vpop.f32.mrf.mxu1  ;;  %v2834_v29 = vpop.f32.mrf.mxu2 }
 0x360   :  { %3120 = vst [vmem:[#allocation10 + $0x18] sm:$0xff] %v2882_v9  ;;  %v2786_v56 = vadd.f32 %v2785_v14, %v2736_v36 }
 0x361   :  { %v2739_v60 = vpop.f32.mrf.mxu0 }
 0x362   :  { %3125 = vst [vmem:[#allocation10 + $0x40] sm:$0xff] %v2786_v56 }
 0x364   :  { %2934 = vmatmul.bf16.gmra.mxu0 %v5121_v49  ;;  %3032 = vmatmul.bf16.gmra.mxu2 %v5121_v49 }
 0x365   :  { %v2883_v12 = vpop.f32.mrf.mxu3 }
 0x366   :  { %v2884_v15 = vadd.f32 %v2883_v12, %v2834_v29 }
 0x367   :  { %v2788_v33 = vpop.f32.mrf.mxu1  ;;  %v2837_v3 = vpop.f32.mrf.mxu2 }
 0x368   :  { %3126 = vst [vmem:[#allocation10 + $0x48] sm:$0xff] %v2884_v15  ;;  %v2789_v34 = vadd.f32 %v2788_v33, %v2739_v60 }
 0x369   :  { %v2741_v47 = vpop.f32.mrf.mxu0 }
 0x36a   :  { %3131 = vst [vmem:[#allocation10 + $0x70] sm:$0xff] %v2789_v34  ;;  %2983 = vmatmul.bf16.gmra.mxu1 %v5125_v38  ;;  %3081 = vmatmul.bf16.gmra.mxu3 %v5125_v38 }
 0x36d   :  { %v2886_v32 = vpop.f32.mrf.mxu3 }
 0x36e   :  { %v2887_v28 = vadd.f32 %v2886_v32, %v2837_v3 }
 0x36f   :  { %v2790_v22 = vpop.f32.mrf.mxu1  ;;  %v2839_v13 = vpop.f32.mrf.mxu2 }
 0x370   :  { %3132 = vst [vmem:[#allocation10 + $0x78] sm:$0xff] %v2887_v28  ;;  %v2791_v51 = vadd.f32 %v2790_v22, %v2741_v47 }
 0x371   :  { %v2744_v62 = vpop.f32.mrf.mxu0 }
 0x372   :  { %3137 = vst [vmem:[#allocation10 + $0xa0] sm:$0xff] %v2791_v51 }
 0x374   :  { %2939 = vmatmul.bf16.gmra.mxu0 %v5129_v0  ;;  %3037 = vmatmul.bf16.gmra.mxu2 %v5129_v0 }
 0x375   :  { %v2888_v49 = vpop.f32.mrf.mxu3 }
 0x376   :  { %v2889_v57 = vadd.f32 %v2888_v49, %v2839_v13 }
 0x377   :  { %v2793_v55 = vpop.f32.mrf.mxu1  ;;  %v2842_v19 = vpop.f32.mrf.mxu2 }
 0x378   :  { %3138 = vst [vmem:[#allocation10 + $0xa8] sm:$0xff] %v2889_v57  ;;  %v2794_v61 = vadd.f32 %v2793_v55, %v2744_v62 }
 0x379   :  { %v2746_v45 = vpop.f32.mrf.mxu0 }
 0x37a   :  { %3143 = vst [vmem:[#allocation10 + $0xd0] sm:$0xff] %v2794_v61  ;;  %2988 = vmatmul.bf16.gmra.mxu1 %v5133_v43  ;;  %3086 = vmatmul.bf16.gmra.mxu3 %v5133_v43 }
 0x37d   :  { %v2891_v38 = vpop.f32.mrf.mxu3 }
 0x37e   :  { %v2892_v24 = vadd.f32 %v2891_v38, %v2842_v19 }
 0x37f   :  { %v2795_v52 = vpop.f32.mrf.mxu1  ;;  %v2844_v58 = vpop.f32.mrf.mxu2 }
 0x380   :  { %3144 = vst [vmem:[#allocation10 + $0xd8] sm:$0xff] %v2892_v24  ;;  %v2796_v16 = vadd.f32 %v2795_v52, %v2746_v45 }
 0x381   :  { %v2749_v8 = vpop.f32.mrf.mxu0 }
 0x382   :  { %3149 = vst [vmem:[#allocation10 + $0x100] sm:$0xff] %v2796_v16 }
 0x384   :  { %2944 = vmatmul.bf16.gmra.mxu0 %v5137_v7  ;;  %3042 = vmatmul.bf16.gmra.mxu2 %v5137_v7 }
 0x385   :  { %v2893_v0 = vpop.f32.mrf.mxu3 }
 0x386   :  { %v2894_v10 = vadd.f32 %v2893_v0, %v2844_v58 }
 0x387   :  { %v2798_v11 = vpop.f32.mrf.mxu1  ;;  %v2847_v50 = vpop.f32.mrf.mxu2 }
 0x388   :  { %3150 = vst [vmem:[#allocation10 + $0x108] sm:$0xff] %v2894_v10  ;;  %v2799_v27 = vadd.f32 %v2798_v11, %v2749_v8 }
 0x389   :  { %v2751_v59 = vpop.f32.mrf.mxu0 }
 0x38a   :  { %3155 = vst [vmem:[#allocation10 + $0x130] sm:$0xff] %v2799_v27  ;;  %2993 = vmatmul.bf16.gmra.mxu1 %v5141_v23  ;;  %3091 = vmatmul.bf16.gmra.mxu3 %v5141_v23 }
 0x38d   :  { %v2896_v43 = vpop.f32.mrf.mxu3 }
 0x38e   :  { %v2897_v48 = vadd.f32 %v2896_v43, %v2847_v50 }
 0x38f   :  { %v2800_v4 = vpop.f32.mrf.mxu1  ;;  %v2849_v5 = vpop.f32.mrf.mxu2 }
 0x390   :  { %3156 = vst [vmem:[#allocation10 + $0x138] sm:$0xff] %v2897_v48  ;;  %v2801_v40 = vadd.f32 %v2800_v4, %v2751_v59 }
 0x391   :  { %v2754_v31 = vpop.f32.mrf.mxu0 }
 0x392   :  { %3161 = vst [vmem:[#allocation10 + $0x160] sm:$0xff] %v2801_v40 }
 0x394   :  { %2949 = vmatmul.bf16.gmra.mxu0 %v5145_v26  ;;  %3047 = vmatmul.bf16.gmra.mxu2 %v5145_v26 }
 0x395   :  { %v2898_v7 = vpop.f32.mrf.mxu3 }
 0x396   :  { %v2899_v42 = vadd.f32 %v2898_v7, %v2849_v5 }
 0x397   :  { %v2803_v39 = vpop.f32.mrf.mxu1  ;;  %v2852_v6 = vpop.f32.mrf.mxu2 }
 0x398   :  { %3162 = vst [vmem:[#allocation10 + $0x168] sm:$0xff] %v2899_v42  ;;  %v2804_v35 = vadd.f32 %v2803_v39, %v2754_v31 }
 0x399   :  { %v2756_v21 = vpop.f32.mrf.mxu0 }
 0x39a   :  { %3167 = vst [vmem:[#allocation10 + $0x190] sm:$0xff] %v2804_v35  ;;  %2998 = vmatmul.bf16.gmra.mxu1 %v5149_v44  ;;  %3096 = vmatmul.bf16.gmra.mxu3 %v5149_v44 }
 0x39d   :  { %v2901_v23 = vpop.f32.mrf.mxu3 }
 0x39e   :  { %v2902_v37 = vadd.f32 %v2901_v23, %v2852_v6 }
 0x39f   :  { %v2805_v41 = vpop.f32.mrf.mxu1  ;;  %v2854_v25 = vpop.f32.mrf.mxu2 }
 0x3a0   :  { %3168 = vst [vmem:[#allocation10 + $0x198] sm:$0xff] %v2902_v37  ;;  %v2806_v18 = vadd.f32 %v2805_v41, %v2756_v21 }
 0x3a1   :  { %v2759_v2 = vpop.f32.mrf.mxu0 }
 0x3a2   :  { %3173 = vst [vmem:[#allocation10 + $0x1c0] sm:$0xff] %v2806_v18 }
 0x3a4   :  { %2954 = vmatmul.bf16.gmra.mxu0 %v5153_v63  ;;  %3052 = vmatmul.bf16.gmra.mxu2 %v5153_v63 }
 0x3a5   :  { %v2903_v26 = vpop.f32.mrf.mxu3 }
 0x3a6   :  { %v2904_v1 = vadd.f32 %v2903_v26, %v2854_v25 }
 0x3a7   :  { %v2808_v36 = vpop.f32.mrf.mxu1  ;;  %v2857_v54 = vpop.f32.mrf.mxu2 }
 0x3a8   :  { %3174 = vst [vmem:[#allocation10 + $0x1c8] sm:$0xff] %v2904_v1  ;;  %v2809_v9 = vadd.f32 %v2808_v36, %v2759_v2 }
 0x3a9   :  { %v2761_v14 = vpop.f32.mrf.mxu0 }
 0x3aa   :  { %3179 = vst [vmem:[#allocation10 + $0x1f0] sm:$0xff] %v2809_v9  ;;  %3003 = vmatmul.bf16.gmra.mxu1 %v5157_v53  ;;  %3101 = vmatmul.bf16.gmra.mxu3 %v5157_v53 }
 0x3ad   :  { %v2906_v44 = vpop.f32.mrf.mxu3 }
 0x3ae   :  { %v2907_v29 = vadd.f32 %v2906_v44, %v2857_v54 }
 0x3af   :  { %v2810_v56 = vpop.f32.mrf.mxu1  ;;  %v2859_v60 = vpop.f32.mrf.mxu2 }
 0x3b0   :  { %3180 = vst [vmem:[#allocation10 + $0x1f8] sm:$0xff] %v2907_v29  ;;  %v2811_v12 = vadd.f32 %v2810_v56, %v2761_v14 }
 0x3b1   :  { %v2764_v15 = vpop.f32.mrf.mxu0 }
 0x3b2   :  { %3185 = vst [vmem:[#allocation10 + $0x220] sm:$0xff] %v2811_v12 }
 0x3b4   :  { %2959 = vmatmul.bf16.gmra.mxu0 %v5161_v30  ;;  %3057 = vmatmul.bf16.gmra.mxu2 %v5161_v30 }
 0x3b5   :  { %v2908_v63 = vpop.f32.mrf.mxu3 }
 0x3b6   :  { %v2909_v33 = vadd.f32 %v2908_v63, %v2859_v60 }
 0x3b7   :  { %v2813_v3 = vpop.f32.mrf.mxu1  ;;  %v2862_v34 = vpop.f32.mrf.mxu2 }
 0x3b8   :  { %3186 = vst [vmem:[#allocation10 + $0x228] sm:$0xff] %v2909_v33  ;;  %v2814_v47 = vadd.f32 %v2813_v3, %v2764_v15 }
 0x3b9   :  { %v2766_v32 = vpop.f32.mrf.mxu0 }
 0x3ba   :  { %3191 = vst [vmem:[#allocation10 + $0x250] sm:$0xff] %v2814_v47  ;;  %3008 = vmatmul.bf16.gmra.mxu1 %v5165_v20  ;;  %3106 = vmatmul.bf16.gmra.mxu3 %v5165_v20 }
 0x3bd   :  { %v2911_v53 = vpop.f32.mrf.mxu3 }
 0x3be   :  { %v2912_v28 = vadd.f32 %v2911_v53, %v2862_v34 }
 0x3bf   :  { %v2815_v22 = vpop.f32.mrf.mxu1  ;;  %v2864_v13 = vpop.f32.mrf.mxu2 }
 0x3c0   :  { %3192 = vst [vmem:[#allocation10 + $0x258] sm:$0xff] %v2912_v28  ;;  %v2816_v51 = vadd.f32 %v2815_v22, %v2766_v32 }
 0x3c1   :  { %v2769_v62 = vpop.f32.mrf.mxu0 }
 0x3c2   :  { %3197 = vst [vmem:[#allocation10 + $0x280] sm:$0xff] %v2816_v51 }
 0x3c4   :  { %2964 = vmatmul.bf16.gmra.mxu0 %v5169_v17  ;;  %3062 = vmatmul.bf16.gmra.mxu2 %v5169_v17 }
 0x3c5   :  { %v2913_v30 = vpop.f32.mrf.mxu3 }
 0x3c6   :  { %v2914_v49 = vadd.f32 %v2913_v30, %v2864_v13 }
 0x3c7   :  { %v2818_v57 = vpop.f32.mrf.mxu1  ;;  %v2867_v55 = vpop.f32.mrf.mxu2 }
 0x3c8   :  { %3198 = vst [vmem:[#allocation10 + $0x288] sm:$0xff] %v2914_v49  ;;  %v2819_v19 = vadd.f32 %v2818_v57, %v2769_v62 }
 0x3c9   :  { %v2771_v61 = vpop.f32.mrf.mxu0 }
 0x3ca   :  { %3203 = vst [vmem:[#allocation10 + $0x2b0] sm:$0xff] %v2819_v19  ;;  %3013 = vmatmul.bf16.gmra.mxu1 %v5173_v46  ;;  %3111 = vmatmul.bf16.gmra.mxu3 %v5173_v46 }
 0x3cd   :  { %v2916_v20 = vpop.f32.mrf.mxu3 }
 0x3ce   :  { %v2917_v45 = vadd.f32 %v2916_v20, %v2867_v55 }
 0x3cf   :  { %v2820_v38 = vpop.f32.mrf.mxu1  ;;  %v2869_v24 = vpop.f32.mrf.mxu2 }
 0x3d0   :  { %3204 = vst [vmem:[#allocation10 + $0x2b8] sm:$0xff] %v2917_v45  ;;  %v2821_v52 = vadd.f32 %v2820_v38, %v2771_v61 }
 0x3d1   :  { %v2930_v58 = vpop.f32.mrf.mxu0 }
 0x3d2   :  { %3209 = vst [vmem:[#allocation10 + $0x2e0] sm:$0xff] %v2821_v52 }
 0x3d5   :  { %v2918_v17 = vpop.f32.mrf.mxu3 }
 0x3d6   :  { %v2919_v16 = vadd.f32 %v2918_v17, %v2869_v24 }
 0x3d7   :  { %v2979_v8 = vpop.f32.mrf.mxu1  ;;  %v3028_v0 = vpop.f32.mrf.mxu2 }
 0x3d8   :  { %3210 = vst [vmem:[#allocation10 + $0x2e8] sm:$0xff] %v2919_v16  ;;  %v2980_v10 = vadd.f32 %v2979_v8, %v2930_v58 }
 0x3d9   :  { %v2932_v11 = vpop.f32.mrf.mxu0 }
 0x3da   :  { %3121 = vst [vmem:[#allocation10 + $0x20] sm:$0xff] %v2980_v10 }
 0x3dd   :  { %v3077_v50 = vpop.f32.mrf.mxu3 }
 0x3de   :  { %v3078_v27 = vadd.f32 %v3077_v50, %v3028_v0 }
 0x3df   :  { %v2981_v59 = vpop.f32.mrf.mxu1  ;;  %v3030_v46 = vpop.f32.mrf.mxu2 }
 0x3e0   :  { %3122 = vst [vmem:[#allocation10 + $0x28] sm:$0xff] %v3078_v27  ;;  %v2982_v43 = vadd.f32 %v2981_v59, %v2932_v11 }
 0x3e1   :  { %v2935_v48 = vpop.f32.mrf.mxu0 }
 0x3e2   :  { %3127 = vst [vmem:[#allocation10 + $0x50] sm:$0xff] %v2982_v43 }
 0x3e5   :  { %v3079_v4 = vpop.f32.mrf.mxu3 }
 0x3e6   :  { %v3080_v5 = vadd.f32 %v3079_v4, %v3030_v46 }
 0x3e7   :  { %v2984_v40 = vpop.f32.mrf.mxu1  ;;  %v3033_v31 = vpop.f32.mrf.mxu2 }
 0x3e8   :  { %3128 = vst [vmem:[#allocation10 + $0x58] sm:$0xff] %v3080_v5  ;;  %v2985_v7 = vadd.f32 %v2984_v40, %v2935_v48 }
 0x3e9   :  { %v2937_v42 = vpop.f32.mrf.mxu0 }
 0x3ea   :  { %3133 = vst [vmem:[#allocation10 + $0x80] sm:$0xff] %v2985_v7 }
 0x3ed   :  { %v3082_v39 = vpop.f32.mrf.mxu3 }
 0x3ee   :  { %v3083_v6 = vadd.f32 %v3082_v39, %v3033_v31 }
 0x3ef   :  { %v2986_v35 = vpop.f32.mrf.mxu1  ;;  %v3035_v21 = vpop.f32.mrf.mxu2 }
 0x3f0   :  { %3134 = vst [vmem:[#allocation10 + $0x88] sm:$0xff] %v3083_v6  ;;  %v2987_v23 = vadd.f32 %v2986_v35, %v2937_v42 }
 0x3f1   :  { %v2940_v37 = vpop.f32.mrf.mxu0 }
 0x3f2   :  { %3139 = vst [vmem:[#allocation10 + $0xb0] sm:$0xff] %v2987_v23 }
 0x3f5   :  { %v3084_v41 = vpop.f32.mrf.mxu3 }
 0x3f6   :  { %v3085_v25 = vadd.f32 %v3084_v41, %v3035_v21 }
 0x3f7   :  { %v2989_v18 = vpop.f32.mrf.mxu1  ;;  %v3038_v2 = vpop.f32.mrf.mxu2 }
 0x3f8   :  { %3140 = vst [vmem:[#allocation10 + $0xb8] sm:$0xff] %v3085_v25  ;;  %v2990_v26 = vadd.f32 %v2989_v18, %v2940_v37 }
 0x3f9   :  { %v2942_v1 = vpop.f32.mrf.mxu0 }
 0x3fa   :  { %3145 = vst [vmem:[#allocation10 + $0xe0] sm:$0xff] %v2990_v26 }
 0x3fd   :  { %v3087_v36 = vpop.f32.mrf.mxu3 }
 0x3fe   :  { %v3088_v54 = vadd.f32 %v3087_v36, %v3038_v2 }
 0x3ff   :  { %v2991_v9 = vpop.f32.mrf.mxu1  ;;  %v3040_v14 = vpop.f32.mrf.mxu2 }
 0x400   :  { %3146 = vst [vmem:[#allocation10 + $0xe8] sm:$0xff] %v3088_v54  ;;  %v2992_v44 = vadd.f32 %v2991_v9, %v2942_v1 }
 0x401   :  { %v2945_v29 = vpop.f32.mrf.mxu0 }
 0x402   :  { %3151 = vst [vmem:[#allocation10 + $0x110] sm:$0xff] %v2992_v44 }
 0x405   :  { %v3089_v56 = vpop.f32.mrf.mxu3 }
 0x406   :  { %v3090_v60 = vadd.f32 %v3089_v56, %v3040_v14 }
 0x407   :  { %v2994_v12 = vpop.f32.mrf.mxu1  ;;  %v3043_v15 = vpop.f32.mrf.mxu2 }
 0x408   :  { %3152 = vst [vmem:[#allocation10 + $0x118] sm:$0xff] %v3090_v60  ;;  %v2995_v63 = vadd.f32 %v2994_v12, %v2945_v29 }
 0x409   :  { %v2947_v33 = vpop.f32.mrf.mxu0 }
 0x40a   :  { %3157 = vst [vmem:[#allocation10 + $0x140] sm:$0xff] %v2995_v63 }
 0x40d   :  { %v3092_v3 = vpop.f32.mrf.mxu3 }
 0x40e   :  { %v3093_v34 = vadd.f32 %v3092_v3, %v3043_v15 }
 0x40f   :  { %v2996_v47 = vpop.f32.mrf.mxu1  ;;  %v3045_v32 = vpop.f32.mrf.mxu2 }
 0x410   :  { %3158 = vst [vmem:[#allocation10 + $0x148] sm:$0xff] %v3093_v34  ;;  %v2997_v53 = vadd.f32 %v2996_v47, %v2947_v33 }
 0x411   :  { %v2950_v28 = vpop.f32.mrf.mxu0 }
 0x412   :  { %3163 = vst [vmem:[#allocation10 + $0x170] sm:$0xff] %v2997_v53 }
 0x415   :  { %v3094_v22 = vpop.f32.mrf.mxu3 }
 0x416   :  { %v3095_v13 = vadd.f32 %v3094_v22, %v3045_v32 }
 0x417   :  { %v2999_v51 = vpop.f32.mrf.mxu1  ;;  %v3048_v62 = vpop.f32.mrf.mxu2 }
 0x418   :  { %3164 = vst [vmem:[#allocation10 + $0x178] sm:$0xff] %v3095_v13  ;;  %v3000_v30 = vadd.f32 %v2999_v51, %v2950_v28 }
 0x419   :  { %v2952_v49 = vpop.f32.mrf.mxu0 }
 0x41a   :  { %3169 = vst [vmem:[#allocation10 + $0x1a0] sm:$0xff] %v3000_v30 }
 0x41d   :  { %v3097_v57 = vpop.f32.mrf.mxu3 }
 0x41e   :  { %v3098_v55 = vadd.f32 %v3097_v57, %v3048_v62 }
 0x41f   :  { %v3001_v19 = vpop.f32.mrf.mxu1  ;;  %v3050_v61 = vpop.f32.mrf.mxu2 }
 0x420   :  { %3170 = vst [vmem:[#allocation10 + $0x1a8] sm:$0xff] %v3098_v55  ;;  %v3002_v20 = vadd.f32 %v3001_v19, %v2952_v49 }
 0x421   :  { %v2955_v45 = vpop.f32.mrf.mxu0 }
 0x422   :  { %3175 = vst [vmem:[#allocation10 + $0x1d0] sm:$0xff] %v3002_v20 }
 0x425   :  { %v3099_v38 = vpop.f32.mrf.mxu3 }
 0x426   :  { %v3100_v24 = vadd.f32 %v3099_v38, %v3050_v61 }
 0x427   :  { %v3004_v52 = vpop.f32.mrf.mxu1  ;;  %v3053_v58 = vpop.f32.mrf.mxu2 }
 0x428   :  { %3176 = vst [vmem:[#allocation10 + $0x1d8] sm:$0xff] %v3100_v24  ;;  %v3005_v17 = vadd.f32 %v3004_v52, %v2955_v45 }
 0x429   :  { %v2957_v16 = vpop.f32.mrf.mxu0 }
 0x42a   :  { %3181 = vst [vmem:[#allocation10 + $0x200] sm:$0xff] %v3005_v17 }
 0x42d   :  { %v3102_v8 = vpop.f32.mrf.mxu3 }
 0x42e   :  { %v3103_v0 = vadd.f32 %v3102_v8, %v3053_v58 }
 0x42f   :  { %v3006_v10 = vpop.f32.mrf.mxu1  ;;  %v3055_v11 = vpop.f32.mrf.mxu2 }
 0x430   :  { %3182 = vst [vmem:[#allocation10 + $0x208] sm:$0xff] %v3103_v0  ;;  %v3007_v50 = vadd.f32 %v3006_v10, %v2957_v16 }
 0x431   :  { %v2960_v27 = vpop.f32.mrf.mxu0 }
 0x432   :  { %3187 = vst [vmem:[#allocation10 + $0x230] sm:$0xff] %v3007_v50 }
 0x435   :  { %v3104_v59 = vpop.f32.mrf.mxu3 }
 0x436   :  { %v3105_v46 = vadd.f32 %v3104_v59, %v3055_v11 }
 0x437   :  { %v3009_v43 = vpop.f32.mrf.mxu1  ;;  %v3058_v48 = vpop.f32.mrf.mxu2 }
 0x438   :  { %3188 = vst [vmem:[#allocation10 + $0x238] sm:$0xff] %v3105_v46  ;;  %v3010_v4 = vadd.f32 %v3009_v43, %v2960_v27 }
 0x439   :  { %v2962_v5 = vpop.f32.mrf.mxu0 }
 0x43a   :  { %3193 = vst [vmem:[#allocation10 + $0x260] sm:$0xff] %v3010_v4 }
 0x43d   :  { %v3107_v40 = vpop.f32.mrf.mxu3 }
 0x43e   :  { %v3108_v31 = vadd.f32 %v3107_v40, %v3058_v48 }
 0x43f   :  { %v3011_v7 = vpop.f32.mrf.mxu1  ;;  %v3060_v39 = vpop.f32.mrf.mxu2 }
 0x440   :  { %3194 = vst [vmem:[#allocation10 + $0x268] sm:$0xff] %v3108_v31  ;;  %v3012_v42 = vadd.f32 %v3011_v7, %v2962_v5 }
 0x441   :  { %v2965_v6 = vpop.f32.mrf.mxu0 }
 0x442   :  { %3199 = vst [vmem:[#allocation10 + $0x290] sm:$0xff] %v3012_v42 }
 0x445   :  { %v3109_v35 = vpop.f32.mrf.mxu3 }
 0x446   :  { %v3110_v21 = vadd.f32 %v3109_v35, %v3060_v39 }
 0x447   :  { %v3014_v23 = vpop.f32.mrf.mxu1  ;;  %v3063_v41 = vpop.f32.mrf.mxu2 }
 0x448   :  { %3200 = vst [vmem:[#allocation10 + $0x298] sm:$0xff] %v3110_v21  ;;  %v3015_v37 = vadd.f32 %v3014_v23, %v2965_v6 }
 0x449   :  { %v2967_v2 = vpop.f32.mrf.mxu0 }
 0x44a   :  { %3205 = vst [vmem:[#allocation10 + $0x2c0] sm:$0xff] %v3015_v37 }
 0x44d   :  { %v3112_v25 = vpop.f32.mrf.mxu3 }
 0x44e   :  { %v3113_v18 = vadd.f32 %v3112_v25, %v3063_v41 }
 0x44f   :  { %v3016_v26 = vpop.f32.mrf.mxu1  ;;  %v3065_v36 = vpop.f32.mrf.mxu2 }
 0x450   :  { %3206 = vst [vmem:[#allocation10 + $0x2c8] sm:$0xff] %v3113_v18  ;;  %v3017_v1 = vadd.f32 %v3016_v26, %v2967_v2 }
 0x452   :  { %3211 = vst [vmem:[#allocation10 + $0x2f0] sm:$0xff] %v3017_v1 }
 0x455   :  { %v3114_v54 = vpop.f32.mrf.mxu3 }
 0x456   :  { %v3115_v9 = vadd.f32 %v3114_v54, %v3065_v36 }
 0x458   :  { %3212 = vst [vmem:[#allocation10 + $0x2f8] sm:$0xff] %v3115_v9 }
 0x459   :  { %3225 = dma.vmem_to_hbm [thread:$0]  %s3218_s3, 12288, %s3220_s13, [#allocation4], %s4742_s14, %s4742_s14, %s4743_s15  }
 0x45a   :  { %4731 = dma.done.wait [#allocation4], 12288  }
 0x45b   :  { %4732 = vsyncadd [#allocation4], 4294955008 }
 0x45c   :  { %3230 = vsyncpa [#allocation3], 1 }
 0x45d   :  { %3231 = vsyncpa [#allocation6], 1 }
 0x45e   :  { %3232 = vsyncpa [#allocation9], 1 }
 0x45f   :  { %3233 = vsyncpa [#allocation4], 1 }

</bundles_post_ra>
